<compile_context>
chip_gen: v7x
topology: tpu7x:2x2x1
jax: 0.10.0
libtpu: 0.0.40
codegen_flags: <defaults>
</compile_context>

<pallas_src>
import jax
import jax.numpy as jnp
import numpy as np
from jax.experimental import pallas as pl
from jax.experimental.pallas import tpu as pltpu

NEG_SLOPE = 0.01  # F.leaky_relu default negative_slope


def _leaky(x):
    return jnp.where(x > 0, x, NEG_SLOPE * x)


# ----------------------------------------------------------------------------
# One-time parameter preparation (kills all runtime transposes/reshapes).
# ----------------------------------------------------------------------------
def prepare_params(params):
    f32, bf16 = jnp.float32, jnp.bfloat16

    enc1_w = params["enc1_w"][0, 0].astype(f32)        # (3, 3)      [i, k]
    enc2_w = params["enc2_w"][0, 0].astype(f32)
    conv1_w = params["conv1_w"][:, 0].astype(f32)       # (32, 4, 4)  [c, i, k]
    conv2_w = params["conv2_w"].astype(f32)              # (32, 32, 2, 2) [d, c, i, j]

    # Row-parity selection matrices (even rows 0,2,..,22 / odd rows 1,..,23).
    sel = np.zeros((2, 12, 24), np.float32)
    for p in range(12):
        sel[0, p, 2 * p] = 1.0
        sel[1, p, 2 * p + 1] = 1.0

    # encode (3x3, 1->1) as per-row-tap Toeplitz matrices over W: 32 -> 30.
    m_enc = np.zeros((3, 32, 30), np.float32)
    for k in range(3):
        for w in range(30):
            m_enc[k, w + k, w] = 1.0
    m_enc = jnp.asarray(m_enc)
    t_enc = jnp.stack([jnp.einsum("ik,kwv->iwv", enc1_w, m_enc),
                       jnp.einsum("ik,kwv->iwv", enc2_w, m_enc)])   # (2,3,32,30)
    enc_b = jnp.full((1, 30), (params["enc1_b"] + params["enc2_b"])[0], f32)

    # conv1 (4x4, 1->32) as per-row-tap Toeplitz matrices over W.  Output
    # columns are ordered (q, j, c): q = conv2 output column, j = conv2 W-tap,
    # c = conv1 output channel  ->  13 * 2 * 32 = 832 columns.
    m1 = np.zeros((30, 13, 2, 4), np.float32)
    for q in range(13):
        for j in range(2):
            for k in range(4):
                m1[2 * q + j + k, q, j, k] = 1.0
    t_conv1 = jnp.einsum("wqjk,cik->iwqjc", jnp.asarray(m1),
                         conv1_w).reshape(4, 30, 832).astype(bf16)
    conv1_b = jnp.tile(params["conv1_b"].astype(f32), 26).reshape(1, 832)

    # conv2 (2x2, stride 2, 32->32) as two block-diagonal matrices (one per
    # row-tap i): rows (q, j, c) = 832, cols (q, d) = 416.
    eye13 = jnp.eye(13, dtype=f32)

    def block_diag(i):
        return jnp.einsum("qQ,dcj->qjcQd", eye13,
                          conv2_w[:, :, i, :]).reshape(832, 416).astype(bf16)

    w2_even, w2_odd = block_diag(0), block_diag(1)
    conv2_b = jnp.tile(params["conv2_b"].astype(f32), 13).reshape(1, 416)

    # fc weight pre-permuted to match the kernel's (row p, col q*32+d) conv2
    # output (torch flattens NCHW -> index d*117 + p*13 + q).  Columns are
    # stacked as (p, o) so the kernel reads 9 diagonal (1,4) blocks.
    fc_w = jnp.transpose(params["fc_w"].astype(f32).reshape(4, 32, 9, 13),
                         (3, 1, 2, 0)).reshape(416, 36)
    fc_b = params["fc_b"].astype(f32).reshape(1, 4)

    return dict(sel=jnp.asarray(sel), t_enc=t_enc, enc_b=enc_b,
                t_conv1=t_conv1, conv1_b=conv1_b,
                w2_even=w2_even, w2_odd=w2_odd, conv2_b=conv2_b,
                fc_w=fc_w, fc_b=fc_b)


# ----------------------------------------------------------------------------
# Fused kernel (one grid step = one batch element, everything VMEM-resident).
# ----------------------------------------------------------------------------
def _inverse_model_kernel(pre_ref, curr_ref, sel_ref, te_ref, encb_ref,
                          t1_ref, b1_ref, w2e_ref, w2o_ref, b2_ref,
                          fcs_ref, fcb_ref, out_ref):
    f32, bf16 = jnp.float32, jnp.bfloat16

    def dot(a, b):
        return jnp.dot(a, b, preferred_element_type=f32)

    pre = pre_ref[0, 0]                       # (24, 32)
    curr = curr_ref[0, 0]
    sel_e, sel_o = sel_ref[0], sel_ref[1]     # (12, 24) 0/1 selection

    pe, po = dot(sel_e, pre), dot(sel_o, pre)     # even / odd input rows (12, 32)
    ce, co = dot(sel_e, curr), dot(sel_o, curr)

    # ---- encode1(pre) + encode2(curr) + leaky  (Toeplitz matmuls over W) ----
    def encode(rp, rc):
        acc = dot(rp[0], te_ref[0, 0]) + dot(rc[0], te_ref[1, 0])
        acc = acc + dot(rp[1], te_ref[0, 1]) + dot(rc[1], te_ref[1, 1])
        acc = acc + dot(rp[2], te_ref[0, 2]) + dot(rc[2], te_ref[1, 2])
        return _leaky(acc + encb_ref[...])

    x0e = encode((pe[0:11], po[0:11], pe[1:12]),
                 (ce[0:11], co[0:11], ce[1:12]))          # (11, 30): rows 0,2,..,20
    x0o = encode((po[0:10], pe[1:11], po[1:11]),
                 (co[0:10], ce[1:11], co[1:11]))          # (10, 30): rows 1,3,..,19

    # ---- conv1 (1->32, k=4) + leaky, Toeplitz over W, split by row parity ---
    lhs_e = (x0e[0:9], x0o[0:9], x0e[1:10], x0o[1:10])    # -> x1 rows 0,2,..,16
    lhs_o = (x0o[0:9], x0e[1:10], x0o[1:10], x0e[2:11])   # -> x1 rows 1,3,..,17
    x1e = dot(lhs_e[0].astype(bf16), t1_ref[0])
    x1o = dot(lhs_o[0].astype(bf16), t1_ref[0])
    for i in range(1, 4):
        x1e = x1e + dot(lhs_e[i].astype(bf16), t1_ref[i])
        x1o = x1o + dot(lhs_o[i].astype(bf16), t1_ref[i])
    x1e = _leaky(x1e + b1_ref[...]).astype(bf16)          # (9, 832), cols (q, j, c)
    x1o = _leaky(x1o + b1_ref[...]).astype(bf16)

    # ---- conv2 (32->32, k=2, s=2) + leaky via block-diagonal weights --------
    # y[p, q*32 + d] = conv2 activation at (row p, col q, channel d).
    y = _leaky(dot(x1e, w2e_ref[...]) + dot(x1o, w2o_ref[...]) + b2_ref[...])

    # ---- fc: pre-permuted weight, contraction over (q, d); sum the 9 ------
    # per-row diagonal (1, 4) blocks to finish the contraction over p.
    ymat = dot(y, fcs_ref[...])                           # (9, 36), cols (p, o)
    out = fcb_ref[...]                                    # (1, 4)
    for p in range(9):
        out = out + ymat[p:p + 1, 4 * p:4 * p + 4]
    out_ref[0] = out


def _full_block_spec(arr):
    shape = arr.shape
    zeros = (0,) * len(shape)
    return pl.BlockSpec(shape, lambda b: zeros)


def inverse_model_forward(prepared, pre_x, curr_x):
    """pre_x, curr_x: NCHW (B, 1, 24, 32) float32, matching the torch module."""
    B = pre_x.shape[0]
    assert pre_x.shape == (B, 1, 24, 32) and curr_x.shape == (B, 1, 24, 32)

    weight_names = ("sel", "t_enc", "enc_b", "t_conv1", "conv1_b",
                    "w2_even", "w2_odd", "conv2_b", "fc_w", "fc_b")
    weights = [prepared[n] for n in weight_names]

    out = pl.pallas_call(
        _inverse_model_kernel,
        out_shape=jax.ShapeDtypeStruct((B, 1, 4), jnp.float32),
        grid=(B,),
        in_specs=[
            pl.BlockSpec((1, 1, 24, 32), lambda b: (b, 0, 0, 0)),
            pl.BlockSpec((1, 1, 24, 32), lambda b: (b, 0, 0, 0)),
        ] + [_full_block_spec(w) for w in weights],
        out_specs=pl.BlockSpec((1, 1, 4), lambda b: (b, 0, 0)),
        compiler_params=pltpu.CompilerParams(
            dimension_semantics=("parallel",),
            vmem_limit_bytes=32 * 1024 * 1024),
    )(pre_x, curr_x, *weights)
    return out.reshape(B, 4)


# ----------------------------------------------------------------------------
# Deterministic parameter init (torch-layout shapes) + pure-JAX reference
# ----------------------------------------------------------------------------
def init_params(key):
    ks = jax.random.split(key, 10)

    def n(k, shape, scale):
        return scale * jax.random.normal(k, shape, jnp.float32)

    return dict(
        enc1_w=n(ks[0], (1, 1, 3, 3), 0.2),  enc1_b=n(ks[1], (1,), 0.1),
        enc2_w=n(ks[2], (1, 1, 3, 3), 0.2),  enc2_b=n(ks[3], (1,), 0.1),
        conv1_w=n(ks[4], (32, 1, 4, 4), 0.2), conv1_b=n(ks[5], (32,), 0.1),
        conv2_w=n(ks[6], (32, 32, 2, 2), 0.1), conv2_b=n(ks[7], (32,), 0.1),
        fc_w=n(ks[8], (4, 3744), 0.02),      fc_b=n(ks[9], (4,), 0.1),
    )


def ref_forward(params, pre_x, curr_x):
    def conv(x, w, b, stride=1):
        y = jax.lax.conv_general_dilated(
            x, w, (stride, stride), "VALID",
            dimension_numbers=("NCHW", "OIHW", "NCHW"))
        return y + b.reshape(1, -1, 1, 1)

    lrelu = lambda v: jnp.where(v > 0, v, NEG_SLOPE * v)
    p = conv(pre_x, params["enc1_w"], params["enc1_b"])
    c = conv(curr_x, params["enc2_w"], params["enc2_b"])
    x = lrelu(p + c)
    x = lrelu(conv(x, params["conv1_w"], params["conv1_b"]))
    x = lrelu(conv(x, params["conv2_w"], params["conv2_b"], stride=2))
    x = x.reshape(x.shape[0], -1)
    return x @ params["fc_w"].T + params["fc_b"]


if __name__ == "__main__":
    key = jax.random.PRNGKey(0)
    k_pre, k_curr, k_params = jax.random.split(key, 3)
    B = 2
    pre_x = jax.random.normal(k_pre, (B, 1, 24, 32), jnp.float32)
    curr_x = jax.random.normal(k_curr, (B, 1, 24, 32), jnp.float32)
    params = init_params(k_params)
    prepared = prepare_params(params)       # one-time weight repacking

    fwd = jax.jit(inverse_model_forward)
    out = jax.block_until_ready(fwd(prepared, pre_x, curr_x))
    assert out.shape == (B, 4), out.shape

    ref = ref_forward(params, pre_x, curr_x)
    np.testing.assert_allclose(np.asarray(out), np.asarray(ref),
                               rtol=2e-2, atol=2e-2)

    print("KERNEL_OK")
</pallas_src>

<mosaic_0001>
module attributes {stable_mosaic.version = 11 : i64} {
  func.func @_inverse_model_kernel(%arg0: i32, %arg1: memref<1x1x24x32xf32, #tpu.memory_space<vmem>>, %arg2: memref<1x1x24x32xf32, #tpu.memory_space<vmem>>, %arg3: memref<2x12x24xf32, #tpu.memory_space<vmem>>, %arg4: memref<2x3x32x30xf32, #tpu.memory_space<vmem>>, %arg5: memref<1x30xf32, #tpu.memory_space<vmem>>, %arg6: memref<4x30x832xbf16, #tpu.memory_space<vmem>>, %arg7: memref<1x832xf32, #tpu.memory_space<vmem>>, %arg8: memref<832x416xbf16, #tpu.memory_space<vmem>>, %arg9: memref<832x416xbf16, #tpu.memory_space<vmem>>, %arg10: memref<1x416xf32, #tpu.memory_space<vmem>>, %arg11: memref<416x36xf32, #tpu.memory_space<vmem>>, %arg12: memref<1x4xf32, #tpu.memory_space<vmem>>, %arg13: memref<1x1x4xf32, #tpu.memory_space<vmem>>) attributes {dimension_semantics = [#tpu.dimension_semantics<parallel>], iteration_bounds = array<i64: 2>, scalar_prefetch = 0 : i64, scratch_operands = 0 : i64, tpu.core_type = #tpu.core_type<tc>, window_params = [{transform_indices = @transform_0, window_bounds = array<i64: 1, 1, 24, 32>}, {transform_indices = @transform_1, window_bounds = array<i64: 1, 1, 24, 32>}, {pipeline_mode = #tpu.pipeline_mode<synchronous>, transform_indices = @transform_2, window_bounds = array<i64: 2, 12, 24>}, {pipeline_mode = #tpu.pipeline_mode<synchronous>, transform_indices = @transform_3, window_bounds = array<i64: 2, 3, 32, 30>}, {pipeline_mode = #tpu.pipeline_mode<synchronous>, transform_indices = @transform_4, window_bounds = array<i64: 1, 30>}, {pipeline_mode = #tpu.pipeline_mode<synchronous>, transform_indices = @transform_5, window_bounds = array<i64: 4, 30, 832>}, {pipeline_mode = #tpu.pipeline_mode<synchronous>, transform_indices = @transform_6, window_bounds = array<i64: 1, 832>}, {pipeline_mode = #tpu.pipeline_mode<synchronous>, transform_indices = @transform_7, window_bounds = array<i64: 832, 416>}, {pipeline_mode = #tpu.pipeline_mode<synchronous>, transform_indices = @transform_8, window_bounds = array<i64: 832, 416>}, {pipeline_mode = #tpu.pipeline_mode<synchronous>, transform_indices = @transform_9, window_bounds = array<i64: 1, 416>}, {pipeline_mode = #tpu.pipeline_mode<synchronous>, transform_indices = @transform_10, window_bounds = array<i64: 416, 36>}, {pipeline_mode = #tpu.pipeline_mode<synchronous>, transform_indices = @transform_11, window_bounds = array<i64: 1, 4>}, {transform_indices = @transform_12, window_bounds = array<i64: 1, 1, 4>}]} {
    %c0 = arith.constant 0 : index
    %c0_0 = arith.constant 0 : index
    %c0_1 = arith.constant 0 : index
    %c0_2 = arith.constant 0 : index
    %0 = vector.load %arg1[%c0, %c0_0, %c0_1, %c0_2] : memref<1x1x24x32xf32, #tpu.memory_space<vmem>>, vector<1x1x24x32xf32>
    %1 = vector.shape_cast %0 : vector<1x1x24x32xf32> to vector<24x32xf32>
    %c0_3 = arith.constant 0 : index
    %c0_4 = arith.constant 0 : index
    %c0_5 = arith.constant 0 : index
    %c0_6 = arith.constant 0 : index
    %2 = vector.load %arg2[%c0_3, %c0_4, %c0_5, %c0_6] : memref<1x1x24x32xf32, #tpu.memory_space<vmem>>, vector<1x1x24x32xf32>
    %3 = vector.shape_cast %2 : vector<1x1x24x32xf32> to vector<24x32xf32>
    %c0_7 = arith.constant 0 : index
    %c0_8 = arith.constant 0 : index
    %c0_9 = arith.constant 0 : index
    %4 = vector.load %arg3[%c0_7, %c0_8, %c0_9] : memref<2x12x24xf32, #tpu.memory_space<vmem>>, vector<1x12x24xf32>
    %5 = vector.shape_cast %4 : vector<1x12x24xf32> to vector<12x24xf32>
    %c1 = arith.constant 1 : index
    %c0_10 = arith.constant 0 : index
    %c0_11 = arith.constant 0 : index
    %6 = vector.load %arg3[%c1, %c0_10, %c0_11] : memref<2x12x24xf32, #tpu.memory_space<vmem>>, vector<1x12x24xf32>
    %7 = vector.shape_cast %6 : vector<1x12x24xf32> to vector<12x24xf32>
    %cst = arith.constant dense<0.000000e+00> : vector<12x32xf32>
    %8 = tpu.matmul %5, %1, %cst {dimension_numbers = #tpu.dot_dimension_numbers<[1], [0], [0], [1], [0, 0, 1, 1], [], []>} : vector<12x24xf32>, vector<24x32xf32>, vector<12x32xf32> -> vector<12x32xf32>
    %cst_12 = arith.constant dense<0.000000e+00> : vector<12x32xf32>
    %9 = tpu.matmul %7, %1, %cst_12 {dimension_numbers = #tpu.dot_dimension_numbers<[1], [0], [0], [1], [0, 0, 1, 1], [], []>} : vector<12x24xf32>, vector<24x32xf32>, vector<12x32xf32> -> vector<12x32xf32>
    %cst_13 = arith.constant dense<0.000000e+00> : vector<12x32xf32>
    %10 = tpu.matmul %5, %3, %cst_13 {dimension_numbers = #tpu.dot_dimension_numbers<[1], [0], [0], [1], [0, 0, 1, 1], [], []>} : vector<12x24xf32>, vector<24x32xf32>, vector<12x32xf32> -> vector<12x32xf32>
    %cst_14 = arith.constant dense<0.000000e+00> : vector<12x32xf32>
    %11 = tpu.matmul %7, %3, %cst_14 {dimension_numbers = #tpu.dot_dimension_numbers<[1], [0], [0], [1], [0, 0, 1, 1], [], []>} : vector<12x24xf32>, vector<24x32xf32>, vector<12x32xf32> -> vector<12x32xf32>
    %12 = vector.extract_strided_slice %8 {offsets = [0, 0], sizes = [11, 32], strides = [1, 1]} : vector<12x32xf32> to vector<11x32xf32>
    %13 = vector.extract_strided_slice %9 {offsets = [0, 0], sizes = [11, 32], strides = [1, 1]} : vector<12x32xf32> to vector<11x32xf32>
    %14 = vector.extract_strided_slice %8 {offsets = [1, 0], sizes = [11, 32], strides = [1, 1]} : vector<12x32xf32> to vector<11x32xf32>
    %15 = vector.extract_strided_slice %10 {offsets = [0, 0], sizes = [11, 32], strides = [1, 1]} : vector<12x32xf32> to vector<11x32xf32>
    %16 = vector.extract_strided_slice %11 {offsets = [0, 0], sizes = [11, 32], strides = [1, 1]} : vector<12x32xf32> to vector<11x32xf32>
    %17 = vector.extract_strided_slice %10 {offsets = [1, 0], sizes = [11, 32], strides = [1, 1]} : vector<12x32xf32> to vector<11x32xf32>
    %c0_15 = arith.constant 0 : index
    %c0_16 = arith.constant 0 : index
    %c0_17 = arith.constant 0 : index
    %c0_18 = arith.constant 0 : index
    %18 = vector.load %arg4[%c0_15, %c0_16, %c0_17, %c0_18] : memref<2x3x32x30xf32, #tpu.memory_space<vmem>>, vector<1x1x32x30xf32>
    %19 = vector.shape_cast %18 : vector<1x1x32x30xf32> to vector<32x30xf32>
    %cst_19 = arith.constant dense<0.000000e+00> : vector<11x30xf32>
    %20 = tpu.matmul %12, %19, %cst_19 {dimension_numbers = #tpu.dot_dimension_numbers<[1], [0], [0], [1], [0, 0, 1, 1], [], []>} : vector<11x32xf32>, vector<32x30xf32>, vector<11x30xf32> -> vector<11x30xf32>
    %c1_20 = arith.constant 1 : index
    %c0_21 = arith.constant 0 : index
    %c0_22 = arith.constant 0 : index
    %c0_23 = arith.constant 0 : index
    %21 = vector.load %arg4[%c1_20, %c0_21, %c0_22, %c0_23] : memref<2x3x32x30xf32, #tpu.memory_space<vmem>>, vector<1x1x32x30xf32>
    %22 = vector.shape_cast %21 : vector<1x1x32x30xf32> to vector<32x30xf32>
    %cst_24 = arith.constant dense<0.000000e+00> : vector<11x30xf32>
    %23 = tpu.matmul %15, %22, %cst_24 {dimension_numbers = #tpu.dot_dimension_numbers<[1], [0], [0], [1], [0, 0, 1, 1], [], []>} : vector<11x32xf32>, vector<32x30xf32>, vector<11x30xf32> -> vector<11x30xf32>
    %24 = arith.addf %20, %23 : vector<11x30xf32>
    %c0_25 = arith.constant 0 : index
    %c1_26 = arith.constant 1 : index
    %c0_27 = arith.constant 0 : index
    %c0_28 = arith.constant 0 : index
    %25 = vector.load %arg4[%c0_25, %c1_26, %c0_27, %c0_28] : memref<2x3x32x30xf32, #tpu.memory_space<vmem>>, vector<1x1x32x30xf32>
    %26 = vector.shape_cast %25 : vector<1x1x32x30xf32> to vector<32x30xf32>
    %cst_29 = arith.constant dense<0.000000e+00> : vector<11x30xf32>
    %27 = tpu.matmul %13, %26, %cst_29 {dimension_numbers = #tpu.dot_dimension_numbers<[1], [0], [0], [1], [0, 0, 1, 1], [], []>} : vector<11x32xf32>, vector<32x30xf32>, vector<11x30xf32> -> vector<11x30xf32>
    %28 = arith.addf %24, %27 : vector<11x30xf32>
    %c1_30 = arith.constant 1 : index
    %c1_31 = arith.constant 1 : index
    %c0_32 = arith.constant 0 : index
    %c0_33 = arith.constant 0 : index
    %29 = vector.load %arg4[%c1_30, %c1_31, %c0_32, %c0_33] : memref<2x3x32x30xf32, #tpu.memory_space<vmem>>, vector<1x1x32x30xf32>
    %30 = vector.shape_cast %29 : vector<1x1x32x30xf32> to vector<32x30xf32>
    %cst_34 = arith.constant dense<0.000000e+00> : vector<11x30xf32>
    %31 = tpu.matmul %16, %30, %cst_34 {dimension_numbers = #tpu.dot_dimension_numbers<[1], [0], [0], [1], [0, 0, 1, 1], [], []>} : vector<11x32xf32>, vector<32x30xf32>, vector<11x30xf32> -> vector<11x30xf32>
    %32 = arith.addf %28, %31 : vector<11x30xf32>
    %c0_35 = arith.constant 0 : index
    %c2 = arith.constant 2 : index
    %c0_36 = arith.constant 0 : index
    %c0_37 = arith.constant 0 : index
    %33 = vector.load %arg4[%c0_35, %c2, %c0_36, %c0_37] : memref<2x3x32x30xf32, #tpu.memory_space<vmem>>, vector<1x1x32x30xf32>
    %34 = vector.shape_cast %33 : vector<1x1x32x30xf32> to vector<32x30xf32>
    %cst_38 = arith.constant dense<0.000000e+00> : vector<11x30xf32>
    %35 = tpu.matmul %14, %34, %cst_38 {dimension_numbers = #tpu.dot_dimension_numbers<[1], [0], [0], [1], [0, 0, 1, 1], [], []>} : vector<11x32xf32>, vector<32x30xf32>, vector<11x30xf32> -> vector<11x30xf32>
    %36 = arith.addf %32, %35 : vector<11x30xf32>
    %c1_39 = arith.constant 1 : index
    %c2_40 = arith.constant 2 : index
    %c0_41 = arith.constant 0 : index
    %c0_42 = arith.constant 0 : index
    %37 = vector.load %arg4[%c1_39, %c2_40, %c0_41, %c0_42] : memref<2x3x32x30xf32, #tpu.memory_space<vmem>>, vector<1x1x32x30xf32>
    %38 = vector.shape_cast %37 : vector<1x1x32x30xf32> to vector<32x30xf32>
    %cst_43 = arith.constant dense<0.000000e+00> : vector<11x30xf32>
    %39 = tpu.matmul %17, %38, %cst_43 {dimension_numbers = #tpu.dot_dimension_numbers<[1], [0], [0], [1], [0, 0, 1, 1], [], []>} : vector<11x32xf32>, vector<32x30xf32>, vector<11x30xf32> -> vector<11x30xf32>
    %40 = arith.addf %36, %39 : vector<11x30xf32>
    %c0_44 = arith.constant 0 : index
    %c0_45 = arith.constant 0 : index
    %41 = vector.load %arg5[%c0_44, %c0_45] : memref<1x30xf32, #tpu.memory_space<vmem>>, vector<1x30xf32>
    %42 = vector.broadcast %41 : vector<1x30xf32> to vector<11x30xf32>
    %43 = arith.addf %40, %42 : vector<11x30xf32>
    %cst_46 = arith.constant 0.000000e+00 : f32
    %44 = vector.broadcast %cst_46 : f32 to vector<11x30xf32>
    %45 = arith.cmpf ogt, %43, %44 : vector<11x30xf32>
    %cst_47 = arith.constant 0.00999999977 : f32
    %46 = vector.broadcast %cst_47 : f32 to vector<11x30xf32>
    %47 = arith.mulf %46, %43 : vector<11x30xf32>
    %48 = arith.select %45, %43, %47 : vector<11x30xi1>, vector<11x30xf32>
    %49 = vector.extract_strided_slice %9 {offsets = [0, 0], sizes = [10, 32], strides = [1, 1]} : vector<12x32xf32> to vector<10x32xf32>
    %50 = vector.extract_strided_slice %8 {offsets = [1, 0], sizes = [10, 32], strides = [1, 1]} : vector<12x32xf32> to vector<10x32xf32>
    %51 = vector.extract_strided_slice %9 {offsets = [1, 0], sizes = [10, 32], strides = [1, 1]} : vector<12x32xf32> to vector<10x32xf32>
    %52 = vector.extract_strided_slice %11 {offsets = [0, 0], sizes = [10, 32], strides = [1, 1]} : vector<12x32xf32> to vector<10x32xf32>
    %53 = vector.extract_strided_slice %10 {offsets = [1, 0], sizes = [10, 32], strides = [1, 1]} : vector<12x32xf32> to vector<10x32xf32>
    %54 = vector.extract_strided_slice %11 {offsets = [1, 0], sizes = [10, 32], strides = [1, 1]} : vector<12x32xf32> to vector<10x32xf32>
    %c0_48 = arith.constant 0 : index
    %c0_49 = arith.constant 0 : index
    %c0_50 = arith.constant 0 : index
    %c0_51 = arith.constant 0 : index
    %55 = vector.load %arg4[%c0_48, %c0_49, %c0_50, %c0_51] : memref<2x3x32x30xf32, #tpu.memory_space<vmem>>, vector<1x1x32x30xf32>
    %56 = vector.shape_cast %55 : vector<1x1x32x30xf32> to vector<32x30xf32>
    %cst_52 = arith.constant dense<0.000000e+00> : vector<10x30xf32>
    %57 = tpu.matmul %49, %56, %cst_52 {dimension_numbers = #tpu.dot_dimension_numbers<[1], [0], [0], [1], [0, 0, 1, 1], [], []>} : vector<10x32xf32>, vector<32x30xf32>, vector<10x30xf32> -> vector<10x30xf32>
    %c1_53 = arith.constant 1 : index
    %c0_54 = arith.constant 0 : index
    %c0_55 = arith.constant 0 : index
    %c0_56 = arith.constant 0 : index
    %58 = vector.load %arg4[%c1_53, %c0_54, %c0_55, %c0_56] : memref<2x3x32x30xf32, #tpu.memory_space<vmem>>, vector<1x1x32x30xf32>
    %59 = vector.shape_cast %58 : vector<1x1x32x30xf32> to vector<32x30xf32>
    %cst_57 = arith.constant dense<0.000000e+00> : vector<10x30xf32>
    %60 = tpu.matmul %52, %59, %cst_57 {dimension_numbers = #tpu.dot_dimension_numbers<[1], [0], [0], [1], [0, 0, 1, 1], [], []>} : vector<10x32xf32>, vector<32x30xf32>, vector<10x30xf32> -> vector<10x30xf32>
    %61 = arith.addf %57, %60 : vector<10x30xf32>
    %c0_58 = arith.constant 0 : index
    %c1_59 = arith.constant 1 : index
    %c0_60 = arith.constant 0 : index
    %c0_61 = arith.constant 0 : index
    %62 = vector.load %arg4[%c0_58, %c1_59, %c0_60, %c0_61] : memref<2x3x32x30xf32, #tpu.memory_space<vmem>>, vector<1x1x32x30xf32>
    %63 = vector.shape_cast %62 : vector<1x1x32x30xf32> to vector<32x30xf32>
    %cst_62 = arith.constant dense<0.000000e+00> : vector<10x30xf32>
    %64 = tpu.matmul %50, %63, %cst_62 {dimension_numbers = #tpu.dot_dimension_numbers<[1], [0], [0], [1], [0, 0, 1, 1], [], []>} : vector<10x32xf32>, vector<32x30xf32>, vector<10x30xf32> -> vector<10x30xf32>
    %65 = arith.addf %61, %64 : vector<10x30xf32>
    %c1_63 = arith.constant 1 : index
    %c1_64 = arith.constant 1 : index
    %c0_65 = arith.constant 0 : index
    %c0_66 = arith.constant 0 : index
    %66 = vector.load %arg4[%c1_63, %c1_64, %c0_65, %c0_66] : memref<2x3x32x30xf32, #tpu.memory_space<vmem>>, vector<1x1x32x30xf32>
    %67 = vector.shape_cast %66 : vector<1x1x32x30xf32> to vector<32x30xf32>
    %cst_67 = arith.constant dense<0.000000e+00> : vector<10x30xf32>
    %68 = tpu.matmul %53, %67, %cst_67 {dimension_numbers = #tpu.dot_dimension_numbers<[1], [0], [0], [1], [0, 0, 1, 1], [], []>} : vector<10x32xf32>, vector<32x30xf32>, vector<10x30xf32> -> vector<10x30xf32>
    %69 = arith.addf %65, %68 : vector<10x30xf32>
    %c0_68 = arith.constant 0 : index
    %c2_69 = arith.constant 2 : index
    %c0_70 = arith.constant 0 : index
    %c0_71 = arith.constant 0 : index
    %70 = vector.load %arg4[%c0_68, %c2_69, %c0_70, %c0_71] : memref<2x3x32x30xf32, #tpu.memory_space<vmem>>, vector<1x1x32x30xf32>
    %71 = vector.shape_cast %70 : vector<1x1x32x30xf32> to vector<32x30xf32>
    %cst_72 = arith.constant dense<0.000000e+00> : vector<10x30xf32>
    %72 = tpu.matmul %51, %71, %cst_72 {dimension_numbers = #tpu.dot_dimension_numbers<[1], [0], [0], [1], [0, 0, 1, 1], [], []>} : vector<10x32xf32>, vector<32x30xf32>, vector<10x30xf32> -> vector<10x30xf32>
    %73 = arith.addf %69, %72 : vector<10x30xf32>
    %c1_73 = arith.constant 1 : index
    %c2_74 = arith.constant 2 : index
    %c0_75 = arith.constant 0 : index
    %c0_76 = arith.constant 0 : index
    %74 = vector.load %arg4[%c1_73, %c2_74, %c0_75, %c0_76] : memref<2x3x32x30xf32, #tpu.memory_space<vmem>>, vector<1x1x32x30xf32>
    %75 = vector.shape_cast %74 : vector<1x1x32x30xf32> to vector<32x30xf32>
    %cst_77 = arith.constant dense<0.000000e+00> : vector<10x30xf32>
    %76 = tpu.matmul %54, %75, %cst_77 {dimension_numbers = #tpu.dot_dimension_numbers<[1], [0], [0], [1], [0, 0, 1, 1], [], []>} : vector<10x32xf32>, vector<32x30xf32>, vector<10x30xf32> -> vector<10x30xf32>
    %77 = arith.addf %73, %76 : vector<10x30xf32>
    %c0_78 = arith.constant 0 : index
    %c0_79 = arith.constant 0 : index
    %78 = vector.load %arg5[%c0_78, %c0_79] : memref<1x30xf32, #tpu.memory_space<vmem>>, vector<1x30xf32>
    %79 = vector.broadcast %78 : vector<1x30xf32> to vector<10x30xf32>
    %80 = arith.addf %77, %79 : vector<10x30xf32>
    %cst_80 = arith.constant 0.000000e+00 : f32
    %81 = vector.broadcast %cst_80 : f32 to vector<10x30xf32>
    %82 = arith.cmpf ogt, %80, %81 : vector<10x30xf32>
    %cst_81 = arith.constant 0.00999999977 : f32
    %83 = vector.broadcast %cst_81 : f32 to vector<10x30xf32>
    %84 = arith.mulf %83, %80 : vector<10x30xf32>
    %85 = arith.select %82, %80, %84 : vector<10x30xi1>, vector<10x30xf32>
    %86 = vector.extract_strided_slice %48 {offsets = [0, 0], sizes = [9, 30], strides = [1, 1]} : vector<11x30xf32> to vector<9x30xf32>
    %87 = vector.extract_strided_slice %85 {offsets = [0, 0], sizes = [9, 30], strides = [1, 1]} : vector<10x30xf32> to vector<9x30xf32>
    %88 = vector.extract_strided_slice %48 {offsets = [1, 0], sizes = [9, 30], strides = [1, 1]} : vector<11x30xf32> to vector<9x30xf32>
    %89 = vector.extract_strided_slice %85 {offsets = [1, 0], sizes = [9, 30], strides = [1, 1]} : vector<10x30xf32> to vector<9x30xf32>
    %90 = vector.extract_strided_slice %85 {offsets = [0, 0], sizes = [9, 30], strides = [1, 1]} : vector<10x30xf32> to vector<9x30xf32>
    %91 = vector.extract_strided_slice %48 {offsets = [1, 0], sizes = [9, 30], strides = [1, 1]} : vector<11x30xf32> to vector<9x30xf32>
    %92 = vector.extract_strided_slice %85 {offsets = [1, 0], sizes = [9, 30], strides = [1, 1]} : vector<10x30xf32> to vector<9x30xf32>
    %93 = vector.extract_strided_slice %48 {offsets = [2, 0], sizes = [9, 30], strides = [1, 1]} : vector<11x30xf32> to vector<9x30xf32>
    %94 = arith.truncf %86 : vector<9x30xf32> to vector<9x30xbf16>
    %c0_82 = arith.constant 0 : index
    %c0_83 = arith.constant 0 : index
    %c0_84 = arith.constant 0 : index
    %95 = vector.load %arg6[%c0_82, %c0_83, %c0_84] : memref<4x30x832xbf16, #tpu.memory_space<vmem>>, vector<1x30x832xbf16>
    %96 = vector.shape_cast %95 : vector<1x30x832xbf16> to vector<30x832xbf16>
    %cst_85 = arith.constant dense<0.000000e+00> : vector<9x832xf32>
    %97 = tpu.matmul %94, %96, %cst_85 {dimension_numbers = #tpu.dot_dimension_numbers<[1], [0], [0], [1], [0, 0, 1, 1], [], []>} : vector<9x30xbf16>, vector<30x832xbf16>, vector<9x832xf32> -> vector<9x832xf32>
    %98 = arith.truncf %90 : vector<9x30xf32> to vector<9x30xbf16>
    %c0_86 = arith.constant 0 : index
    %c0_87 = arith.constant 0 : index
    %c0_88 = arith.constant 0 : index
    %99 = vector.load %arg6[%c0_86, %c0_87, %c0_88] : memref<4x30x832xbf16, #tpu.memory_space<vmem>>, vector<1x30x832xbf16>
    %100 = vector.shape_cast %99 : vector<1x30x832xbf16> to vector<30x832xbf16>
    %cst_89 = arith.constant dense<0.000000e+00> : vector<9x832xf32>
    %101 = tpu.matmul %98, %100, %cst_89 {dimension_numbers = #tpu.dot_dimension_numbers<[1], [0], [0], [1], [0, 0, 1, 1], [], []>} : vector<9x30xbf16>, vector<30x832xbf16>, vector<9x832xf32> -> vector<9x832xf32>
    %102 = arith.truncf %87 : vector<9x30xf32> to vector<9x30xbf16>
    %c1_90 = arith.constant 1 : index
    %c0_91 = arith.constant 0 : index
    %c0_92 = arith.constant 0 : index
    %103 = vector.load %arg6[%c1_90, %c0_91, %c0_92] : memref<4x30x832xbf16, #tpu.memory_space<vmem>>, vector<1x30x832xbf16>
    %104 = vector.shape_cast %103 : vector<1x30x832xbf16> to vector<30x832xbf16>
    %cst_93 = arith.constant dense<0.000000e+00> : vector<9x832xf32>
    %105 = tpu.matmul %102, %104, %cst_93 {dimension_numbers = #tpu.dot_dimension_numbers<[1], [0], [0], [1], [0, 0, 1, 1], [], []>} : vector<9x30xbf16>, vector<30x832xbf16>, vector<9x832xf32> -> vector<9x832xf32>
    %106 = arith.addf %97, %105 : vector<9x832xf32>
    %107 = arith.truncf %91 : vector<9x30xf32> to vector<9x30xbf16>
    %c1_94 = arith.constant 1 : index
    %c0_95 = arith.constant 0 : index
    %c0_96 = arith.constant 0 : index
    %108 = vector.load %arg6[%c1_94, %c0_95, %c0_96] : memref<4x30x832xbf16, #tpu.memory_space<vmem>>, vector<1x30x832xbf16>
    %109 = vector.shape_cast %108 : vector<1x30x832xbf16> to vector<30x832xbf16>
    %cst_97 = arith.constant dense<0.000000e+00> : vector<9x832xf32>
    %110 = tpu.matmul %107, %109, %cst_97 {dimension_numbers = #tpu.dot_dimension_numbers<[1], [0], [0], [1], [0, 0, 1, 1], [], []>} : vector<9x30xbf16>, vector<30x832xbf16>, vector<9x832xf32> -> vector<9x832xf32>
    %111 = arith.addf %101, %110 : vector<9x832xf32>
    %112 = arith.truncf %88 : vector<9x30xf32> to vector<9x30xbf16>
    %c2_98 = arith.constant 2 : index
    %c0_99 = arith.constant 0 : index
    %c0_100 = arith.constant 0 : index
    %113 = vector.load %arg6[%c2_98, %c0_99, %c0_100] : memref<4x30x832xbf16, #tpu.memory_space<vmem>>, vector<1x30x832xbf16>
    %114 = vector.shape_cast %113 : vector<1x30x832xbf16> to vector<30x832xbf16>
    %cst_101 = arith.constant dense<0.000000e+00> : vector<9x832xf32>
    %115 = tpu.matmul %112, %114, %cst_101 {dimension_numbers = #tpu.dot_dimension_numbers<[1], [0], [0], [1], [0, 0, 1, 1], [], []>} : vector<9x30xbf16>, vector<30x832xbf16>, vector<9x832xf32> -> vector<9x832xf32>
    %116 = arith.addf %106, %115 : vector<9x832xf32>
    %117 = arith.truncf %92 : vector<9x30xf32> to vector<9x30xbf16>
    %c2_102 = arith.constant 2 : index
    %c0_103 = arith.constant 0 : index
    %c0_104 = arith.constant 0 : index
    %118 = vector.load %arg6[%c2_102, %c0_103, %c0_104] : memref<4x30x832xbf16, #tpu.memory_space<vmem>>, vector<1x30x832xbf16>
    %119 = vector.shape_cast %118 : vector<1x30x832xbf16> to vector<30x832xbf16>
    %cst_105 = arith.constant dense<0.000000e+00> : vector<9x832xf32>
    %120 = tpu.matmul %117, %119, %cst_105 {dimension_numbers = #tpu.dot_dimension_numbers<[1], [0], [0], [1], [0, 0, 1, 1], [], []>} : vector<9x30xbf16>, vector<30x832xbf16>, vector<9x832xf32> -> vector<9x832xf32>
    %121 = arith.addf %111, %120 : vector<9x832xf32>
    %122 = arith.truncf %89 : vector<9x30xf32> to vector<9x30xbf16>
    %c3 = arith.constant 3 : index
    %c0_106 = arith.constant 0 : index
    %c0_107 = arith.constant 0 : index
    %123 = vector.load %arg6[%c3, %c0_106, %c0_107] : memref<4x30x832xbf16, #tpu.memory_space<vmem>>, vector<1x30x832xbf16>
    %124 = vector.shape_cast %123 : vector<1x30x832xbf16> to vector<30x832xbf16>
    %cst_108 = arith.constant dense<0.000000e+00> : vector<9x832xf32>
    %125 = tpu.matmul %122, %124, %cst_108 {dimension_numbers = #tpu.dot_dimension_numbers<[1], [0], [0], [1], [0, 0, 1, 1], [], []>} : vector<9x30xbf16>, vector<30x832xbf16>, vector<9x832xf32> -> vector<9x832xf32>
    %126 = arith.addf %116, %125 : vector<9x832xf32>
    %127 = arith.truncf %93 : vector<9x30xf32> to vector<9x30xbf16>
    %c3_109 = arith.constant 3 : index
    %c0_110 = arith.constant 0 : index
    %c0_111 = arith.constant 0 : index
    %128 = vector.load %arg6[%c3_109, %c0_110, %c0_111] : memref<4x30x832xbf16, #tpu.memory_space<vmem>>, vector<1x30x832xbf16>
    %129 = vector.shape_cast %128 : vector<1x30x832xbf16> to vector<30x832xbf16>
    %cst_112 = arith.constant dense<0.000000e+00> : vector<9x832xf32>
    %130 = tpu.matmul %127, %129, %cst_112 {dimension_numbers = #tpu.dot_dimension_numbers<[1], [0], [0], [1], [0, 0, 1, 1], [], []>} : vector<9x30xbf16>, vector<30x832xbf16>, vector<9x832xf32> -> vector<9x832xf32>
    %131 = arith.addf %121, %130 : vector<9x832xf32>
    %c0_113 = arith.constant 0 : index
    %c0_114 = arith.constant 0 : index
    %132 = vector.load %arg7[%c0_113, %c0_114] : memref<1x832xf32, #tpu.memory_space<vmem>>, vector<1x832xf32>
    %133 = vector.broadcast %132 : vector<1x832xf32> to vector<9x832xf32>
    %134 = arith.addf %126, %133 : vector<9x832xf32>
    %cst_115 = arith.constant 0.000000e+00 : f32
    %135 = vector.broadcast %cst_115 : f32 to vector<9x832xf32>
    %136 = arith.cmpf ogt, %134, %135 : vector<9x832xf32>
    %cst_116 = arith.constant 0.00999999977 : f32
    %137 = vector.broadcast %cst_116 : f32 to vector<9x832xf32>
    %138 = arith.mulf %137, %134 : vector<9x832xf32>
    %139 = arith.select %136, %134, %138 : vector<9x832xi1>, vector<9x832xf32>
    %140 = arith.truncf %139 : vector<9x832xf32> to vector<9x832xbf16>
    %c0_117 = arith.constant 0 : index
    %c0_118 = arith.constant 0 : index
    %141 = vector.load %arg7[%c0_117, %c0_118] : memref<1x832xf32, #tpu.memory_space<vmem>>, vector<1x832xf32>
    %142 = vector.broadcast %141 : vector<1x832xf32> to vector<9x832xf32>
    %143 = arith.addf %131, %142 : vector<9x832xf32>
    %cst_119 = arith.constant 0.000000e+00 : f32
    %144 = vector.broadcast %cst_119 : f32 to vector<9x832xf32>
    %145 = arith.cmpf ogt, %143, %144 : vector<9x832xf32>
    %cst_120 = arith.constant 0.00999999977 : f32
    %146 = vector.broadcast %cst_120 : f32 to vector<9x832xf32>
    %147 = arith.mulf %146, %143 : vector<9x832xf32>
    %148 = arith.select %145, %143, %147 : vector<9x832xi1>, vector<9x832xf32>
    %149 = arith.truncf %148 : vector<9x832xf32> to vector<9x832xbf16>
    %c0_121 = arith.constant 0 : index
    %c0_122 = arith.constant 0 : index
    %150 = vector.load %arg8[%c0_121, %c0_122] : memref<832x416xbf16, #tpu.memory_space<vmem>>, vector<832x416xbf16>
    %cst_123 = arith.constant dense<0.000000e+00> : vector<9x416xf32>
    %151 = tpu.matmul %140, %150, %cst_123 {dimension_numbers = #tpu.dot_dimension_numbers<[1], [0], [0], [1], [0, 0, 1, 1], [], []>} : vector<9x832xbf16>, vector<832x416xbf16>, vector<9x416xf32> -> vector<9x416xf32>
    %c0_124 = arith.constant 0 : index
    %c0_125 = arith.constant 0 : index
    %152 = vector.load %arg9[%c0_124, %c0_125] : memref<832x416xbf16, #tpu.memory_space<vmem>>, vector<832x416xbf16>
    %cst_126 = arith.constant dense<0.000000e+00> : vector<9x416xf32>
    %153 = tpu.matmul %149, %152, %cst_126 {dimension_numbers = #tpu.dot_dimension_numbers<[1], [0], [0], [1], [0, 0, 1, 1], [], []>} : vector<9x832xbf16>, vector<832x416xbf16>, vector<9x416xf32> -> vector<9x416xf32>
    %154 = arith.addf %151, %153 : vector<9x416xf32>
    %c0_127 = arith.constant 0 : index
    %c0_128 = arith.constant 0 : index
    %155 = vector.load %arg10[%c0_127, %c0_128] : memref<1x416xf32, #tpu.memory_space<vmem>>, vector<1x416xf32>
    %156 = vector.broadcast %155 : vector<1x416xf32> to vector<9x416xf32>
    %157 = arith.addf %154, %156 : vector<9x416xf32>
    %cst_129 = arith.constant 0.000000e+00 : f32
    %158 = vector.broadcast %cst_129 : f32 to vector<9x416xf32>
    %159 = arith.cmpf ogt, %157, %158 : vector<9x416xf32>
    %cst_130 = arith.constant 0.00999999977 : f32
    %160 = vector.broadcast %cst_130 : f32 to vector<9x416xf32>
    %161 = arith.mulf %160, %157 : vector<9x416xf32>
    %162 = arith.select %159, %157, %161 : vector<9x416xi1>, vector<9x416xf32>
    %c0_131 = arith.constant 0 : index
    %c0_132 = arith.constant 0 : index
    %163 = vector.load %arg11[%c0_131, %c0_132] : memref<416x36xf32, #tpu.memory_space<vmem>>, vector<416x36xf32>
    %cst_133 = arith.constant dense<0.000000e+00> : vector<9x36xf32>
    %164 = tpu.matmul %162, %163, %cst_133 {dimension_numbers = #tpu.dot_dimension_numbers<[1], [0], [0], [1], [0, 0, 1, 1], [], []>} : vector<9x416xf32>, vector<416x36xf32>, vector<9x36xf32> -> vector<9x36xf32>
    %c0_134 = arith.constant 0 : index
    %c0_135 = arith.constant 0 : index
    %165 = vector.load %arg12[%c0_134, %c0_135] : memref<1x4xf32, #tpu.memory_space<vmem>>, vector<1x4xf32>
    %166 = vector.extract_strided_slice %164 {offsets = [0, 0], sizes = [1, 4], strides = [1, 1]} : vector<9x36xf32> to vector<1x4xf32>
    %167 = arith.addf %165, %166 : vector<1x4xf32>
    %168 = vector.extract_strided_slice %164 {offsets = [1, 4], sizes = [1, 4], strides = [1, 1]} : vector<9x36xf32> to vector<1x4xf32>
    %169 = arith.addf %167, %168 : vector<1x4xf32>
    %170 = vector.extract_strided_slice %164 {offsets = [2, 8], sizes = [1, 4], strides = [1, 1]} : vector<9x36xf32> to vector<1x4xf32>
    %171 = arith.addf %169, %170 : vector<1x4xf32>
    %172 = vector.extract_strided_slice %164 {offsets = [3, 12], sizes = [1, 4], strides = [1, 1]} : vector<9x36xf32> to vector<1x4xf32>
    %173 = arith.addf %171, %172 : vector<1x4xf32>
    %174 = vector.extract_strided_slice %164 {offsets = [4, 16], sizes = [1, 4], strides = [1, 1]} : vector<9x36xf32> to vector<1x4xf32>
    %175 = arith.addf %173, %174 : vector<1x4xf32>
    %176 = vector.extract_strided_slice %164 {offsets = [5, 20], sizes = [1, 4], strides = [1, 1]} : vector<9x36xf32> to vector<1x4xf32>
    %177 = arith.addf %175, %176 : vector<1x4xf32>
    %178 = vector.extract_strided_slice %164 {offsets = [6, 24], sizes = [1, 4], strides = [1, 1]} : vector<9x36xf32> to vector<1x4xf32>
    %179 = arith.addf %177, %178 : vector<1x4xf32>
    %180 = vector.extract_strided_slice %164 {offsets = [7, 28], sizes = [1, 4], strides = [1, 1]} : vector<9x36xf32> to vector<1x4xf32>
    %181 = arith.addf %179, %180 : vector<1x4xf32>
    %182 = vector.extract_strided_slice %164 {offsets = [8, 32], sizes = [1, 4], strides = [1, 1]} : vector<9x36xf32> to vector<1x4xf32>
    %183 = arith.addf %181, %182 : vector<1x4xf32>
    %c0_136 = arith.constant 0 : index
    %c0_137 = arith.constant 0 : index
    %c0_138 = arith.constant 0 : index
    %184 = vector.load %arg13[%c0_136, %c0_137, %c0_138] : memref<1x1x4xf32, #tpu.memory_space<vmem>>, vector<1x1x4xf32>
    %185 = vector.shape_cast %184 : vector<1x1x4xf32> to vector<1x4xf32>
    %186 = vector.shape_cast %183 : vector<1x4xf32> to vector<1x1x4xf32>
    tpu.vector_store %arg13[%c0_136, %c0_137, %c0_138], %186 {strides = array<i32>} : memref<1x1x4xf32, #tpu.memory_space<vmem>>, vector<1x1x4xf32>,
    return
  }
  func.func @transform_0(%arg0: i32) -> (i32, i32, i32, i32) {
    %c0_i32 = arith.constant 0 : i32
    %c0_i32_0 = arith.constant 0 : i32
    %c0_i32_1 = arith.constant 0 : i32
    %c0_i32_2 = arith.constant 0 : i32
    return %arg0, %c0_i32, %c0_i32_0, %c0_i32_1 : i32, i32, i32, i32
  }
  func.func @transform_1(%arg0: i32) -> (i32, i32, i32, i32) {
    %c0_i32 = arith.constant 0 : i32
    %c0_i32_0 = arith.constant 0 : i32
    %c0_i32_1 = arith.constant 0 : i32
    %c0_i32_2 = arith.constant 0 : i32
    return %arg0, %c0_i32, %c0_i32_0, %c0_i32_1 : i32, i32, i32, i32
  }
  func.func @transform_2(%arg0: i32) -> (i32, i32, i32) {
    %c0_i32 = arith.constant 0 : i32
    %c0_i32_0 = arith.constant 0 : i32
    %c0_i32_1 = arith.constant 0 : i32
    %c0_i32_2 = arith.constant 0 : i32
    return %c0_i32, %c0_i32_0, %c0_i32_1 : i32, i32, i32
  }
  func.func @transform_3(%arg0: i32) -> (i32, i32, i32, i32) {
    %c0_i32 = arith.constant 0 : i32
    %c0_i32_0 = arith.constant 0 : i32
    %c0_i32_1 = arith.constant 0 : i32
    %c0_i32_2 = arith.constant 0 : i32
    %c0_i32_3 = arith.constant 0 : i32
    return %c0_i32, %c0_i32_0, %c0_i32_1, %c0_i32_2 : i32, i32, i32, i32
  }
  func.func @transform_4(%arg0: i32) -> (i32, i32) {
    %c0_i32 = arith.constant 0 : i32
    %c0_i32_0 = arith.constant 0 : i32
    %c0_i32_1 = arith.constant 0 : i32
    return %c0_i32, %c0_i32_0 : i32, i32
  }
  func.func @transform_5(%arg0: i32) -> (i32, i32, i32) {
    %c0_i32 = arith.constant 0 : i32
    %c0_i32_0 = arith.constant 0 : i32
    %c0_i32_1 = arith.constant 0 : i32
    %c0_i32_2 = arith.constant 0 : i32
    return %c0_i32, %c0_i32_0, %c0_i32_1 : i32, i32, i32
  }
  func.func @transform_6(%arg0: i32) -> (i32, i32) {
    %c0_i32 = arith.constant 0 : i32
    %c0_i32_0 = arith.constant 0 : i32
    %c0_i32_1 = arith.constant 0 : i32
    return %c0_i32, %c0_i32_0 : i32, i32
  }
  func.func @transform_7(%arg0: i32) -> (i32, i32) {
    %c0_i32 = arith.constant 0 : i32
    %c0_i32_0 = arith.constant 0 : i32
    %c0_i32_1 = arith.constant 0 : i32
    return %c0_i32, %c0_i32_0 : i32, i32
  }
  func.func @transform_8(%arg0: i32) -> (i32, i32) {
    %c0_i32 = arith.constant 0 : i32
    %c0_i32_0 = arith.constant 0 : i32
    %c0_i32_1 = arith.constant 0 : i32
    return %c0_i32, %c0_i32_0 : i32, i32
  }
  func.func @transform_9(%arg0: i32) -> (i32, i32) {
    %c0_i32 = arith.constant 0 : i32
    %c0_i32_0 = arith.constant 0 : i32
    %c0_i32_1 = arith.constant 0 : i32
    return %c0_i32, %c0_i32_0 : i32, i32
  }
  func.func @transform_10(%arg0: i32) -> (i32, i32) {
    %c0_i32 = arith.constant 0 : i32
    %c0_i32_0 = arith.constant 0 : i32
    %c0_i32_1 = arith.constant 0 : i32
    return %c0_i32, %c0_i32_0 : i32, i32
  }
  func.func @transform_11(%arg0: i32) -> (i32, i32) {
    %c0_i32 = arith.constant 0 : i32
    %c0_i32_0 = arith.constant 0 : i32
    %c0_i32_1 = arith.constant 0 : i32
    return %c0_i32, %c0_i32_0 : i32, i32
  }
  func.func @transform_12(%arg0: i32) -> (i32, i32, i32) {
    %c0_i32 = arith.constant 0 : i32
    %c0_i32_0 = arith.constant 0 : i32
    %c0_i32_1 = arith.constant 0 : i32
    return %arg0, %c0_i32, %c0_i32_0 : i32, i32, i32
  }
}

</mosaic_0001>

<bundles_post_ra>
// kernel: inverse_model_forward.1
= control target key start
LH: loop header
LB: loop body
LE: loop exit
PB: predicated region body
PF: predicated region fallthrough
CT: control target
= control target key end

     0   :  { %17 = vsyncpa [#allocation3], 0  ;;  %s11953_s0 = inlined_call_operand.vmem [shape: f32[2,1,24,32], index: 0, kind: input, shape index: {}]   ;;  %s11954_s1 = inlined_call_operand.vmem [shape: f32[2,1,24,32], index: 1, kind: input, shape index: {}]   ;;  %s11955_s2 = inlined_call_operand.vmem [shape: f32[2,12,24], index: 2, kind: input, shape index: {}]   ;;  %s11956_s3 = inlined_call_operand.vmem [shape: f32[2,3,32,30], index: 3, kind: input, shape index: {}]   ;;  %s11957_s4 = inlined_call_operand.vmem [shape: f32[1,30], index: 4, kind: input, shape index: {}]   ;;  %s11958_s5 = inlined_call_operand.vmem [shape: bf16[4,30,832], index: 5, kind: input, shape index: {}]   ;;  %s11959_s6 = inlined_call_operand.vmem [shape: f32[1,832], index: 6, kind: input, shape index: {}]   ;;  %s11960_s7 = inlined_call_operand.vmem [shape: bf16[832,416], index: 7, kind: input, shape index: {}]   ;;  %s11961_s8 = inlined_call_operand.vmem [shape: bf16[832,416], index: 8, kind: input, shape index: {}]   ;;  %s11962_s9 = inlined_call_operand.vmem [shape: f32[1,416], index: 9, kind: input, shape index: {}]   ;;  %s11963_s10 = inlined_call_operand.vmem [shape: f32[416,36], index: 10, kind: input, shape index: {}]   ;;  %s11964_s11 = inlined_call_operand.vmem [shape: f32[1,4], index: 11, kind: input, shape index: {}]   ;;  %s11965_s12 = inlined_call_operand.hbm [shape: f32[2,1,4], index: 12, kind: output, shape index: {}]  }
   0x1   :  { %19 = vsyncpa [#allocation3 + $0x1], 0  ;;  %s9688_s21 = smov 0   ;;  %s9690_s22 = smov 0  }
   0x2   :  { %s9692_s23 = smov 0   ;;  %s9694_s24 = smov 0  }
   0x3 LB: > { %11967 = sst [smem:[#allocation5_spill]] %s9603_s23  ;;  %s9709_s25 = sadd.s32 4294967295, %s9607_s24   ;;  %s9607_s24 = sphi %s9694_s24, %s11976_s24   ;;  %s9603_s23 = sphi %s9692_s23, %s11975_s23   ;;  %s9599_s22 = sphi %s9690_s22, %s11974_s22   ;;  %s9595_s21 = sphi %s9688_s21, %s11973_s21  }
   0x4   : > { %s7434_s26 = sadd.s32 4294967294, %s9607_s24   ;;  %s9713_s27 = sadd.s32 1, %s9607_s24  }
   0x5   : > { %s294_s28 = sadd.s32 1, %s9603_s23  ;;  %s291_s29 = ssub.s32 %s9607_s24, %s9713_s27 }
   0x6   : > { %p304_p0 = scmp.ne.s32.totalorder %s9603_s23, %s9599_s22  ;;  %p292_p1 = scmp.eq.s32.totalorder %s291_s29, 0 }
   0x7   : > { %p305_p2 = scmp.eq.s32.totalorder %s9709_s25, 1  ;;  %p310_p3 = scmp.ne.s32.totalorder %s9599_s22, %s9595_s21 }
   0x8   : > { %p311_p4 = scmp.eq.s32.totalorder %s7434_s26, 1  ;;  %p7437_p7 = scmp.ge.s32.totalorder %s9607_s24, 1 }
   0x9   : > { %s9724_s30 = scalar_select %p292_p1, %s9603_s23, %s294_s28  }
   0xa   : > { %p9726_p5 = por %p305_p2, %p304_p0  ;;  %p9730_p6 = por %p311_p4, %p310_p3 }
   0xb   : > { %11968 = sst [smem:[#allocation6_spill]] %s9724_s30  ;;  %p375_p8 = scmp.lt.s32.totalorder %s9607_s24, 3 }
   0xd   : > { %p376_p9 = pnand %p7437_p7, %p375_p8 }
   0xe   : > { %p421_p10 = scmp.lt.s32.totalorder (!%p376_p9), %s9709_s25, 1  ;;  %v7440_v0 = vld [vmem:[%s11955_s2 + $0x10] sm:$0xff] (!%p376_p9)  ;;  %vm443_vm0 = vcmask (!%p376_p9), 195584   ;;  %v438_v1 = vld [vmem:[%s11955_s2] sm:$0xff] (!%p376_p9)  ;;  %v7451_v11 = vld [vmem:[%s11956_s3 + $0x68] sm:$0xff] (!%p376_p9)  ;;  %vm765_vm1 = vcmask (!%p376_p9), 261120  }
   0xf   : > { %379 = sbr.rel (%p376_p9) target bundleno = 1795 (0x703), region = 68  ;;  %8267 = vmatprep.mubr.msk.f32.mxu1 (!%p376_p9), %vm443_vm0, %v7440_v0  ;;  %8240 = vmatprep.mubr.msk.f32.mxu0 (!%p376_p9), %vm443_vm0, %v438_v1  ;;  %v7450_v10 = vld [vmem:[%s11956_s3 + $0x60] sm:$0xff] (!%p376_p9)  ;;  %v7441_v12 = vld [vmem:[%s11955_s2 + $0x18] sm:$0xf] (!%p376_p9)  ;;  %v439_v13 = vld [vmem:[%s11955_s2 + $0x8] sm:$0xf] (!%p376_p9) }
  0x10   : > { %v7452_v14 = vld [vmem:[%s11956_s3 + $0x70] sm:$0xff] (!%p376_p9)  ;;  %v7453_v15 = vld [vmem:[%s11956_s3 + $0x78] sm:$0xff] (!%p376_p9)  ;;  %v8482_v16 = vpack.c.bf16 (!%p376_p9), %v7451_v11, %v7450_v10  ;;  %v756_v18 = vld [vmem:[%s11956_s3] sm:$0xff] (!%p376_p9)  ;;  %vm1109_vm2 = vcmask (!%p376_p9), 1046528   ;;  %vm1878_vm5 = vcmask (!%p376_p9), 244736   ;;  %vm9611_vm6 = vmmov (!%p376_p9), 0  }
  0x11   : > { %v8486_v17 = vpack.c.bf16 (!%p376_p9), %v7453_v15, %v7452_v14  ;;  %v757_v19 = vld [vmem:[%s11956_s3 + $0x8] sm:$0xff] (!%p376_p9)  ;;  %v758_v21 = vld [vmem:[%s11956_s3 + $0x10] sm:$0xff] (!%p376_p9)  ;;  %v759_v22 = vld [vmem:[%s11956_s3 + $0x18] sm:$0xff] (!%p376_p9)  ;;  %v9609_v15 = vmov (!%p376_p9), 0   ;;  %s9615_s26 = smov (!%p376_p9), 116   ;;  %s9616_s28 = smov (!%p376_p9), 120  }
  0x12   : > { %v8490_v20 = vpack.c.bf16 (!%p376_p9), %v757_v19, %v756_v18  ;;  %v8494_v29 = vpack.c.bf16 (!%p376_p9), %v759_v22, %v758_v21  ;;  %v7458_v32 = vld [vmem:[%s11956_s3 + $0x20] sm:$0xff] (!%p376_p9)  ;;  %v7459_v33 = vld [vmem:[%s11956_s3 + $0x28] sm:$0xff] (!%p376_p9)  ;;  %v7460_v38 = vld [vmem:[%s11956_s3 + $0x30] sm:$0xff] (!%p376_p9)  ;;  %s9619_s16 = smov (!%p376_p9), 104   ;;  %s9620_s17 = smov (!%p376_p9), 100  }
  0x13   : > { %v8498_v36 = vpack.c.bf16 (!%p376_p9), %v7459_v33, %v7458_v32  ;;  %v7461_v39 = vld [vmem:[%s11956_s3 + $0x38] sm:$0xff] (!%p376_p9)  ;;  %v7464_v44 = vld [vmem:[%s11956_s3 + $0x80] sm:$0xff] (!%p376_p9)  ;;  %v7465_v45 = vld [vmem:[%s11956_s3 + $0x88] sm:$0xff] (!%p376_p9)  ;;  %s9621_s18 = smov (!%p376_p9), 96   ;;  %s419_s30 = sand.u32 (!%p376_p9), 1, %s9599_s22  }
  0x14   : > { %v8502_v43 = vpack.c.bf16 (!%p376_p9), %v7461_v39, %v7460_v38  ;;  %v8506_v50 = vpack.c.bf16 (!%p376_p9), %v7465_v45, %v7464_v44  ;;  %v7466_v52 = vld [vmem:[%s11956_s3 + $0x90] sm:$0xff] (!%p376_p9)  ;;  %v7467_v53 = vld [vmem:[%s11956_s3 + $0x98] sm:$0xff] (!%p376_p9)  ;;  %v7470_v56 = vld [vmem:[%s11956_s3 + $0x40] sm:$0xff] (!%p376_p9) }
  0x15   : > { %v8510_v55 = vpack.c.bf16 (!%p376_p9), %v7467_v53, %v7466_v52  ;;  %v7471_v57 = vld [vmem:[%s11956_s3 + $0x48] sm:$0xff] (!%p376_p9)  ;;  %v7472_v59 = vld [vmem:[%s11956_s3 + $0x50] sm:$0xff] (!%p376_p9)  ;;  %v7473_v60 = vld [vmem:[%s11956_s3 + $0x58] sm:$0xff] (!%p376_p9) }
  0x16   : > { %s422_s19 = scalar_select %p421_p10, %s9709_s25, 1  ;;  %v8514_v58 = vpack.c.bf16 %v7471_v57, %v7470_v56  ;;  %v8518_v61 = vpack.c.bf16 %v7473_v60, %v7472_v59  ;;  %v7476_v62 = vld [vmem:[%s11956_s3 + $0xa0] sm:$0xff]  ;;  %v7477_v63 = vld [vmem:[%s11956_s3 + $0xa8] sm:$0xff]  ;;  %v9939_v10 = vld [vmem:[%s11958_s5 + $0xb4] ss:$28 sps:$4 sm:$0x7f]  }
  0x17   : > { %v8852_v11 = vld [vmem:[%s11958_s5 + $0xb0] ss:$28 sps:$4 sm:$0x7f]   ;;  %v9958_v14 = vld [vmem:[%s11958_s5 + $0x84] ss:$28 sps:$4 sm:$0xff]  }
  0x18   : > { %s8788_s20 = smul.u32 24, %s422_s19  ;;  %v10042_v44 = vld [vmem:[%s11958_s5 + $0x44] ss:$28 sps:$4 sm:$0x7f]   ;;  %v10070_v53 = vld [vmem:[%s11958_s5 + $0x14] ss:$28 sps:$4 sm:$0xff]  }
  0x19   : > { %v10087_v56 = vld [vmem:[%s11958_s5 + $0x4c] ss:$28 sps:$4 sm:$0x7f]  }
  0x1a   : > { %s425_s29 = scalar_lea.vmem %s11953_s0, %s8788_s20  ;;  %s430_s15 = scalar_lea.vmem %s11954_s1, %s8788_s20  ;;  %v8879_v57 = vld [vmem:[%s11958_s5 + $0x48] ss:$28 sps:$4 sm:$0x7f]  }
  0x1b   : > { %v432_v2 = vld [vmem:[%s425_s29] sm:$0xff]  ;;  %v433_v3 = vld [vmem:[%s425_s29 + $0x8] sm:$0xff]  ;;  %v434_v7 = vld [vmem:[%s425_s29 + $0x10] sm:$0xff]  ;;  %v2154_v59 = vsel %vm1109_vm2, %v8879_v57, 0  ;;  %s9614_s20 = smov 124   ;;  %s9617_s29 = smov 112  }
  0x1c   : > { %v435_v4 = vld [vmem:[%s430_s15] sm:$0xff]  ;;  %v8466_v5 = vpack.c.bf16 %v433_v3, %v432_v2  ;;  %v436_v6 = vld [vmem:[%s430_s15 + $0x8] sm:$0xff]  ;;  %v437_v8 = vld [vmem:[%s430_s15 + $0x10] sm:$0xff]  ;;  %s9618_s15 = smov 108  }
  0x1d   : > { %v8474_v9 = vpack.c.bf16 %v436_v6, %v435_v4  ;;  %v7479_v2 = vld [vmem:[%s11956_s3 + $0xb8] sm:$0xff]  ;;  %v9907_v4 = vld [vmem:[%s11958_s5 + $0x74] ss:$28 sps:$4 sm:$0xff]  }
  0x1e   : > { %8467 = vmatprep.subr.bf16.mxu0 %v8466_v5  ;;  %v9917_v6 = vld [vmem:[%s11958_s5 + $0x70] ss:$28 sps:$4 sm:$0xff]  }
  0x1f   : > { %8479 = vmatprep.subr.bf16.mxu1 %v8474_v9  ;;  %8469 = vmatpush3.bf16.msra.mxu0 %v8466_v5  ;;  %v8939_v57 = vld [vmem:[%s11961_s8 + $0x60] ss:$16 sps:$4 sm:$0xff]  }
  0x20   : > { %8481 = vmatpush3.bf16.msra.mxu1 %v8474_v9  ;;  %8238 = vmatprep.subr.mxu0 %v434_v7 }
  0x21   : > { %8265 = vmatprep.subr.mxu1 %v437_v8 }
  0x23   : > { %8239 = vmatpush3.msra.mxu0 %v434_v7 }
  0x24   : > { %8266 = vmatpush3.msra.mxu1 %v437_v8  ;;  %8471 = vmatprep.subr.bf16.mxu0 %v8466_v5 }
  0x25   : > { %8268 = vmatmul.mubr.msk.f32.vlgmr.msra.gmra.mrb[0].mxu1 %vm443_vm0, %v7441_v12  ;;  %8241 = vmatmul.mubr.msk.f32.vlgmr.msra.gmra.mrb[0].mxu0 %vm443_vm0, %v439_v13 }
  0x26   : > { %8473 = vmatpush3.bf16.msra.mxu0 %v8466_v5  ;;  %8249 = vmatprep.mubr.msk.f32.mxu0 %vm443_vm0, %v7440_v0  ;;  %v8522_v0 = vpack.c.bf16 %v7477_v63, %v7476_v62  ;;  %v9912_v5 = vld [vmem:[%s11958_s5 + $0x7c] ss:$28 sps:$4 sm:$0xff]  }
  0x27   : > { %8247 = vmatprep.subr.mxu0 %v434_v7  ;;  %8531 = vmatprep.subr.bf16.mxu1 %v8482_v16 }
  0x28   : > { %8533 = vmatpush3.bf16.msra.mxu1 %v8482_v16 }
  0x29   : > { %8535 = vmatprep.subr.bf16.mxu1 %v8486_v17 }
  0x2a   : > { %8248 = vmatpush3.msra.mxu0 %v434_v7  ;;  %v9922_v7 = vld [vmem:[%s11958_s5 + $0x78] ss:$28 sps:$4 sm:$0xff]  }
  0x2b   : > { %8475 = vmatprep.subr.bf16.mxu0 %v8474_v9  ;;  %8250 = vmatmul.mubr.msk.f32.vlgmr.msra.gmra.mrb[2].mxu0 %vm443_vm0, %v7441_v12 }
  0x2c   : > { %8477 = vmatpush3.bf16.msra.mxu0 %v8474_v9  ;;  %8258 = vmatprep.mubr.msk.f32.mxu0 %vm443_vm0, %v438_v1  ;;  %v7478_v1 = vld [vmem:[%s11956_s3 + $0xb0] sm:$0xff]  ;;  %v8849_v9 = vld [vmem:[%s11958_s5 + $0xa8] ss:$28 sps:$4 sm:$0x7f]  }
  0x2d   : > { %8256 = vmatprep.subr.mxu0 %v437_v8  ;;  %8537 = vmatpush3.bf16.msra.mxu1 %v8486_v17  ;;  %v8526_v3 = vpack.c.bf16 %v7479_v2, %v7478_v1  ;;  %v9947_v12 = vsel %vm1109_vm2, %v8849_v9, 0  ;;  %v8883_v1 = vld [vmem:[%s11958_s5 + $0xe4] ss:$28 sps:$4 sm:$0xff]   ;;  %v8886_v2 = vld [vmem:[%s11958_s5 + $0xec] ss:$28 sps:$4 sm:$0xff]  }
  0x2e   : > { %8539 = vmatprep.subr.bf16.mxu1 %v8490_v20 }
  0x30   : > { %8257 = vmatpush3.msra.mxu0 %v437_v8  ;;  %v9931_v8 = vld [vmem:[%s11958_s5 + $0xac] ss:$28 sps:$4 sm:$0x7f]  }
  0x31   : > { %8259 = vmatmul.mubr.msk.f32.vlgmr.msra.gmra.mrb[4].mxu0 %vm443_vm0, %v439_v13  ;;  %8483 = vmatprep.subr.bf16.mxu0 %v8482_v16  ;;  %v9953_v13 = vsel %vm1109_vm2, %v8852_v11, 0  ;;  %v8895_v11 = vld [vmem:[%s11958_s5 + $0xf4] ss:$28 sps:$4 sm:$0xff]  }
  0x32   : > { %8485 = vmatpush3.bf16.msra.mxu0 %v8482_v16  ;;  %v9610_v16 = vmov 0.0  }
  0x33   : > { %8487 = vmatprep.subr.bf16.mxu0 %v8486_v17 }
  0x36   : > { %8489 = vmatpush3.bf16.msra.mxu0 %v8486_v17  ;;  %v7482_v17 = vld [vmem:[%s11957_s4] ss:$0 sm:$0xff] }
  0x37   : > { %8491 = vmatprep.subr.bf16.mxu0 %v8490_v20 }
  0xf8   : > { %v9788_v23 = vpop.f32.mrb[0].mxu1  ;;  %v8242_v24 = vpop.f32.mrb[0].mxu0 }
  0xf9   : > { %v1687_v25 = vrot.slane %v9788_v23, 1  ;;  %v9791_v26 = vrot.slane %v8242_v24, 1  ;;  %v9793_v27 = vpop.f32.mrb[1].mxu1  ;;  %v516_v28 = vpop.f32.mrb[1].mxu0 }
  0xfa   : > { %v1686_v30 = vrot.slane %v9793_v27, 1  ;;  %v1110_v31 = vrot.slane %v516_v28, 1  ;;  %8344 = vmatprep.mubr.msk.f32.mxu1 %vm765_vm1, %v9793_v27 }
  0xfb   : > { %8345 = vmatmul.mubr.msk.f32.vlgmr.msra.gmra.mrb[2].mxu1 %vm765_vm1, %v9788_v23 }
  0xfc   : > { %8541 = vmatpush3.bf16.msra.mxu1 %v8490_v20  ;;  %v9808_v34 = vsel %vm1109_vm2, %v1110_v31, %v9791_v26  ;;  %v9813_v35 = vsel %vm1109_vm2, %v1686_v30, %v1687_v25  ;;  %v8859_v30 = vld [vmem:[%s11958_s5 + $0xb8] ss:$28 sps:$4 sm:$0x7f]   ;;  %v8860_v31 = vld [vmem:[%s11958_s5 + $0xc0] ss:$28 sps:$4 sm:$0x7f]  }
  0xfd   : > { %8543 = vmatprep.subr.bf16.mxu1 %v8494_v29  ;;  %v10000_v32 = vsel %vm1109_vm2, %v8859_v30, 0  ;;  %v10004_v33 = vsel %vm1109_vm2, %v8860_v31, 0  ;;  %v8909_v30 = vld [vmem:[%s11958_s5 + $0x188] ss:$28 sps:$4 sm:$0x7f]  }
  0xfe   : > { %v9815_v37 = vpop.f32.mrb[2].mxu0  ;;  %v8910_v31 = vld [vmem:[%s11958_s5 + $0x194] ss:$28 sps:$4 sm:$0x7f]  }
  0xff   : > { %v1603_v40 = vrot.slane %v9815_v37, 1  ;;  %v597_v41 = vpop.f32.mrb[3].mxu0 }
 0x100   : > { %8545 = vmatpush3.bf16.msra.mxu1 %v8494_v29  ;;  %v1602_v42 = vrot.slane %v597_v41, 1  ;;  %8355 = vmatprep.mubr.msk.f32.mxu1 %vm765_vm1, %v597_v41 }
 0x101   : > { %8547 = vmatprep.subr.bf16.mxu1 %v8498_v36 }
 0x102   : > { %v1604_v46 = vsel %vm1109_vm2, %v1602_v42, %v1603_v40 }
 0x103   : > { %8356 = vmatmul.mubr.msk.f32.vlgmr.msra.gmra.mrb[2].mxu1 %vm765_vm1, %v9815_v37 }
 0x104   : > { %8549 = vmatpush3.bf16.msra.mxu1 %v8498_v36  ;;  %v8260_v47 = vpop.f32.mrb[4].mxu0  ;;  %8366 = vmatprep.mubr.msk.f32.mxu1 %vm765_vm1, %v9808_v34 }
 0x105   : > { %v9838_v48 = vrot.slane %v8260_v47, 1  ;;  %v672_v49 = vpop.f32.mrb[5].mxu0  ;;  %8551 = vmatprep.subr.bf16.mxu1 %v8502_v43 }
 0x106   : > { %v1199_v51 = vrot.slane %v672_v49, 1  ;;  %8278 = vmatprep.mubr.msk.f32.mxu0 %vm765_vm1, %v672_v49 }
 0x107   : > { %8279 = vmatmul.mubr.msk.f32.vlgmr.msra.gmra.mrb[6].mxu0 %vm765_vm1, %v8260_v47 }
 0x108   : > { %8553 = vmatpush3.bf16.msra.mxu1 %v8502_v43  ;;  %8493 = vmatpush3.bf16.msra.mxu0 %v8490_v20  ;;  %v1201_v54 = vsel %vm1109_vm2, %v1199_v51, %v9838_v48 }
 0x109   : > { %8289 = vmatprep.mubr.msk.f32.mxu0 %vm765_vm1, %v516_v28  ;;  %8555 = vmatprep.subr.bf16.mxu1 %v8506_v50  ;;  %v9981_v28 = vld [vmem:[%s11958_s5 + $0xbc] ss:$28 sps:$4 sm:$0x7f]  }
 0x10a   : > { %8495 = vmatprep.subr.bf16.mxu0 %v8494_v29 }
 0x10b   : > { %8367 = vmatmul.mubr.msk.f32.vlgmr.msra.gmra.mrb[2].mxu1 %vm765_vm1, %v9791_v26 }
 0x10c   : > { %8557 = vmatpush3.bf16.msra.mxu1 %v8506_v50  ;;  %8497 = vmatpush3.bf16.msra.mxu0 %v8494_v29 }
 0x10d   : > { %8377 = vmatprep.mubr.msk.f32.mxu1 %vm765_vm1, %v1201_v54  ;;  %8559 = vmatprep.subr.bf16.mxu1 %v8510_v55 }
 0x10e   : > { %8499 = vmatprep.subr.bf16.mxu0 %v8498_v36 }
 0x10f   : > { %8290 = vmatmul.mubr.msk.f32.vlgmr.msra.gmra.mrb[6].mxu0 %vm765_vm1, %v8242_v24 }
 0x110   : > { %8561 = vmatpush3.bf16.msra.mxu1 %v8510_v55  ;;  %8501 = vmatpush3.bf16.msra.mxu0 %v8498_v36 }
 0x111   : > { %8300 = vmatprep.mubr.msk.f32.mxu0 %vm765_vm1, %v597_v41  ;;  %8563 = vmatprep.subr.bf16.mxu1 %v8514_v58  ;;  %v10032_v41 = vld [vmem:[%s11958_s5 + $0x3c] ss:$28 sps:$4 sm:$0x7f]  }
 0x112   : > { %8503 = vmatprep.subr.bf16.mxu0 %v8502_v43 }
 0x113   : > { %8378 = vmatmul.mubr.msk.f32.vlgmr.msra.gmra.mrb[2].mxu1 %vm765_vm1, %v9838_v48 }
 0x114   : > { %8565 = vmatpush3.bf16.msra.mxu1 %v8514_v58  ;;  %8505 = vmatpush3.bf16.msra.mxu0 %v8502_v43  ;;  %v8869_v43 = vld [vmem:[%s11958_s5 + $0x38] ss:$28 sps:$4 sm:$0x7f]  }
 0x115   : > { %8388 = vmatprep.mubr.msk.f32.mxu1 %vm765_vm1, %v1604_v46  ;;  %8567 = vmatprep.subr.bf16.mxu1 %v8518_v61  ;;  %v8872_v46 = vld [vmem:[%s11958_s5 + $0x40] ss:$28 sps:$4 sm:$0x7f]   ;;  %v10060_v51 = vsel %vm1109_vm2, %v8869_v43, 0 }
 0x116   : > { %8507 = vmatprep.subr.bf16.mxu0 %v8506_v50  ;;  %v10065_v52 = vsel %vm1109_vm2, %v8872_v46, 0  ;;  %v8921_v46 = vld [vmem:[%s11961_s8] ss:$16 sps:$4 sm:$0xff]  }
 0x117   : > { %8301 = vmatmul.mubr.msk.f32.vlgmr.msra.gmra.mrb[6].mxu0 %vm765_vm1, %v9815_v37  ;;  %v10022_v37 = vld [vmem:[%s11958_s5] ss:$28 sps:$4 sm:$0xff]  }
 0x118   : > { %8569 = vmatpush3.bf16.msra.mxu1 %v8518_v61  ;;  %8509 = vmatpush3.bf16.msra.mxu0 %v8506_v50 }
 0x119   : > { %8311 = vmatprep.mubr.msk.f32.mxu0 %vm765_vm1, %v9793_v27  ;;  %8571 = vmatprep.subr.bf16.mxu1 %v8522_v0  ;;  %v9976_v27 = vld [vmem:[%s11958_s5 + $0x88] ss:$28 sps:$4 sm:$0xff]  }
 0x11a   : > { %8511 = vmatprep.subr.bf16.mxu0 %v8510_v55 }
 0x11b   : > { %8389 = vmatmul.mubr.msk.f32.vlgmr.msra.gmra.mrb[2].mxu1 %vm765_vm1, %v1603_v40  ;;  %v10027_v40 = vld [vmem:[%s11958_s5 + $0x8] ss:$28 sps:$4 sm:$0xff]  }
 0x11c   : > { %8573 = vmatpush3.bf16.msra.mxu1 %v8522_v0  ;;  %8513 = vmatpush3.bf16.msra.mxu0 %v8510_v55  ;;  %v8876_v55 = vld [vmem:[%s11958_s5 + $0x18] ss:$28 sps:$4 sm:$0xff]  }
 0x11d   : > { %8399 = vmatprep.mubr.msk.f32.mxu1 %vm765_vm1, %v9813_v35  ;;  %8575 = vmatprep.subr.bf16.mxu1 %v8526_v3  ;;  %v10014_v35 = vld [vmem:[%s11958_s5 + $0xc] ss:$28 sps:$4 sm:$0xff]  }
 0x11e   : > { %8515 = vmatprep.subr.bf16.mxu0 %v8514_v58 }
 0x11f   : > { %8312 = vmatmul.mubr.msk.f32.vlgmr.msra.gmra.mrb[6].mxu0 %vm765_vm1, %v9788_v23 }
 0x120   : > { %8577 = vmatpush3.bf16.msra.mxu1 %v8526_v3  ;;  %8517 = vmatpush3.bf16.msra.mxu0 %v8514_v58  ;;  %v8880_v58 = vld [vmem:[%s11958_s5 + $0x50] ss:$28 sps:$4 sm:$0x7f]  }
 0x121   : > { %8322 = vmatprep.mubr.msk.f32.mxu0 %vm765_vm1, %v9808_v34  ;;  %8519 = vmatprep.subr.bf16.mxu0 %v8518_v61  ;;  %v10009_v34 = vld [vmem:[%s11958_s5 + $0x4] ss:$28 sps:$4 sm:$0xff]   ;;  %v2160_v60 = vsel %vm1109_vm2, %v8880_v58, 0  ;;  %v8942_v58 = vld [vmem:[%s11961_s8 + $0x68] ss:$16 sps:$4 sm:$0xff]  }
 0x122   : > { %1946 = vmatprep.subr.bf16.mxu1 %v9912_v5 }
 0x123   : > { %8400 = vmatmul.mubr.msk.f32.vlgmr.msra.gmra.mrb[2].mxu1 %vm765_vm1, %v1687_v25  ;;  %v9971_v25 = vld [vmem:[%s11958_s5 + $0x80] ss:$28 sps:$4 sm:$0xff]  }
 0x124   : > { %8521 = vmatpush3.bf16.msra.mxu0 %v8518_v61  ;;  %1947 = vmatpush1.bf16.msra.mxu1 %v9922_v7 }
 0x125   : > { %8523 = vmatprep.subr.bf16.mxu0 %v8522_v0  ;;  %7527 = vmatprep.subr.msk.bf16.mxu1 %vm1109_vm2, %v9939_v10 }
 0x126   : > { %1978 = vmatprep.mubr.bf16.mxu1 %v9609_v15 }
 0x127   : > { %8323 = vmatmul.mubr.msk.f32.vlgmr.msra.gmra.mrb[6].mxu0 %vm765_vm1, %v9791_v26 }
 0x128   : > { %8525 = vmatpush3.bf16.msra.mxu0 %v8522_v0  ;;  %8333 = vmatprep.mubr.msk.f32.mxu0 %vm765_vm1, %v1201_v54  ;;  %v10077_v54 = vld [vmem:[%s11958_s5 + $0x10] ss:$28 sps:$4 sm:$0xff]  }
 0x129   : > { %8527 = vmatprep.subr.bf16.mxu0 %v8526_v3  ;;  %1949 = vmatpush1.bf16.msra.mxu1 %v9953_v13 }
 0x12a   : > { %8402 = vmatprep.subr.bf16.mxu1 %v9610_v16 }
 0x12c   : > { %8529 = vmatpush3.bf16.msra.mxu0 %v8526_v3  ;;  %v8881_v3 = vld [vmem:[%s11958_s5 + $0xe0] ss:$28 sps:$4 sm:$0xff]  }
 0x12d   : > { %1903 = vmatprep.subr.bf16.mxu0 %v9907_v4 }
 0x12f   : > { %8334 = vmatmul.mubr.msk.f32.vlgmr.msra.gmra.mrb[6].mxu0 %vm765_vm1, %v9838_v48 }
 0x130   : > { %1904 = vmatpush1.bf16.msra.mxu0 %v9917_v6  ;;  %1935 = vmatprep.mubr.bf16.mxu0 %v9609_v15 }
 0x131   : > { %7525 = vmatprep.subr.msk.bf16.mxu0 %vm1109_vm2, %v9931_v8 }
 0x134   : > { %1906 = vmatpush1.bf16.msra.mxu0 %v9947_v12 }
 0x135   : > { %1989 = vmatprep.subr.bf16.mxu0 %v9958_v14 }
 0x1f6   : > { %v8401_v18 = vpop.f32.mrb[2].mxu1 }
 0x1f7   : > { %v1771_v19 = vadd.f32 %v8401_v18, %v7482_v17  ;;  %v1759_v20 = vpop.f32.mrb[3].mxu1  ;;  %v8900_v18 = vld [vmem:[%s11958_s5 + $0x130] ss:$28 sps:$4 sm:$0x7f]  }
 0x1f8   : > { %v1770_v21 = vadd.f32 %v7482_v17, %v1759_v20  ;;  %v2782_v20 = vsel %vm1109_vm2, %v8900_v18, 0  ;;  %v8980_v18 = vld [vmem:[%s11961_s8 + $0x12c] ss:$16 sps:$4 sm:$0xff]  }
 0x1f9   : > { %vm1773_vm3 = vcmp.gt.f32.partialorder %v1771_v19, 0.0  ;;  %v1775_v22 = vmul.f32 0.01, %v1771_v19 }
 0x1fa   : > { %vm1772_vm4 = vcmp.gt.f32.partialorder %v1770_v21, 0.0  ;;  %v1774_v23 = vmul.f32 0.01, %v1770_v21 }
 0x1fb   : > { %v1777_v24 = vsel %vm1773_vm3, %v1771_v19, %v1775_v22 }
 0x1fc   : > { %v1776_v26 = vsel %vm1772_vm4, %v1770_v21, %v1774_v23 }
 0x1fd   : > { %v9983_v29 = vpack.c.bf16 %v1777_v24, %v1776_v26  ;;  %v8906_v26 = vld [vmem:[%s11958_s5 + $0x15c] ss:$28 sps:$4 sm:$0xff]  }
 0x1ff   : > { %7526 = vmatmul.mubr.msk.bf16.vlgmr.msra.gmra.mrb[8].mxu0 %vm1878_vm5, %v9983_v29  ;;  %7528 = vmatmul.mubr.msk.bf16.vlgmr.msra.gmra.mrb[4].mxu1 %vm1878_vm5, %v9983_v29  ;;  %v2970_v21 = vshll.u32 %v9983_v29, 16  ;;  %v2968_v23 = vshrl.u32 %v9983_v29, 16 }
 0x200   : > { %1990 = vmatpush1.bf16.msra.mxu0 %v9971_v25  ;;  %8403 = vmatpush3.bf16.msra.mxu1 %v9976_v27 }
 0x201   : > { %7529 = vmatprep.subr.msk.bf16.mxu0 %vm1109_vm2, %v9981_v28  ;;  %8404 = vmatprep.subr.bf16.mxu1 %v9610_v16  ;;  %v2972_v22 = vrot.slane %v2970_v21, 1  ;;  %v8983_v21 = vld [vmem:[%s11961_s8 + $0x144] ss:$16 sps:$4 sm:$0xff]  }
 0x202   : > { %v8335_v36 = vpop.f32.mrb[6].mxu0  ;;  %2021 = vmatprep.mubr.bf16.mxu0 %v9609_v15  ;;  %8406 = vmatprep.mubr.msk.bf16.mxu1 %vm9611_vm6, %v9610_v16 }
 0x203   : > { %v1291_v38 = vadd.f32 %v8335_v36, %v7482_v17  ;;  %v1272_v39 = vpop.f32.mrb[7].mxu0  ;;  %v2973_v24 = vor.u32 %v2972_v22, %v2968_v23  ;;  %v8913_v36 = vld [vmem:[%s11958_s5 + $0x160] ss:$28 sps:$4 sm:$0xff]  }
 0x204   : > { %v1290_v42 = vadd.f32 %v7482_v17, %v1272_v39  ;;  %1992 = vmatpush1.bf16.msra.mxu0 %v10000_v32  ;;  %8405 = vmatpush3.bf16.msra.mxu1 %v10004_v33  ;;  %v8899_v17 = vld [vmem:[%s11958_s5 + $0x128] ss:$28 sps:$4 sm:$0x7f]   ;;  %v8919_v39 = vld [vmem:[%s11958_s5 + $0x198] ss:$28 sps:$4 sm:$0x7f]  }
 0x205   : > { %vm1293_vm7 = vcmp.gt.f32.partialorder %v1291_v38, 0.0  ;;  %v1295_v45 = vmul.f32 0.01, %v1291_v38  ;;  %2162 = vmatprep.subr.bf16.mxu0 %v10009_v34  ;;  %2205 = vmatprep.subr.bf16.mxu1 %v10014_v35  ;;  %v2776_v19 = vsel %vm1109_vm2, %v8899_v17, 0  ;;  %v8977_v17 = vld [vmem:[%s11961_s8 + $0x124] ss:$16 sps:$4 sm:$0xff]  }
 0x206   : > { %vm1292_vm8 = vcmp.gt.f32.partialorder %v1290_v42, 0.0  ;;  %v1294_v47 = vmul.f32 0.01, %v1290_v42  ;;  %v8986_v22 = vld [vmem:[%s11961_s8 + $0x14c] ss:$16 sps:$4 sm:$0xff]  }
 0x207   : > { %v1297_v48 = vsel %vm1293_vm7, %v1291_v38, %v1295_v45  ;;  %7530 = vmatmul.mubr.msk.bf16.vlgmr.msra.gmra.mrb[12].mxu0 %vm1878_vm5, %v9983_v29  ;;  %8407 = vmatmul.mubr.msk.bf16.vlgmr.msra.gmra.mrb[8].mxu1 %vm1878_vm5, %v9983_v29  ;;  %v8917_v38 = vld [vmem:[%s11958_s5 + $0x19c] ss:$28 sps:$4 sm:$0x7f]   ;;  %v8981_v23 = vld [vmem:[%s11961_s8 + $0x140] ss:$16 sps:$4 sm:$0xff]  }
 0x208   : > { %v1296_v49 = vsel %vm1292_vm8, %v1290_v42, %v1294_v47  ;;  %2163 = vmatpush1.bf16.msra.mxu0 %v10022_v37  ;;  %2206 = vmatpush1.bf16.msra.mxu1 %v10027_v40  ;;  %v8926_v45 = vld [vmem:[%s11961_s8 + $0xc] ss:$16 sps:$4 sm:$0xff]   ;;  %v8929_v47 = vld [vmem:[%s11961_s8 + $0x24] ss:$16 sps:$4 sm:$0xff]  }
 0x209   : > { %v10055_v50 = vpack.c.bf16 %v1297_v48, %v1296_v49  ;;  %7546 = vmatprep.subr.msk.bf16.mxu0 %vm1109_vm2, %v10032_v41  ;;  %7548 = vmatprep.subr.msk.bf16.mxu1 %vm1109_vm2, %v10042_v44  ;;  %v8932_v48 = vld [vmem:[%s11961_s8 + $0x2c] ss:$16 sps:$4 sm:$0xff]   ;;  %v8927_v49 = vld [vmem:[%s11961_s8 + $0x20] ss:$16 sps:$4 sm:$0xff]  }
 0x20a   : > { %2194 = vmatprep.mubr.bf16.mxu0 %v9609_v15  ;;  %2237 = vmatprep.mubr.bf16.mxu1 %v9609_v15 }
 0x20b   : > { %v2334_v61 = vshll.u32 %v10055_v50, 16  ;;  %v2332_v63 = vshrl.u32 %v10055_v50, 16  ;;  %v3449_v43 = vrot.slane %v10055_v50, 1 }
 0x20c   : > { %2165 = vmatpush1.bf16.msra.mxu0 %v10060_v51  ;;  %2208 = vmatpush1.bf16.msra.mxu1 %v10065_v52 }
 0x20d   : > { %2248 = vmatprep.subr.bf16.mxu0 %v10070_v53  ;;  %8410 = vmatprep.subr.bf16.mxu1 %v9610_v16  ;;  %v2336_v62 = vrot.slane %v2334_v61, 1  ;;  %v8945_v61 = vld [vmem:[%s11961_s8 + $0x80] ss:$16 sps:$4 sm:$0xff]  }
 0x20f   : > { %7547 = vmatmul.mubr.msk.bf16.vlgmr.msra.gmra.mrb[8].mxu0 %vm1878_vm5, %v10055_v50  ;;  %7549 = vmatmul.mubr.msk.bf16.vlgmr.msra.gmra.mrb[4].mxu1 %vm1878_vm5, %v10055_v50  ;;  %v10129_v0 = vor.u32 %v2336_v62, %v2332_v63  ;;  %v8948_v62 = vld [vmem:[%s11961_s8 + $0x88] ss:$16 sps:$4 sm:$0xff]   ;;  %v8953_v63 = vld [vmem:[%s11961_s8 + $0xa4] ss:$16 sps:$4 sm:$0xff]  }
 0x210   : > { %2249 = vmatpush1.bf16.msra.mxu0 %v10077_v54  ;;  %8411 = vmatpush3.bf16.msra.mxu1 %v8876_v55 }
 0x211   : > { %7550 = vmatprep.subr.msk.bf16.mxu0 %vm1109_vm2, %v10087_v56  ;;  %8412 = vmatprep.subr.bf16.mxu1 %v9610_v16 }
 0x212   : > { %2280 = vmatprep.mubr.bf16.mxu0 %v9609_v15  ;;  %8414 = vmatprep.mubr.msk.bf16.mxu1 %vm9611_vm6, %v9610_v16 }
 0x214   : > { %2251 = vmatpush1.bf16.msra.mxu0 %v2154_v59  ;;  %8413 = vmatpush3.bf16.msra.mxu1 %v2160_v60 }
 0x215   : > { %2341 = vmatprep.subr.bf16.mxu0 %v9907_v4  ;;  %2384 = vmatprep.subr.bf16.mxu1 %v9912_v5  ;;  %v8884_v4 = vld [vmem:[%s11958_s5 + $0xe8] ss:$28 sps:$4 sm:$0xff]   ;;  %v8887_v5 = vld [vmem:[%s11958_s5 + $0x11c] ss:$28 sps:$4 sm:$0x7f]  }
 0x217   : > { %7551 = vmatmul.mubr.msk.bf16.vlgmr.msra.gmra.mrb[12].mxu0 %vm1878_vm5, %v10055_v50  ;;  %8415 = vmatmul.mubr.msk.bf16.vlgmr.msra.gmra.mrb[12].mxu1 %vm1878_vm5, %v10055_v50  ;;  %v8930_v50 = vld [vmem:[%s11961_s8 + $0x28] ss:$16 sps:$4 sm:$0xff]  }
 0x218   : > { %2342 = vmatpush1.bf16.msra.mxu0 %v9917_v6  ;;  %2385 = vmatpush1.bf16.msra.mxu1 %v9922_v7  ;;  %v8889_v6 = vld [vmem:[%s11958_s5 + $0x118] ss:$28 sps:$4 sm:$0x7f]   ;;  %v8890_v7 = vld [vmem:[%s11958_s5 + $0x124] ss:$28 sps:$4 sm:$0x7f]  }
 0x219   : > { %7553 = vmatprep.subr.msk.bf16.mxu0 %vm1109_vm2, %v9931_v8  ;;  %7555 = vmatprep.subr.msk.bf16.mxu1 %vm1109_vm2, %v9939_v10  ;;  %v8892_v8 = vld [vmem:[%s11958_s5 + $0x120] ss:$28 sps:$4 sm:$0x7f]   ;;  %v2764_v9 = vsel %vm1109_vm2, %v8889_v6, 0  ;;  %v8960_v6 = vld [vmem:[%s11961_s8 + $0xc8] ss:$16 sps:$4 sm:$0xff]  }
 0x21a   : > { %2373 = vmatprep.mubr.bf16.mxu0 %v9609_v15  ;;  %2416 = vmatprep.mubr.bf16.mxu1 %v9609_v15  ;;  %v2770_v10 = vsel %vm1109_vm2, %v8892_v8, 0  ;;  %v8968_v8 = vld [vmem:[%s11961_s8 + $0xec] ss:$16 sps:$4 sm:$0xff]  }
 0x21c   : > { %2344 = vmatpush1.bf16.msra.mxu0 %v9947_v12  ;;  %2387 = vmatpush1.bf16.msra.mxu1 %v9953_v13  ;;  %v8893_v12 = vld [vmem:[%s11958_s5 + $0xf0] ss:$28 sps:$4 sm:$0xff]   ;;  %v8896_v13 = vld [vmem:[%s11958_s5 + $0xf8] ss:$28 sps:$4 sm:$0xff]  }
 0x21d   : > { %2427 = vmatprep.subr.bf16.mxu0 %v9958_v14  ;;  %8418 = vmatprep.subr.bf16.mxu1 %v9610_v16  ;;  %v8897_v14 = vld [vmem:[%s11958_s5 + $0x12c] ss:$28 sps:$4 sm:$0x7f]  }
 0x21f   : > { %7554 = vmatmul.mubr.msk.bf16.vlgmr.msra.gmra.mrb[16].mxu0 %vm1878_vm5, %v10129_v0  ;;  %7556 = vmatmul.mubr.msk.bf16.vlgmr.msra.gmra.mrb[16].mxu1 %vm1878_vm5, %v10129_v0 }
 0x220   : > { %2428 = vmatpush1.bf16.msra.mxu0 %v9971_v25  ;;  %8419 = vmatpush3.bf16.msra.mxu1 %v9976_v27  ;;  %v8903_v25 = vld [vmem:[%s11958_s5 + $0x154] ss:$28 sps:$4 sm:$0xff]  }
 0x221   : > { %7557 = vmatprep.subr.msk.bf16.mxu0 %vm1109_vm2, %v9981_v28  ;;  %8420 = vmatprep.subr.bf16.mxu1 %v9610_v16  ;;  %v8901_v27 = vld [vmem:[%s11958_s5 + $0x150] ss:$28 sps:$4 sm:$0xff]   ;;  %v8904_v28 = vld [vmem:[%s11958_s5 + $0x158] ss:$28 sps:$4 sm:$0xff]  }
 0x222   : > { %2459 = vmatprep.mubr.bf16.mxu0 %v9609_v15  ;;  %8422 = vmatprep.mubr.msk.bf16.mxu1 %vm9611_vm6, %v9610_v16 }
 0x224   : > { %2430 = vmatpush1.bf16.msra.mxu0 %v10000_v32  ;;  %8421 = vmatpush3.bf16.msra.mxu1 %v10004_v33  ;;  %v8912_v32 = vld [vmem:[%s11958_s5 + $0x190] ss:$28 sps:$4 sm:$0x7f]   ;;  %v3244_v33 = vsel %vm1109_vm2, %v8909_v30, 0 }
 0x225   : > { %2511 = vmatprep.subr.bf16.mxu0 %v10009_v34  ;;  %2554 = vmatprep.subr.bf16.mxu1 %v10014_v35  ;;  %v3250_v34 = vsel %vm1109_vm2, %v8912_v32, 0  ;;  %v8915_v35 = vld [vmem:[%s11958_s5 + $0x164] ss:$28 sps:$4 sm:$0xff]   ;;  %v8998_v30 = vld [vmem:[%s11961_s8 + $0x18c] ss:$16 sps:$4 sm:$0xff]  }
 0x226   : > { %v8996_v32 = vld [vmem:[%s11961_s8 + $0x188] ss:$16 sps:$4 sm:$0xff]  }
 0x227   : > { %7558 = vmatmul.mubr.msk.bf16.vlgmr.msra.gmra.mrb[20].mxu0 %vm1878_vm5, %v10129_v0  ;;  %8423 = vmatmul.mubr.msk.bf16.vlgmr.msra.gmra.mrb[20].mxu1 %vm1878_vm5, %v10129_v0 }
 0x228   : > { %2512 = vmatpush1.bf16.msra.mxu0 %v10022_v37  ;;  %2555 = vmatpush1.bf16.msra.mxu1 %v10027_v40  ;;  %v8916_v37 = vld [vmem:[%s11958_s5 + $0x168] ss:$28 sps:$4 sm:$0xff]   ;;  %v8920_v40 = vld [vmem:[%s11958_s5 + $0x1a0] ss:$28 sps:$4 sm:$0x7f]  }
 0x229   : > { %7560 = vmatprep.subr.msk.bf16.mxu0 %vm1109_vm2, %v10032_v41  ;;  %7562 = vmatprep.subr.msk.bf16.mxu1 %vm1109_vm2, %v10042_v44  ;;  %v3256_v41 = vsel %vm1109_vm2, %v8919_v39, 0  ;;  %v3262_v42 = vsel %vm1109_vm2, %v8920_v40, 0  ;;  %v8923_v44 = vld [vmem:[%s11961_s8 + $0x4] ss:$16 sps:$4 sm:$0xff]   ;;  %v9005_v39 = vld [vmem:[%s11961_s8 + $0x1c0] ss:$16 sps:$4 sm:$0xff]  }
 0x22a   : > { %2543 = vmatprep.mubr.bf16.mxu0 %v9609_v15  ;;  %2586 = vmatprep.mubr.bf16.mxu1 %v9609_v15  ;;  %v9008_v40 = vld [vmem:[%s11961_s8 + $0x1c8] ss:$16 sps:$4 sm:$0xff]  }
 0x22c   : > { %2514 = vmatpush1.bf16.msra.mxu0 %v10060_v51  ;;  %2557 = vmatpush1.bf16.msra.mxu1 %v10065_v52  ;;  %v8935_v51 = vld [vmem:[%s11961_s8 + $0x44] ss:$16 sps:$4 sm:$0xff]   ;;  %v8938_v52 = vld [vmem:[%s11961_s8 + $0x4c] ss:$16 sps:$4 sm:$0xff]  }
 0x22d   : > { %2597 = vmatprep.subr.bf16.mxu0 %v10070_v53  ;;  %8426 = vmatprep.subr.bf16.mxu1 %v9610_v16  ;;  %v8933_v53 = vld [vmem:[%s11961_s8 + $0x40] ss:$16 sps:$4 sm:$0xff]  }
 0x22f   : > { %7561 = vmatmul.mubr.msk.bf16.vlgmr.msra.gmra.mrb[16].mxu0 %vm1878_vm5, %v9983_v29  ;;  %7563 = vmatmul.mubr.msk.bf16.vlgmr.msra.gmra.mrb[16].mxu1 %vm1878_vm5, %v9983_v29 }
 0x230   : > { %2598 = vmatpush1.bf16.msra.mxu0 %v10077_v54  ;;  %8427 = vmatpush3.bf16.msra.mxu1 %v8876_v55  ;;  %v8936_v54 = vld [vmem:[%s11961_s8 + $0x48] ss:$16 sps:$4 sm:$0xff]   ;;  %v8941_v55 = vld [vmem:[%s11961_s8 + $0x64] ss:$16 sps:$4 sm:$0xff]  }
 0x231   : > { %7564 = vmatprep.subr.msk.bf16.mxu0 %vm1109_vm2, %v10087_v56  ;;  %8428 = vmatprep.subr.bf16.mxu1 %v9610_v16  ;;  %v8944_v56 = vld [vmem:[%s11961_s8 + $0x6c] ss:$16 sps:$4 sm:$0xff]  }
 0x232   : > { %2629 = vmatprep.mubr.bf16.mxu0 %v9609_v15  ;;  %8430 = vmatprep.mubr.msk.bf16.mxu1 %vm9611_vm6, %v9610_v16 }
 0x234   : > { %2600 = vmatpush1.bf16.msra.mxu0 %v2154_v59  ;;  %8429 = vmatpush3.bf16.msra.mxu1 %v2160_v60  ;;  %v8947_v59 = vld [vmem:[%s11961_s8 + $0x84] ss:$16 sps:$4 sm:$0xff]   ;;  %v8950_v60 = vld [vmem:[%s11961_s8 + $0x8c] ss:$16 sps:$4 sm:$0xff]  }
 0x235   : > { %2784 = vmatprep.subr.bf16.mxu0 %v8883_v1  ;;  %2827 = vmatprep.subr.bf16.mxu1 %v8886_v2 }
 0x237   : > { %7565 = vmatmul.mubr.msk.bf16.vlgmr.msra.gmra.mrb[20].mxu0 %vm1878_vm5, %v9983_v29  ;;  %8431 = vmatmul.mubr.msk.bf16.vlgmr.msra.gmra.mrb[24].mxu1 %vm1878_vm5, %v9983_v29  ;;  %v8907_v29 = vld [vmem:[%s11958_s5 + $0x18c] ss:$28 sps:$4 sm:$0x7f]  }
 0x238   : > { %2785 = vmatpush1.bf16.msra.mxu0 %v8881_v3  ;;  %2828 = vmatpush1.bf16.msra.mxu1 %v8884_v4 }
 0x239   : > { %7597 = vmatprep.subr.msk.bf16.mxu0 %vm1109_vm2, %v8887_v5  ;;  %7599 = vmatprep.subr.msk.bf16.mxu1 %vm1109_vm2, %v8890_v7 }
 0x23a   : > { %2816 = vmatprep.mubr.bf16.mxu0 %v9609_v15  ;;  %2859 = vmatprep.mubr.bf16.mxu1 %v9609_v15 }
 0x23c   : > { %2787 = vmatpush1.bf16.msra.mxu0 %v2764_v9  ;;  %2830 = vmatpush1.bf16.msra.mxu1 %v2770_v10 }
 0x23d   : > { %2870 = vmatprep.subr.bf16.mxu0 %v8895_v11  ;;  %8434 = vmatprep.subr.bf16.mxu1 %v9610_v16 }
 0x23f   : > { %7598 = vmatmul.mubr.msk.bf16.vlgmr.msra.gmra.mrb[8].mxu0 %vm1878_vm5, %v10129_v0  ;;  %7600 = vmatmul.mubr.msk.bf16.vlgmr.msra.gmra.mrb[4].mxu1 %vm1878_vm5, %v10129_v0 }
 0x240   : > { %2871 = vmatpush1.bf16.msra.mxu0 %v8893_v12  ;;  %8435 = vmatpush3.bf16.msra.mxu1 %v8896_v13 }
 0x241   : > { %7601 = vmatprep.subr.msk.bf16.mxu0 %vm1109_vm2, %v8897_v14  ;;  %8436 = vmatprep.subr.bf16.mxu1 %v9610_v16 }
 0x242   : > { %2902 = vmatprep.mubr.bf16.mxu0 %v9609_v15  ;;  %8438 = vmatprep.mubr.msk.bf16.mxu1 %vm9611_vm6, %v9610_v16 }
 0x244   : > { %2873 = vmatpush1.bf16.msra.mxu0 %v2776_v19  ;;  %8437 = vmatpush3.bf16.msra.mxu1 %v2782_v20 }
 0x245   : > { %2977 = vmatprep.subr.bf16.mxu0 %v8883_v1  ;;  %3020 = vmatprep.subr.bf16.mxu1 %v8886_v2  ;;  %v8951_v1 = vld [vmem:[%s11961_s8 + $0xa0] ss:$16 sps:$4 sm:$0xff]   ;;  %v8954_v2 = vld [vmem:[%s11961_s8 + $0xa8] ss:$16 sps:$4 sm:$0xff]  }
 0x247   : > { %7602 = vmatmul.mubr.msk.bf16.vlgmr.msra.gmra.mrb[12].mxu0 %vm1878_vm5, %v10129_v0  ;;  %8439 = vmatmul.mubr.msk.bf16.vlgmr.msra.gmra.mrb[28].mxu1 %vm1878_vm5, %v10129_v0  ;;  %v8956_v0 = vld [vmem:[%s11961_s8 + $0xac] ss:$16 sps:$4 sm:$0xff]  }
 0x248   : > { %2978 = vmatpush1.bf16.msra.mxu0 %v8881_v3  ;;  %3021 = vmatpush1.bf16.msra.mxu1 %v8884_v4  ;;  %v8959_v3 = vld [vmem:[%s11961_s8 + $0xc4] ss:$16 sps:$4 sm:$0xff]   ;;  %v8962_v4 = vld [vmem:[%s11961_s8 + $0xcc] ss:$16 sps:$4 sm:$0xff]  }
 0x249   : > { %7604 = vmatprep.subr.msk.bf16.mxu0 %vm1109_vm2, %v8887_v5  ;;  %7606 = vmatprep.subr.msk.bf16.mxu1 %vm1109_vm2, %v8890_v7  ;;  %v8957_v5 = vld [vmem:[%s11961_s8 + $0xc0] ss:$16 sps:$4 sm:$0xff]   ;;  %v8965_v7 = vld [vmem:[%s11961_s8 + $0xe4] ss:$16 sps:$4 sm:$0xff]  }
 0x24a   : > { %3009 = vmatprep.mubr.bf16.mxu0 %v9609_v15  ;;  %3052 = vmatprep.mubr.bf16.mxu1 %v9609_v15 }
 0x24c   : > { %2980 = vmatpush1.bf16.msra.mxu0 %v2764_v9  ;;  %3023 = vmatpush1.bf16.msra.mxu1 %v2770_v10  ;;  %v8963_v9 = vld [vmem:[%s11961_s8 + $0xe0] ss:$16 sps:$4 sm:$0xff]   ;;  %v8966_v10 = vld [vmem:[%s11961_s8 + $0xe8] ss:$16 sps:$4 sm:$0xff]  }
 0x24d   : > { %3063 = vmatprep.subr.bf16.mxu0 %v8895_v11  ;;  %8442 = vmatprep.subr.bf16.mxu1 %v9610_v16  ;;  %v8971_v11 = vld [vmem:[%s11961_s8 + $0x104] ss:$16 sps:$4 sm:$0xff]  }
 0x24f   : > { %7605 = vmatmul.mubr.msk.bf16.vlgmr.msra.gmra.mrb[16].mxu0 %vm1878_vm5, %v2973_v24  ;;  %7607 = vmatmul.mubr.msk.bf16.vlgmr.msra.gmra.mrb[16].mxu1 %vm1878_vm5, %v2973_v24 }
 0x250   : > { %3064 = vmatpush1.bf16.msra.mxu0 %v8893_v12  ;;  %8443 = vmatpush3.bf16.msra.mxu1 %v8896_v13  ;;  %v8974_v12 = vld [vmem:[%s11961_s8 + $0x10c] ss:$16 sps:$4 sm:$0xff]   ;;  %v8969_v13 = vld [vmem:[%s11961_s8 + $0x100] ss:$16 sps:$4 sm:$0xff]  }
 0x251   : > { %7608 = vmatprep.subr.msk.bf16.mxu0 %vm1109_vm2, %v8897_v14  ;;  %8444 = vmatprep.subr.bf16.mxu1 %v9610_v16  ;;  %v8972_v14 = vld [vmem:[%s11961_s8 + $0x108] ss:$16 sps:$4 sm:$0xff]  }
 0x252   : > { %3095 = vmatprep.mubr.bf16.mxu0 %v9609_v15  ;;  %8446 = vmatprep.mubr.msk.bf16.mxu1 %vm9611_vm6, %v9610_v16 }
 0x254   : > { %3066 = vmatpush1.bf16.msra.mxu0 %v2776_v19  ;;  %8445 = vmatpush3.bf16.msra.mxu1 %v2782_v20  ;;  %v8975_v19 = vld [vmem:[%s11961_s8 + $0x120] ss:$16 sps:$4 sm:$0xff]   ;;  %v8978_v20 = vld [vmem:[%s11961_s8 + $0x128] ss:$16 sps:$4 sm:$0xff]  }
 0x255   : > { %3264 = vmatprep.subr.bf16.mxu0 %v8903_v25  ;;  %3307 = vmatprep.subr.bf16.mxu1 %v8906_v26 }
 0x257   : > { %7609 = vmatmul.mubr.msk.bf16.vlgmr.msra.gmra.mrb[20].mxu0 %vm1878_vm5, %v2973_v24  ;;  %8447 = vmatmul.mubr.msk.bf16.vlgmr.msra.gmra.mrb[32].mxu1 %vm1878_vm5, %v2973_v24 }
 0x258   : > { %3265 = vmatpush1.bf16.msra.mxu0 %v8901_v27  ;;  %3308 = vmatpush1.bf16.msra.mxu1 %v8904_v28 }
 0x259   : > { %7641 = vmatprep.subr.msk.bf16.mxu0 %vm1109_vm2, %v8907_v29  ;;  %7643 = vmatprep.subr.msk.bf16.mxu1 %vm1109_vm2, %v8910_v31 }
 0x25a   : > { %3296 = vmatprep.mubr.bf16.mxu0 %v9609_v15  ;;  %3339 = vmatprep.mubr.bf16.mxu1 %v9609_v15 }
 0x25c   : > { %3267 = vmatpush1.bf16.msra.mxu0 %v3244_v33  ;;  %3310 = vmatpush1.bf16.msra.mxu1 %v3250_v34 }
 0x25d   : > { %3350 = vmatprep.subr.bf16.mxu0 %v8915_v35  ;;  %8450 = vmatprep.subr.bf16.mxu1 %v9610_v16 }
 0x25f   : > { %7642 = vmatmul.mubr.msk.bf16.vlgmr.msra.gmra.mrb[8].mxu0 %vm1878_vm5, %v2973_v24  ;;  %7644 = vmatmul.mubr.msk.bf16.vlgmr.msra.gmra.mrb[4].mxu1 %vm1878_vm5, %v2973_v24 }
 0x260   : > { %3351 = vmatpush1.bf16.msra.mxu0 %v8913_v36  ;;  %8451 = vmatpush3.bf16.msra.mxu1 %v8916_v37 }
 0x261   : > { %7645 = vmatprep.subr.msk.bf16.mxu0 %vm1109_vm2, %v8917_v38  ;;  %8452 = vmatprep.subr.bf16.mxu1 %v9610_v16 }
 0x262   : > { %3382 = vmatprep.mubr.bf16.mxu0 %v9609_v15  ;;  %8454 = vmatprep.mubr.msk.bf16.mxu1 %vm9611_vm6, %v9610_v16 }
 0x264   : > { %3353 = vmatpush1.bf16.msra.mxu0 %v3256_v41  ;;  %8453 = vmatpush3.bf16.msra.mxu1 %v3262_v42 }
 0x265   : > { %3453 = vmatprep.subr.bf16.mxu0 %v8903_v25  ;;  %3496 = vmatprep.subr.bf16.mxu1 %v8906_v26  ;;  %v8989_v25 = vld [vmem:[%s11961_s8 + $0x164] ss:$16 sps:$4 sm:$0xff]   ;;  %v8992_v26 = vld [vmem:[%s11961_s8 + $0x16c] ss:$16 sps:$4 sm:$0xff]  }
 0x267   : > { %7646 = vmatmul.mubr.msk.bf16.vlgmr.msra.gmra.mrb[12].mxu0 %vm1878_vm5, %v2973_v24  ;;  %8455 = vmatmul.mubr.msk.bf16.vlgmr.msra.gmra.mrb[36].mxu1 %vm1878_vm5, %v2973_v24  ;;  %v8984_v24 = vld [vmem:[%s11961_s8 + $0x148] ss:$16 sps:$4 sm:$0xff]  }
 0x268   : > { %3454 = vmatpush1.bf16.msra.mxu0 %v8901_v27  ;;  %3497 = vmatpush1.bf16.msra.mxu1 %v8904_v28  ;;  %v8987_v27 = vld [vmem:[%s11961_s8 + $0x160] ss:$16 sps:$4 sm:$0xff]   ;;  %v8990_v28 = vld [vmem:[%s11961_s8 + $0x168] ss:$16 sps:$4 sm:$0xff]  }
 0x269   : > { %7648 = vmatprep.subr.msk.bf16.mxu0 %vm1109_vm2, %v8907_v29  ;;  %7650 = vmatprep.subr.msk.bf16.mxu1 %vm1109_vm2, %v8910_v31  ;;  %v8995_v29 = vld [vmem:[%s11961_s8 + $0x184] ss:$16 sps:$4 sm:$0xff]   ;;  %v8993_v31 = vld [vmem:[%s11961_s8 + $0x180] ss:$16 sps:$4 sm:$0xff]  }
 0x26a   : > { %3485 = vmatprep.mubr.bf16.mxu0 %v9609_v15  ;;  %3528 = vmatprep.mubr.bf16.mxu1 %v9609_v15 }
 0x26c   : > { %3456 = vmatpush1.bf16.msra.mxu0 %v3244_v33  ;;  %3499 = vmatpush1.bf16.msra.mxu1 %v3250_v34  ;;  %v9001_v33 = vld [vmem:[%s11961_s8 + $0x1a4] ss:$16 sps:$4 sm:$0xff]   ;;  %v9004_v34 = vld [vmem:[%s11961_s8 + $0x1ac] ss:$16 sps:$4 sm:$0xff]  }
 0x26d   : > { %3539 = vmatprep.subr.bf16.mxu0 %v8915_v35  ;;  %8458 = vmatprep.subr.bf16.mxu1 %v9610_v16  ;;  %v8999_v35 = vld [vmem:[%s11961_s8 + $0x1a0] ss:$16 sps:$4 sm:$0xff]  }
 0x26f   : > { %7649 = vmatmul.mubr.msk.bf16.vlgmr.msra.gmra.mrb[16].mxu0 %vm1878_vm5, %v3449_v43  ;;  %7651 = vmatmul.mubr.msk.bf16.vlgmr.msra.gmra.mrb[16].mxu1 %vm1878_vm5, %v3449_v43 }
 0x270   : > { %3540 = vmatpush1.bf16.msra.mxu0 %v8913_v36  ;;  %8459 = vmatpush3.bf16.msra.mxu1 %v8916_v37  ;;  %v9002_v36 = vld [vmem:[%s11961_s8 + $0x1a8] ss:$16 sps:$4 sm:$0xff]   ;;  %v9007_v37 = vld [vmem:[%s11961_s8 + $0x1c4] ss:$16 sps:$4 sm:$0xff]  }
 0x271   : > { %7652 = vmatprep.subr.msk.bf16.mxu0 %vm1109_vm2, %v8917_v38  ;;  %8460 = vmatprep.subr.bf16.mxu1 %v9610_v16  ;;  %v9010_v38 = vld [vmem:[%s11961_s8 + $0x1cc] ss:$16 sps:$4 sm:$0xff]  }
 0x272   : > { %3571 = vmatprep.mubr.bf16.mxu0 %v9609_v15  ;;  %8462 = vmatprep.mubr.msk.bf16.mxu1 %vm9611_vm6, %v9610_v16  ;;  %v8924_v16 = vld [vmem:[%s11961_s8 + $0x8] ss:$16 sps:$4 sm:$0xff]  }
 0x274   : > { %3542 = vmatpush1.bf16.msra.mxu0 %v3256_v41  ;;  %8461 = vmatpush3.bf16.msra.mxu1 %v3262_v42  ;;  %v9013_v41 = vld [vmem:[%s11961_s8 + $0x1e4] ss:$16 sps:$4 sm:$0xff]   ;;  %v9016_v42 = vld [vmem:[%s11961_s8 + $0x1ec] ss:$16 sps:$4 sm:$0xff]  }
 0x275   : > { %5260 = vmatprep.subr.bf16.mxu0 %v8923_v44  ;;  %5432 = vmatprep.subr.bf16.mxu1 %v8926_v45  ;;  %v9014_v44 = vld [vmem:[%s11961_s8 + $0x1e8] ss:$16 sps:$4 sm:$0xff]   ;;  %v9019_v45 = vld [vmem:[%s11961_s8 + $0x204] ss:$16 sps:$4 sm:$0xff]  }
 0x277   : > { %7653 = vmatmul.mubr.msk.bf16.vlgmr.msra.gmra.mrb[20].mxu0 %vm1878_vm5, %v3449_v43  ;;  %8463 = vmatmul.mubr.msk.bf16.vlgmr.msra.gmra.mrb[40].mxu1 %vm1878_vm5, %v3449_v43  ;;  %v9011_v43 = vld [vmem:[%s11961_s8 + $0x1e0] ss:$16 sps:$4 sm:$0xff]  }
 0x278   : > { %5261 = vmatpush1.bf16.msra.mxu0 %v8921_v46  ;;  %5433 = vmatpush1.bf16.msra.mxu1 %v8924_v16  ;;  %v9022_v46 = vld [vmem:[%s11961_s8 + $0x20c] ss:$16 sps:$4 sm:$0xff]  }
 0x279   : > { %5262 = vmatprep.subr.bf16.mxu0 %v8929_v47  ;;  %5434 = vmatprep.subr.bf16.mxu1 %v8932_v48 }
 0x27c   : > { %5263 = vmatpush1.bf16.msra.mxu0 %v8927_v49  ;;  %5435 = vmatpush1.bf16.msra.mxu1 %v8930_v50 }
 0x27d   : > { %5264 = vmatprep.subr.bf16.mxu0 %v8935_v51  ;;  %5436 = vmatprep.subr.bf16.mxu1 %v8938_v52 }
 0x280   : > { %5265 = vmatpush1.bf16.msra.mxu0 %v8933_v53  ;;  %5437 = vmatpush1.bf16.msra.mxu1 %v8936_v54 }
 0x281   : > { %5266 = vmatprep.subr.bf16.mxu0 %v8941_v55  ;;  %5438 = vmatprep.subr.bf16.mxu1 %v8944_v56 }
 0x284   : > { %5267 = vmatpush1.bf16.msra.mxu0 %v8939_v57  ;;  %5439 = vmatpush1.bf16.msra.mxu1 %v8942_v58 }
 0x285   : > { %5268 = vmatprep.subr.bf16.mxu0 %v8947_v59  ;;  %5440 = vmatprep.subr.bf16.mxu1 %v8950_v60 }
 0x288   : > { %5269 = vmatpush1.bf16.msra.mxu0 %v8945_v61  ;;  %5441 = vmatpush1.bf16.msra.mxu1 %v8948_v62 }
 0x289   : > { %5270 = vmatprep.subr.bf16.mxu0 %v8953_v63  ;;  %5442 = vmatprep.subr.bf16.mxu1 %v8956_v0 }
 0x28c   : > { %5271 = vmatpush1.bf16.msra.mxu0 %v8951_v1  ;;  %5443 = vmatpush1.bf16.msra.mxu1 %v8954_v2 }
 0x28d   : > { %5272 = vmatprep.subr.bf16.mxu0 %v8959_v3  ;;  %5444 = vmatprep.subr.bf16.mxu1 %v8962_v4 }
 0x290   : > { %5273 = vmatpush1.bf16.msra.mxu0 %v8957_v5  ;;  %5445 = vmatpush1.bf16.msra.mxu1 %v8960_v6 }
 0x291   : > { %5274 = vmatprep.subr.bf16.mxu0 %v8965_v7  ;;  %5446 = vmatprep.subr.bf16.mxu1 %v8968_v8  ;;  %v3639_v8 = vlaneseq }
 0x294   : > { %5275 = vmatpush1.bf16.msra.mxu0 %v8963_v9  ;;  %5447 = vmatpush1.bf16.msra.mxu1 %v8966_v10  ;;  %v10536_v9 = vshrl.u32 %v3639_v8, 7 }
 0x295   : > { %5276 = vmatprep.subr.bf16.mxu0 %v8971_v11  ;;  %5448 = vmatprep.subr.bf16.mxu1 %v8974_v12 }
 0x298   : > { %5277 = vmatpush1.bf16.msra.mxu0 %v8969_v13  ;;  %5449 = vmatpush1.bf16.msra.mxu1 %v8972_v14  ;;  %v3641_v13 = vsub.s32 0, %v10536_v9  ;;  %v3649_v14 = vsub.s32 2, %v10536_v9 }
 0x299   : > { %5278 = vmatprep.subr.bf16.mxu0 %v8977_v17  ;;  %5450 = vmatprep.subr.bf16.mxu1 %v8980_v18  ;;  %v3637_v18 = vld [vmem:[%s11959_s6] sm:$0x7f] }
 0x29c   : > { %5279 = vmatpush1.bf16.msra.mxu0 %v8975_v19  ;;  %5451 = vmatpush1.bf16.msra.mxu1 %v8978_v20  ;;  %v3645_v19 = vsub.s32 1, %v10536_v9  ;;  %v3653_v20 = vsub.s32 3, %v10536_v9 }
 0x29d   : > { %5280 = vmatprep.subr.bf16.mxu0 %v8983_v21  ;;  %5452 = vmatprep.subr.bf16.mxu1 %v8986_v22 }
 0x2a0   : > { %5281 = vmatpush1.bf16.msra.mxu0 %v8981_v23  ;;  %5453 = vmatpush1.bf16.msra.mxu1 %v8984_v24  ;;  %v10551_v23 = vrot.slane %v3637_v18, %v3641_v13  ;;  %v10555_v24 = vrot.slane %v3637_v18, %v3649_v14 }
 0x2a1   : > { %5282 = vmatprep.subr.bf16.mxu0 %v8989_v25  ;;  %5454 = vmatprep.subr.bf16.mxu1 %v8992_v26  ;;  %v10559_v25 = vrot.slane %v3637_v18, %v3645_v19  ;;  %v10563_v26 = vrot.slane %v3637_v18, %v3653_v20 }
 0x2a4   : > { %5283 = vmatpush1.bf16.msra.mxu0 %v8987_v27  ;;  %5455 = vmatpush1.bf16.msra.mxu1 %v8990_v28  ;;  %v3657_v27 = vsub.s32 4, %v10536_v9  ;;  %v3661_v28 = vsub.s32 5, %v10536_v9 }
 0x2a5   : > { %5284 = vmatprep.subr.bf16.mxu0 %v8995_v29  ;;  %5456 = vmatprep.subr.bf16.mxu1 %v8998_v30 }
 0x2a8   : > { %5285 = vmatpush1.bf16.msra.mxu0 %v8993_v31  ;;  %5457 = vmatpush1.bf16.msra.mxu1 %v8996_v32  ;;  %v3665_v31 = vsub.s32 6, %v10536_v9 }
 0x2a9   : > { %5286 = vmatprep.subr.bf16.mxu0 %v9001_v33  ;;  %5458 = vmatprep.subr.bf16.mxu1 %v9004_v34 }
 0x2ac   : > { %5287 = vmatpush1.bf16.msra.mxu0 %v8999_v35  ;;  %5459 = vmatpush1.bf16.msra.mxu1 %v9002_v36 }
 0x2ad   : > { %5288 = vmatprep.subr.bf16.mxu0 %v9007_v37  ;;  %5460 = vmatprep.subr.bf16.mxu1 %v9010_v38 }
 0x2b0   : > { %5289 = vmatpush1.bf16.msra.mxu0 %v9005_v39  ;;  %5461 = vmatpush1.bf16.msra.mxu1 %v9008_v40 }
 0x2b1   : > { %5290 = vmatprep.subr.bf16.mxu0 %v9013_v41  ;;  %5462 = vmatprep.subr.bf16.mxu1 %v9016_v42  ;;  %v10572_v41 = vrot.slane %v3637_v18, %v3657_v27  ;;  %v10574_v42 = vrot.slane %v3637_v18, %v3661_v28 }
 0x2b4   : > { %5291 = vmatpush1.bf16.msra.mxu0 %v9011_v43  ;;  %5463 = vmatpush1.bf16.msra.mxu1 %v9014_v44  ;;  %v10576_v44 = vrot.slane %v3637_v18, %v3665_v31 }
 0x2b5   : > { %5303 = vmatprep.subr.bf16.mxu0 %v9019_v45  ;;  %5475 = vmatprep.subr.bf16.mxu1 %v9022_v46 }
 0x2da   : > { %v2066_v16 = vpop.f32.mrb[8].mxu1 }
 0x2db   : > { %v8408_v47 = vpop.f32.mrb[9].mxu1 }
 0x2dc   : > { %v2069_v48 = vpop.f32.mrb[10].mxu1 }
 0x2dd   : > { %v8409_v49 = vpop.f32.mrb[11].mxu1 }
 0x2ea   : > { %v2325_v50 = vpop.f32.mrb[12].mxu1 }
 0x2eb   : > { %v2326_v51 = vadd.f32 %v2325_v50, %v2066_v16  ;;  %v8416_v52 = vpop.f32.mrb[13].mxu1 }
 0x2ec   : > { %v2328_v53 = vpop.f32.mrb[14].mxu1 }
 0x2ed   : > { %v2329_v54 = vadd.f32 %v2328_v53, %v2069_v48  ;;  %v8417_v55 = vpop.f32.mrb[15].mxu1 }
 0x2fa   : > { %v2504_v56 = vpop.f32.mrb[20].mxu1 }
 0x2fb   : > { %v8424_v57 = vpop.f32.mrb[21].mxu1 }
 0x2fc   : > { %v2507_v58 = vpop.f32.mrb[22].mxu1 }
 0x2fd   : > { %v8425_v59 = vpop.f32.mrb[23].mxu1 }
 0x30a   : > { %v2674_v60 = vpop.f32.mrb[24].mxu1 }
 0x30b   : > { %v2675_v61 = vadd.f32 %v2674_v60, %v2504_v56  ;;  %v8432_v62 = vpop.f32.mrb[25].mxu1 }
 0x30c   : > { %v2677_v63 = vpop.f32.mrb[26].mxu1 }
 0x30d   : > { %v2678_v0 = vadd.f32 %v2677_v63, %v2507_v58  ;;  %v8433_v1 = vpop.f32.mrb[27].mxu1 }
 0x31a   : > { %v2947_v2 = vpop.f32.mrb[28].mxu1 }
 0x31b   : > { %v10532_v3 = vadd.f32 %v2947_v2, %v2326_v51  ;;  %v8440_v4 = vpop.f32.mrb[29].mxu1 }
 0x31c   : > { %v2950_v5 = vpop.f32.mrb[30].mxu1 }
 0x31d   : > { %v10534_v6 = vadd.f32 %v2950_v5, %v2329_v54  ;;  %v8441_v7 = vpop.f32.mrb[31].mxu1 }
 0x32a   : > { %v3140_v10 = vpop.f32.mrb[32].mxu1 }
 0x32b   : > { %v10538_v11 = vadd.f32 %v3140_v10, %v2675_v61  ;;  %v8448_v12 = vpop.f32.mrb[33].mxu1 }
 0x32c   : > { %v3143_v17 = vpop.f32.mrb[34].mxu1 }
 0x32d   : > { %v10547_v21 = vadd.f32 %v3143_v17, %v2678_v0  ;;  %v8449_v22 = vpop.f32.mrb[35].mxu1 }
 0x332   : > { %v3298_v29 = vpop.f32.mrb[8].mxu0  ;;  %v3341_v30 = vpop.f32.mrb[4].mxu1 }
 0x333   : > { %v3674_v32 = vadd.f32 %v10551_v23, %v3298_v29  ;;  %v3676_v33 = vadd.f32 %v10555_v24, %v3341_v30  ;;  %v3300_v34 = vpop.f32.mrb[9].mxu0  ;;  %v3343_v35 = vpop.f32.mrb[5].mxu1 }
 0x334   : > { %v3675_v36 = vadd.f32 %v10559_v25, %v3300_v34  ;;  %v3677_v37 = vadd.f32 %v10563_v26, %v3343_v35  ;;  %v3302_v38 = vpop.f32.mrb[10].mxu0  ;;  %v3345_v39 = vpop.f32.mrb[6].mxu1 }
 0x335   : > { %vm3688_vm9 = vcmp.gt.f32.partialorder %v3674_v32, 0.0  ;;  %v3702_v40 = vmul.f32 0.01, %v3674_v32  ;;  %vm3690_vm10 = vcmp.gt.f32.partialorder %v3676_v33, 0.0  ;;  %v3704_v43 = vmul.f32 0.01, %v3676_v33 }
 0x336   : > { %vm3689_vm11 = vcmp.gt.f32.partialorder %v3675_v36, 0.0  ;;  %v3703_v45 = vmul.f32 0.01, %v3675_v36  ;;  %vm3691_vm12 = vcmp.gt.f32.partialorder %v3677_v37, 0.0  ;;  %v3681_v46 = vadd.f32 %v10551_v23, %v3302_v38  ;;  %v3304_v47 = vpop.f32.mrb[11].mxu0  ;;  %v3347_v48 = vpop.f32.mrb[7].mxu1 }
 0x337   : > { %v3683_v16 = vadd.f32 %v10555_v24, %v3345_v39  ;;  %v3716_v49 = vsel %vm3688_vm9, %v3674_v32, %v3702_v40  ;;  %v3705_v50 = vmul.f32 0.01, %v3677_v37  ;;  %v3682_v51 = vadd.f32 %v10559_v25, %v3304_v47 }
 0x338   : > { %v3684_v52 = vadd.f32 %v10563_v26, %v3347_v48  ;;  %vm3695_vm13 = vcmp.gt.f32.partialorder %v3681_v46, 0.0  ;;  %v3709_v53 = vmul.f32 0.01, %v3681_v46  ;;  %v3718_v57 = vsel %vm3690_vm10, %v3676_v33, %v3704_v43 }
 0x339   : > { %vm3697_vm14 = vcmp.gt.f32.partialorder %v3683_v16, 0.0  ;;  %v3711_v54 = vmul.f32 0.01, %v3683_v16  ;;  %vm3696_vm15 = vcmp.gt.f32.partialorder %v3682_v51, 0.0  ;;  %v3710_v55 = vmul.f32 0.01, %v3682_v51 }
 0x33a   : > { %vm3698_vm0 = vcmp.gt.f32.partialorder %v3684_v52, 0.0  ;;  %v3712_v56 = vmul.f32 0.01, %v3684_v52  ;;  %v3723_v58 = vsel %vm3695_vm13, %v3681_v46, %v3709_v53  ;;  %v3384_v60 = vpop.f32.mrb[12].mxu0  ;;  %v3427_v61 = vpop.f32.mrb[36].mxu1  ;;  %v3717_v62 = vsel %vm3689_vm11, %v3675_v36, %v3703_v45 }
 0x33b   : > { %v3725_v59 = vsel %vm3697_vm14, %v3683_v16, %v3711_v54  ;;  %v10584_v63 = vpack.c.bf16 %v3723_v58, %v3716_v49  ;;  %v3678_v1 = vadd.f32 %v10572_v41, %v3384_v60  ;;  %v3440_v2 = vadd.f32 %v3427_v61, %v10532_v3  ;;  %v3386_v4 = vpop.f32.mrb[13].mxu0  ;;  %v8456_v5 = vpop.f32.mrb[37].mxu1 }
 0x33c   : > { %v10586_v0 = vpack.c.bf16 %v3725_v59, %v3718_v57  ;;  %v3679_v7 = vadd.f32 %v10574_v42, %v3386_v4  ;;  %v3388_v8 = vpop.f32.mrb[14].mxu0  ;;  %v3430_v10 = vpop.f32.mrb[38].mxu1  ;;  %v3724_v12 = vsel %vm3696_vm15, %v3682_v51, %v3710_v55  ;;  %v3719_v17 = vsel %vm3691_vm12, %v3677_v37, %v3705_v50 }
 0x33d   : > { %v3726_v18 = vsel %vm3698_vm0, %v3684_v52, %v3712_v56  ;;  %vm3692_vm2 = vcmp.gt.f32.partialorder %v3678_v1, 0.0  ;;  %v3706_v22 = vmul.f32 0.01, %v3678_v1  ;;  %v3680_v27 = vadd.f32 %v10576_v44, %v3440_v2  ;;  %v3390_v29 = vpop.f32.mrb[15].mxu0  ;;  %v8457_v3 = vpop.f32.mrb[39].mxu1 }
 0x33e   : > { %v3685_v28 = vadd.f32 %v10572_v41, %v3388_v8  ;;  %vm3693_vm3 = vcmp.gt.f32.partialorder %v3679_v7, 0.0  ;;  %v3707_v30 = vmul.f32 0.01, %v3679_v7  ;;  %v3447_v31 = vadd.f32 %v3430_v10, %v10534_v6 }
 0x33f   : > { %v3686_v32 = vadd.f32 %v10574_v42, %v3390_v29  ;;  %v3720_v33 = vsel %vm3692_vm2, %v3678_v1, %v3706_v22  ;;  %vm3694_vm4 = vcmp.gt.f32.partialorder %v3680_v27, 0.0  ;;  %v3708_v34 = vmul.f32 0.01, %v3680_v27 }
 0x340   : > { %vm3699_vm5 = vcmp.gt.f32.partialorder %v3685_v28, 0.0  ;;  %v3713_v35 = vmul.f32 0.01, %v3685_v28  ;;  %v3687_v36 = vadd.f32 %v10576_v44, %v3447_v31  ;;  %v10599_v43 = vpack.c.bf16 %v3724_v12, %v3717_v62 }
 0x341   : > { %vm3700_vm6 = vcmp.gt.f32.partialorder %v3686_v32, 0.0  ;;  %v3714_v37 = vmul.f32 0.01, %v3686_v32  ;;  %v3722_v38 = vsel %vm3694_vm4, %v3680_v27, %v3708_v34  ;;  %v10601_v45 = vpack.c.bf16 %v3726_v18, %v3719_v17 }
 0x342   : > { %v3487_v39 = vpop.f32.mrb[16].mxu0  ;;  %v3530_v40 = vpop.f32.mrb[16].mxu1  ;;  %v10604_v6 = vsel %vm3693_vm3, %v3679_v7, %v3707_v30  ;;  %v3727_v46 = vsel %vm3699_vm5, %v3685_v28, %v3713_v35  ;;  %vm3701_vm7 = vcmp.gt.f32.partialorder %v3687_v36, 0.0  ;;  %v3715_v16 = vmul.f32 0.01, %v3687_v36 }
 0x343   : > { %v3737_v47 = vadd.f32 %v10551_v23, %v3487_v39  ;;  %v3489_v48 = vpop.f32.mrb[17].mxu0  ;;  %v3532_v49 = vpop.f32.mrb[17].mxu1  ;;  %v10607_v50 = vpack.c.bf16 %v3727_v46, %v3720_v33  ;;  %v3739_v51 = vadd.f32 %v10555_v24, %v3530_v40  ;;  %v3728_v29 = vsel %vm3700_vm6, %v3686_v32, %v3714_v37 }
 0x344   : > { %v3738_v52 = vadd.f32 %v10559_v25, %v3489_v48  ;;  %v3740_v53 = vadd.f32 %v10563_v26, %v3532_v49  ;;  %v3491_v54 = vpop.f32.mrb[18].mxu0  ;;  %v3534_v55 = vpop.f32.mrb[18].mxu1  ;;  %v3729_v56 = vsel %vm3701_vm7, %v3687_v36, %v3715_v16  ;;  %vm5256_vm7 = vcmask 523264  }
 0x345   : > { %vm3751_vm8 = vcmp.gt.f32.partialorder %v3737_v47, 0.0  ;;  %v3765_v57 = vmul.f32 0.01, %v3737_v47  ;;  %v3744_v58 = vadd.f32 %v10551_v23, %v3491_v54  ;;  %v3493_v59 = vpop.f32.mrb[19].mxu0  ;;  %v3536_v60 = vpop.f32.mrb[19].mxu1  ;;  %v10613_v61 = vpack.c.bf16 %v3729_v56, %v3722_v38 }
 0x346   : > { %vm3753_vm9 = vcmp.gt.f32.partialorder %v3739_v51, 0.0  ;;  %v3767_v62 = vmul.f32 0.01, %v3739_v51  ;;  %vm3752_vm10 = vcmp.gt.f32.partialorder %v3738_v52, 0.0  ;;  %v3766_v2 = vmul.f32 0.01, %v3738_v52 }
 0x347   : > { %v3779_v1 = vsel %vm3751_vm8, %v3737_v47, %v3765_v57  ;;  %vm3754_vm11 = vcmp.gt.f32.partialorder %v3740_v53, 0.0  ;;  %v3768_v4 = vmul.f32 0.01, %v3740_v53  ;;  %vm3758_vm12 = vcmp.gt.f32.partialorder %v3744_v58, 0.0 }
 0x348   : > { %v3781_v5 = vsel %vm3753_vm9, %v3739_v51, %v3767_v62  ;;  %v3772_v7 = vmul.f32 0.01, %v3744_v58  ;;  %v3746_v8 = vadd.f32 %v10555_v24, %v3534_v55  ;;  %v3745_v10 = vadd.f32 %v10559_v25, %v3493_v59  ;;  %v9020_v59 = vld [vmem:[%s11961_s8 + $0x208] ss:$16 sps:$4 sm:$0xff]  }
 0x349   : > { %v3747_v23 = vadd.f32 %v10563_v26, %v3536_v60  ;;  %v3780_v12 = vsel %vm3752_vm10, %v3738_v52, %v3766_v2  ;;  %v3782_v17 = vsel %vm3754_vm11, %v3740_v53, %v3768_v4 }
 0x34a   : > { %v3786_v18 = vsel %vm3758_vm12, %v3744_v58, %v3772_v7  ;;  %vm3760_vm13 = vcmp.gt.f32.partialorder %v3746_v8, 0.0  ;;  %v3774_v22 = vmul.f32 0.01, %v3746_v8  ;;  %v3573_v27 = vpop.f32.mrb[20].mxu0  ;;  %v3616_v28 = vpop.f32.mrb[40].mxu1  ;;  %vm3759_vm14 = vcmp.gt.f32.partialorder %v3745_v10, 0.0 }
 0x34b   : > { %v3793_v3 = vpack.c.bf16 %v3786_v18, %v3779_v1  ;;  %v3773_v30 = vmul.f32 0.01, %v3745_v10  ;;  %vm3761_vm15 = vcmp.gt.f32.partialorder %v3747_v23, 0.0  ;;  %v3575_v31 = vpop.f32.mrb[21].mxu0  ;;  %v8464_v33 = vpop.f32.mrb[41].mxu1  ;;  %v3741_v25 = vadd.f32 %v10572_v41, %v3573_v27 }
 0x34c   : > { %v3788_v24 = vsel %vm3760_vm13, %v3746_v8, %v3774_v22  ;;  %v3775_v34 = vmul.f32 0.01, %v3747_v23  ;;  %v3629_v26 = vadd.f32 %v3616_v28, %v10538_v11  ;;  %v3577_v35 = vpop.f32.mrb[22].mxu0  ;;  %v3619_v36 = vpop.f32.mrb[42].mxu1  ;;  %v3742_v39 = vadd.f32 %v10574_v42, %v3575_v31  ;;  %v9017_v58 = vld [vmem:[%s11961_s8 + $0x200] ss:$16 sps:$4 sm:$0xff]  }
 0x34d   : > { %v10621_v38 = vpack.c.bf16 %v3788_v24, %v3781_v5  ;;  %v3748_v32 = vadd.f32 %v10572_v41, %v3577_v35  ;;  %v3636_v37 = vadd.f32 %v3619_v36, %v10547_v21  ;;  %v3579_v40 = vpop.f32.mrb[23].mxu0  ;;  %v8465_v46 = vpop.f32.mrb[43].mxu1  ;;  %vm3755_vm0 = vcmp.gt.f32.partialorder %v3741_v25, 0.0  ;;  %v9025_v8 = vld [vmem:[%s11961_s8 + $0x224] ss:$16 sps:$4 sm:$0xff]  }
 0x34e   : > { %v3769_v16 = vmul.f32 0.01, %v3741_v25  ;;  %v3743_v47 = vadd.f32 %v10576_v44, %v3629_v26  ;;  %v3749_v48 = vadd.f32 %v10574_v42, %v3579_v40  ;;  %vm3756_vm2 = vcmp.gt.f32.partialorder %v3742_v39, 0.0  ;;  %v9029_v18 = vld [vmem:[%s11961_s8 + $0x240] ss:$16 sps:$4 sm:$0xff]  }
 0x34f   : > { %v3770_v11 = vmul.f32 0.01, %v3742_v39  ;;  %vm3762_vm3 = vcmp.gt.f32.partialorder %v3748_v32, 0.0  ;;  %v3776_v49 = vmul.f32 0.01, %v3748_v32  ;;  %v3750_v53 = vadd.f32 %v10576_v44, %v3636_v37 }
 0x350   : > { %v3783_v51 = vsel %vm3755_vm0, %v3741_v25, %v3769_v16  ;;  %vm3757_vm4 = vcmp.gt.f32.partialorder %v3743_v47, 0.0  ;;  %v3771_v52 = vmul.f32 0.01, %v3743_v47  ;;  %vm3763_vm5 = vcmp.gt.f32.partialorder %v3749_v48, 0.0  ;;  %v9032_v22 = vld [vmem:[%s11961_s8 + $0x248] ss:$16 sps:$4 sm:$0xff]  }
 0x351   : > { %v3790_v41 = vsel %vm3762_vm3, %v3748_v32, %v3776_v49  ;;  %v3777_v21 = vmul.f32 0.01, %v3749_v48  ;;  %v3787_v54 = vsel %vm3759_vm14, %v3745_v10, %v3773_v30  ;;  %vm3764_vm6 = vcmp.gt.f32.partialorder %v3750_v53, 0.0  ;;  %v9028_v10 = vld [vmem:[%s11961_s8 + $0x22c] ss:$16 sps:$4 sm:$0xff]  }
 0x352   : > { %v3785_v55 = vsel %vm3757_vm4, %v3743_v47, %v3771_v52  ;;  %v10630_v56 = vpack.c.bf16 %v3790_v41, %v3783_v51  ;;  %v3778_v57 = vmul.f32 0.01, %v3750_v53  ;;  %v3794_v42 = vpack.c.bf16 %v3787_v54, %v3780_v12  ;;  %v9031_v12 = vld [vmem:[%s11961_s8 + $0x244] ss:$16 sps:$4 sm:$0xff]   ;;  %v9040_v28 = vld [vmem:[%s11961_s8 + $0x26c] ss:$16 sps:$4 sm:$0xff]  }
 0x353   : > { %v3789_v44 = vsel %vm3761_vm15, %v3747_v23, %v3775_v34  ;;  %v3784_v60 = vsel %vm3756_vm2, %v3742_v39, %v3770_v11  ;;  %v3791_v62 = vsel %vm3763_vm5, %v3749_v48, %v3777_v21  ;;  %v10643_v5 = vpack.c.bf16 %v3728_v29, %v10604_v6  ;;  %v9023_v6 = vld [vmem:[%s11961_s8 + $0x220] ss:$16 sps:$4 sm:$0xff]   ;;  %v9026_v23 = vld [vmem:[%s11961_s8 + $0x228] ss:$16 sps:$4 sm:$0xff]   ;;  %v9037_v27 = vld [vmem:[%s11961_s8 + $0x264] ss:$16 sps:$4 sm:$0xff]  }
 0x354   : > { %v3792_v1 = vsel %vm3764_vm6, %v3750_v53, %v3778_v57  ;;  %v3796_v2 = vpack.c.bf16 %v3789_v44, %v3782_v17  ;;  %v10640_v4 = vpack.c.bf16 %v3791_v62, %v3784_v60  ;;  %5292 = vmatprep.mubr.bf16.mxu0 %v3794_v42  ;;  %5464 = vmatprep.mubr.bf16.mxu1 %v3794_v42  ;;  %v9034_v17 = vld [vmem:[%s11961_s8 + $0x24c] ss:$16 sps:$4 sm:$0xff]   ;;  %v9035_v29 = vld [vmem:[%s11961_s8 + $0x260] ss:$16 sps:$4 sm:$0xff]   ;;  %v9043_v30 = vld [vmem:[%s11961_s8 + $0x284] ss:$16 sps:$4 sm:$0xff]  }
 0x355   : > { %v10645_v7 = vpack.c.bf16 %v3792_v1, %v3785_v55  ;;  %5293 = vmatmul.mubr.bf16.vlgmr.msra.gmra.mrb[24].mxu0 %v3793_v3  ;;  %5465 = vmatmul.mubr.bf16.vlgmr.msra.gmra.mrb[44].mxu1 %v3793_v3  ;;  %v9038_v3 = vld [vmem:[%s11961_s8 + $0x268] ss:$16 sps:$4 sm:$0xff]   ;;  %v9046_v31 = vld [vmem:[%s11961_s8 + $0x28c] ss:$16 sps:$4 sm:$0xff]   ;;  %v9041_v33 = vld [vmem:[%s11961_s8 + $0x280] ss:$16 sps:$4 sm:$0xff]  }
 0x356   : > { %5304 = vmatpush1.bf16.msra.mxu0 %v9017_v58  ;;  %5476 = vmatpush1.bf16.msra.mxu1 %v9020_v59  ;;  %v9044_v24 = vld [vmem:[%s11961_s8 + $0x288] ss:$16 sps:$4 sm:$0xff]   ;;  %v9049_v34 = vld [vmem:[%s11961_s8 + $0x2a4] ss:$16 sps:$4 sm:$0xff]   ;;  %v9052_v25 = vld [vmem:[%s11961_s8 + $0x2ac] ss:$16 sps:$4 sm:$0xff]  }
 0x357   : > { %5335 = vmatprep.mubr.bf16.mxu0 %v3796_v2  ;;  %5507 = vmatprep.mubr.bf16.mxu1 %v3796_v2  ;;  %v9047_v26 = vld [vmem:[%s11961_s8 + $0x2a0] ss:$16 sps:$4 sm:$0xff]   ;;  %v9050_v35 = vld [vmem:[%s11961_s8 + $0x2a8] ss:$16 sps:$4 sm:$0xff]   ;;  %v9055_v36 = vld [vmem:[%s11961_s8 + $0x2c4] ss:$16 sps:$4 sm:$0xff]  }
 0x358   : > { %5305 = vmatprep.subr.bf16.mxu0 %v9025_v8  ;;  %5477 = vmatprep.subr.bf16.mxu1 %v9028_v10  ;;  %v9058_v39 = vld [vmem:[%s11961_s8 + $0x2cc] ss:$16 sps:$4 sm:$0xff]   ;;  %v9053_v32 = vld [vmem:[%s11961_s8 + $0x2c0] ss:$16 sps:$4 sm:$0xff]   ;;  %v9056_v37 = vld [vmem:[%s11961_s8 + $0x2c8] ss:$16 sps:$4 sm:$0xff]  }
 0x359   : > { %v9061_v40 = vld [vmem:[%s11961_s8 + $0x2e4] ss:$16 sps:$4 sm:$0xff]   ;;  %v9064_v46 = vld [vmem:[%s11961_s8 + $0x2ec] ss:$16 sps:$4 sm:$0xff]   ;;  %v9059_v16 = vld [vmem:[%s11961_s8 + $0x2e0] ss:$16 sps:$4 sm:$0xff]  }
 0x35a   : > { %5306 = vmatpush1.bf16.msra.mxu0 %v9023_v6  ;;  %5478 = vmatpush1.bf16.msra.mxu1 %v9026_v23  ;;  %v9062_v47 = vld [vmem:[%s11961_s8 + $0x2e8] ss:$16 sps:$4 sm:$0xff]   ;;  %v9067_v48 = vld [vmem:[%s11961_s8 + $0x304] ss:$16 sps:$4 sm:$0xff]   ;;  %v9070_v11 = vld [vmem:[%s11961_s8 + $0x30c] ss:$16 sps:$4 sm:$0xff]  }
 0x35b   : > { %5307 = vmatprep.subr.bf16.mxu0 %v9031_v12  ;;  %5479 = vmatprep.subr.bf16.mxu1 %v9034_v17  ;;  %v9065_v49 = vld [vmem:[%s11961_s8 + $0x300] ss:$16 sps:$4 sm:$0xff]   ;;  %v9068_v51 = vld [vmem:[%s11961_s8 + $0x308] ss:$16 sps:$4 sm:$0xff]   ;;  %v9073_v52 = vld [vmem:[%s11961_s8 + $0x324] ss:$16 sps:$4 sm:$0xff]  }
 0x35c   : > { %v9076_v53 = vld [vmem:[%s11961_s8 + $0x32c] ss:$16 sps:$4 sm:$0xff]   ;;  %v9071_v41 = vld [vmem:[%s11961_s8 + $0x320] ss:$16 sps:$4 sm:$0xff]   ;;  %v9074_v21 = vld [vmem:[%s11961_s8 + $0x328] ss:$16 sps:$4 sm:$0xff]  }
 0x35d   : > { %v9079_v54 = vld [vmem:[%s11961_s8 + $0x344] ss:$16 sps:$4 sm:$0xff]   ;;  %v9082_v55 = vld [vmem:[%s11961_s8 + $0x34c] ss:$16 sps:$4 sm:$0xff]   ;;  %v9077_v57 = vld [vmem:[%s11961_s8 + $0x340] ss:$16 sps:$4 sm:$0xff]  }
 0x35e   : > { %5308 = vmatpush1.bf16.msra.mxu0 %v9029_v18  ;;  %5480 = vmatpush1.bf16.msra.mxu1 %v9032_v22  ;;  %v9080_v42 = vld [vmem:[%s11961_s8 + $0x348] ss:$16 sps:$4 sm:$0xff]   ;;  %v9085_v58 = vld [vmem:[%s11961_s8 + $0x364] ss:$16 sps:$4 sm:$0xff]   ;;  %v9088_v59 = vld [vmem:[%s11961_s8 + $0x36c] ss:$16 sps:$4 sm:$0xff]  }
 0x35f   : > { %5309 = vmatprep.subr.bf16.mxu0 %v9037_v27  ;;  %5481 = vmatprep.subr.bf16.mxu1 %v9040_v28  ;;  %v9083_v44 = vld [vmem:[%s11961_s8 + $0x360] ss:$16 sps:$4 sm:$0xff]   ;;  %v9086_v60 = vld [vmem:[%s11961_s8 + $0x368] ss:$16 sps:$4 sm:$0xff]   ;;  %v9091_v62 = vld [vmem:[%s11961_s8 + $0x384] ss:$16 sps:$4 sm:$0xff]  }
 0x360   : > { %v9094_v1 = vld [vmem:[%s11961_s8 + $0x38c] ss:$16 sps:$4 sm:$0xff]   ;;  %v9089_v2 = vld [vmem:[%s11961_s8 + $0x380] ss:$16 sps:$4 sm:$0xff]   ;;  %v9092_v8 = vld [vmem:[%s11961_s8 + $0x388] ss:$16 sps:$4 sm:$0xff]  }
 0x361   : > { %v9097_v10 = vld [vmem:[%s11961_s8 + $0x3a4] ss:$16 sps:$4 sm:$0xff]   ;;  %v9100_v6 = vld [vmem:[%s11961_s8 + $0x3ac] ss:$16 sps:$4 sm:$0xff]   ;;  %v9095_v23 = vld [vmem:[%s11961_s8 + $0x3a0] ss:$16 sps:$4 sm:$0xff]  }
 0x362   : > { %5310 = vmatpush1.bf16.msra.mxu0 %v9035_v29  ;;  %5482 = vmatpush1.bf16.msra.mxu1 %v9038_v3  ;;  %v9098_v12 = vld [vmem:[%s11961_s8 + $0x3a8] ss:$16 sps:$4 sm:$0xff]   ;;  %v9103_v17 = vld [vmem:[%s11961_s8 + $0x3c4] ss:$16 sps:$4 sm:$0xff]   ;;  %v9106_v18 = vld [vmem:[%s11961_s8 + $0x3cc] ss:$16 sps:$4 sm:$0xff]  }
 0x363   : > { %5311 = vmatprep.subr.bf16.mxu0 %v9043_v30  ;;  %5483 = vmatprep.subr.bf16.mxu1 %v9046_v31  ;;  %v9101_v22 = vld [vmem:[%s11961_s8 + $0x3c0] ss:$16 sps:$4 sm:$0xff]   ;;  %v9104_v27 = vld [vmem:[%s11961_s8 + $0x3c8] ss:$16 sps:$4 sm:$0xff]   ;;  %v9109_v28 = vld [vmem:[%s11961_s8 + $0x3e4] ss:$16 sps:$4 sm:$0xff]  }
 0x364   : > { %v9112_v29 = vld [vmem:[%s11961_s8 + $0x3ec] ss:$16 sps:$4 sm:$0xff]   ;;  %v9107_v3 = vld [vmem:[%s11961_s8 + $0x3e0] ss:$16 sps:$4 sm:$0xff]   ;;  %v9110_v30 = vld [vmem:[%s11961_s8 + $0x3e8] ss:$16 sps:$4 sm:$0xff]  }
 0x365   : > { %v9115_v31 = vld [vmem:[%s11961_s8 + $0x404] ss:$16 sps:$4 sm:$0xff]  }
 0x366   : > { %5312 = vmatpush1.bf16.msra.mxu0 %v9041_v33  ;;  %5484 = vmatpush1.bf16.msra.mxu1 %v9044_v24  ;;  %v9118_v33 = vld [vmem:[%s11961_s8 + $0x40c] ss:$16 sps:$4 sm:$0xff]   ;;  %v9113_v24 = vld [vmem:[%s11961_s8 + $0x400] ss:$16 sps:$4 sm:$0xff]  }
 0x367   : > { %5313 = vmatprep.subr.bf16.mxu0 %v9049_v34  ;;  %5485 = vmatprep.subr.bf16.mxu1 %v9052_v25  ;;  %v9116_v34 = vld [vmem:[%s11961_s8 + $0x408] ss:$16 sps:$4 sm:$0xff]   ;;  %v9121_v25 = vld [vmem:[%s11961_s8 + $0x424] ss:$16 sps:$4 sm:$0xff]  }
 0x36a   : > { %5314 = vmatpush1.bf16.msra.mxu0 %v9047_v26  ;;  %5486 = vmatpush1.bf16.msra.mxu1 %v9050_v35  ;;  %v9124_v26 = vld [vmem:[%s11961_s8 + $0x42c] ss:$16 sps:$4 sm:$0xff]   ;;  %v9119_v35 = vld [vmem:[%s11961_s8 + $0x420] ss:$16 sps:$4 sm:$0xff]  }
 0x36b   : > { %5315 = vmatprep.subr.bf16.mxu0 %v9055_v36  ;;  %5487 = vmatprep.subr.bf16.mxu1 %v9058_v39  ;;  %v9122_v36 = vld [vmem:[%s11961_s8 + $0x428] ss:$16 sps:$4 sm:$0xff]   ;;  %v9127_v39 = vld [vmem:[%s11961_s8 + $0x444] ss:$16 sps:$4 sm:$0xff]  }
 0x36e   : > { %5316 = vmatpush1.bf16.msra.mxu0 %v9053_v32  ;;  %5488 = vmatpush1.bf16.msra.mxu1 %v9056_v37  ;;  %v9125_v32 = vld [vmem:[%s11961_s8 + $0x440] ss:$16 sps:$4 sm:$0xff]   ;;  %v9133_v37 = vld [vmem:[%s11961_s8 + $0x464] ss:$16 sps:$4 sm:$0xff]  }
 0x36f   : > { %5317 = vmatprep.subr.bf16.mxu0 %v9061_v40  ;;  %5489 = vmatprep.subr.bf16.mxu1 %v9064_v46  ;;  %v9136_v40 = vld [vmem:[%s11961_s8 + $0x46c] ss:$16 sps:$4 sm:$0xff]   ;;  %v9131_v46 = vld [vmem:[%s11961_s8 + $0x460] ss:$16 sps:$4 sm:$0xff]  }
 0x372   : > { %5318 = vmatpush1.bf16.msra.mxu0 %v9059_v16  ;;  %5490 = vmatpush1.bf16.msra.mxu1 %v9062_v47  ;;  %v9134_v16 = vld [vmem:[%s11961_s8 + $0x468] ss:$16 sps:$4 sm:$0xff]   ;;  %v9139_v47 = vld [vmem:[%s11961_s8 + $0x484] ss:$16 sps:$4 sm:$0xff]  }
 0x373   : > { %5319 = vmatprep.subr.bf16.mxu0 %v9067_v48  ;;  %5491 = vmatprep.subr.bf16.mxu1 %v9070_v11  ;;  %v9142_v48 = vld [vmem:[%s11961_s8 + $0x48c] ss:$16 sps:$4 sm:$0xff]   ;;  %v9137_v11 = vld [vmem:[%s11961_s8 + $0x480] ss:$16 sps:$4 sm:$0xff]  }
 0x376   : > { %5320 = vmatpush1.bf16.msra.mxu0 %v9065_v49  ;;  %5492 = vmatpush1.bf16.msra.mxu1 %v9068_v51  ;;  %v9140_v49 = vld [vmem:[%s11961_s8 + $0x488] ss:$16 sps:$4 sm:$0xff]   ;;  %v9145_v51 = vld [vmem:[%s11961_s8 + $0x4a4] ss:$16 sps:$4 sm:$0xff]  }
 0x377   : > { %5321 = vmatprep.subr.bf16.mxu0 %v9073_v52  ;;  %5493 = vmatprep.subr.bf16.mxu1 %v9076_v53  ;;  %v9148_v52 = vld [vmem:[%s11961_s8 + $0x4ac] ss:$16 sps:$4 sm:$0xff]   ;;  %v9143_v53 = vld [vmem:[%s11961_s8 + $0x4a0] ss:$16 sps:$4 sm:$0xff]  }
 0x37a   : > { %5322 = vmatpush1.bf16.msra.mxu0 %v9071_v41  ;;  %5494 = vmatpush1.bf16.msra.mxu1 %v9074_v21  ;;  %v9146_v41 = vld [vmem:[%s11961_s8 + $0x4a8] ss:$16 sps:$4 sm:$0xff]   ;;  %v9151_v21 = vld [vmem:[%s11961_s8 + $0x4c4] ss:$16 sps:$4 sm:$0xff]  }
 0x37b   : > { %5323 = vmatprep.subr.bf16.mxu0 %v9079_v54  ;;  %5495 = vmatprep.subr.bf16.mxu1 %v9082_v55  ;;  %v9154_v54 = vld [vmem:[%s11961_s8 + $0x4cc] ss:$16 sps:$4 sm:$0xff]   ;;  %v9149_v55 = vld [vmem:[%s11961_s8 + $0x4c0] ss:$16 sps:$4 sm:$0xff]  }
 0x37e   : > { %5324 = vmatpush1.bf16.msra.mxu0 %v9077_v57  ;;  %5496 = vmatpush1.bf16.msra.mxu1 %v9080_v42  ;;  %v9152_v57 = vld [vmem:[%s11961_s8 + $0x4c8] ss:$16 sps:$4 sm:$0xff]   ;;  %v9157_v42 = vld [vmem:[%s11961_s8 + $0x4e4] ss:$16 sps:$4 sm:$0xff]  }
 0x37f   : > { %5325 = vmatprep.subr.bf16.mxu0 %v9085_v58  ;;  %5497 = vmatprep.subr.bf16.mxu1 %v9088_v59  ;;  %v9160_v58 = vld [vmem:[%s11961_s8 + $0x4ec] ss:$16 sps:$4 sm:$0xff]   ;;  %v9155_v59 = vld [vmem:[%s11961_s8 + $0x4e0] ss:$16 sps:$4 sm:$0xff]  }
 0x382   : > { %5326 = vmatpush1.bf16.msra.mxu0 %v9083_v44  ;;  %5498 = vmatpush1.bf16.msra.mxu1 %v9086_v60  ;;  %v9158_v44 = vld [vmem:[%s11961_s8 + $0x4e8] ss:$16 sps:$4 sm:$0xff]   ;;  %v9163_v60 = vld [vmem:[%s11961_s8 + $0x504] ss:$16 sps:$4 sm:$0xff]  }
 0x383   : > { %5327 = vmatprep.subr.bf16.mxu0 %v9091_v62  ;;  %5499 = vmatprep.subr.bf16.mxu1 %v9094_v1  ;;  %v9166_v62 = vld [vmem:[%s11961_s8 + $0x50c] ss:$16 sps:$4 sm:$0xff]   ;;  %v9161_v1 = vld [vmem:[%s11961_s8 + $0x500] ss:$16 sps:$4 sm:$0xff]  }
 0x386   : > { %5328 = vmatpush1.bf16.msra.mxu0 %v9089_v2  ;;  %5500 = vmatpush1.bf16.msra.mxu1 %v9092_v8  ;;  %v9164_v2 = vld [vmem:[%s11961_s8 + $0x508] ss:$16 sps:$4 sm:$0xff]   ;;  %v9169_v8 = vld [vmem:[%s11961_s8 + $0x524] ss:$16 sps:$4 sm:$0xff]  }
 0x387   : > { %5329 = vmatprep.subr.bf16.mxu0 %v9097_v10  ;;  %5501 = vmatprep.subr.bf16.mxu1 %v9100_v6  ;;  %v9172_v10 = vld [vmem:[%s11961_s8 + $0x52c] ss:$16 sps:$4 sm:$0xff]   ;;  %v9167_v6 = vld [vmem:[%s11961_s8 + $0x520] ss:$16 sps:$4 sm:$0xff]  }
 0x38a   : > { %5330 = vmatpush1.bf16.msra.mxu0 %v9095_v23  ;;  %5502 = vmatpush1.bf16.msra.mxu1 %v9098_v12  ;;  %v9170_v23 = vld [vmem:[%s11961_s8 + $0x528] ss:$16 sps:$4 sm:$0xff]   ;;  %v9175_v12 = vld [vmem:[%s11961_s8 + $0x544] ss:$16 sps:$4 sm:$0xff]  }
 0x38b   : > { %5331 = vmatprep.subr.bf16.mxu0 %v9103_v17  ;;  %5503 = vmatprep.subr.bf16.mxu1 %v9106_v18  ;;  %v9178_v17 = vld [vmem:[%s11961_s8 + $0x54c] ss:$16 sps:$4 sm:$0xff]   ;;  %v9173_v18 = vld [vmem:[%s11961_s8 + $0x540] ss:$16 sps:$4 sm:$0xff]  }
 0x38e   : > { %5332 = vmatpush1.bf16.msra.mxu0 %v9101_v22  ;;  %5504 = vmatpush1.bf16.msra.mxu1 %v9104_v27  ;;  %v9176_v22 = vld [vmem:[%s11961_s8 + $0x548] ss:$16 sps:$4 sm:$0xff]   ;;  %v9181_v27 = vld [vmem:[%s11961_s8 + $0x564] ss:$16 sps:$4 sm:$0xff]  }
 0x38f   : > { %5333 = vmatprep.subr.bf16.mxu0 %v9109_v28  ;;  %5505 = vmatprep.subr.bf16.mxu1 %v9112_v29  ;;  %v9184_v28 = vld [vmem:[%s11961_s8 + $0x56c] ss:$16 sps:$4 sm:$0xff]   ;;  %v9179_v29 = vld [vmem:[%s11961_s8 + $0x560] ss:$16 sps:$4 sm:$0xff]  }
 0x392   : > { %5334 = vmatpush1.bf16.msra.mxu0 %v9107_v3  ;;  %5506 = vmatpush1.bf16.msra.mxu1 %v9110_v30  ;;  %v9182_v3 = vld [vmem:[%s11961_s8 + $0x568] ss:$16 sps:$4 sm:$0xff]   ;;  %v9187_v30 = vld [vmem:[%s11961_s8 + $0x584] ss:$16 sps:$4 sm:$0xff]  }
 0x393   : > { %5346 = vmatprep.subr.bf16.mxu0 %v9115_v31  ;;  %5518 = vmatprep.subr.bf16.mxu1 %v9118_v33  ;;  %v9190_v31 = vld [vmem:[%s11961_s8 + $0x58c] ss:$16 sps:$4 sm:$0xff]   ;;  %v9185_v33 = vld [vmem:[%s11961_s8 + $0x580] ss:$16 sps:$4 sm:$0xff]  }
 0x395   : > { %5336 = vmatmul.mubr.bf16.vlgmr.msra.gmra.mrb[24].mxu0 %v10621_v38  ;;  %5508 = vmatmul.mubr.bf16.vlgmr.msra.gmra.mrb[44].mxu1 %v10621_v38  ;;  %v9130_v38 = vld [vmem:[%s11961_s8 + $0x44c] ss:$16 sps:$4 sm:$0xff]  }
 0x396   : > { %5347 = vmatpush1.bf16.msra.mxu0 %v9113_v24  ;;  %5378 = vmatprep.mubr.bf16.mxu0 %v10640_v4  ;;  %v9188_v24 = vld [vmem:[%s11961_s8 + $0x588] ss:$16 sps:$4 sm:$0xff]  }
 0x397   : > { %5519 = vmatpush1.bf16.msra.mxu1 %v9116_v34  ;;  %5550 = vmatprep.mubr.bf16.mxu1 %v10640_v4  ;;  %v9128_v4 = vld [vmem:[%s11961_s8 + $0x448] ss:$16 sps:$4 sm:$0xff]   ;;  %v9193_v34 = vld [vmem:[%s11961_s8 + $0x5a4] ss:$16 sps:$4 sm:$0xff]  }
 0x398   : > { %5348 = vmatprep.subr.bf16.mxu0 %v9121_v25  ;;  %5520 = vmatprep.subr.bf16.mxu1 %v9124_v26  ;;  %v9196_v25 = vld [vmem:[%s11961_s8 + $0x5ac] ss:$16 sps:$4 sm:$0xff]   ;;  %v9191_v26 = vld [vmem:[%s11961_s8 + $0x5a0] ss:$16 sps:$4 sm:$0xff]  }
 0x39a   : > { %5349 = vmatpush1.bf16.msra.mxu0 %v9119_v35  ;;  %v9194_v35 = vld [vmem:[%s11961_s8 + $0x5a8] ss:$16 sps:$4 sm:$0xff]  }
 0x39b   : > { %5521 = vmatpush1.bf16.msra.mxu1 %v9122_v36  ;;  %5350 = vmatprep.subr.bf16.mxu0 %v9127_v39  ;;  %v9199_v36 = vld [vmem:[%s11961_s8 + $0x5c4] ss:$16 sps:$4 sm:$0xff]   ;;  %v9202_v39 = vld [vmem:[%s11961_s8 + $0x5cc] ss:$16 sps:$4 sm:$0xff]  }
 0x39c   : > { %5522 = vmatprep.subr.bf16.mxu1 %v9130_v38  ;;  %v9197_v38 = vld [vmem:[%s11961_s8 + $0x5c0] ss:$16 sps:$4 sm:$0xff]  }
 0x39e   : > { %5351 = vmatpush1.bf16.msra.mxu0 %v9125_v32  ;;  %v9200_v32 = vld [vmem:[%s11961_s8 + $0x5c8] ss:$16 sps:$4 sm:$0xff]  }
 0x39f   : > { %5523 = vmatpush1.bf16.msra.mxu1 %v9128_v4  ;;  %5352 = vmatprep.subr.bf16.mxu0 %v9133_v37  ;;  %v9205_v4 = vld [vmem:[%s11961_s8 + $0x5e4] ss:$16 sps:$4 sm:$0xff]   ;;  %v9208_v37 = vld [vmem:[%s11961_s8 + $0x5ec] ss:$16 sps:$4 sm:$0xff]  }
 0x3a0   : > { %5524 = vmatprep.subr.bf16.mxu1 %v9136_v40  ;;  %v9203_v40 = vld [vmem:[%s11961_s8 + $0x5e0] ss:$16 sps:$4 sm:$0xff]  }
 0x3a2   : > { %5353 = vmatpush1.bf16.msra.mxu0 %v9131_v46  ;;  %v9206_v46 = vld [vmem:[%s11961_s8 + $0x5e8] ss:$16 sps:$4 sm:$0xff]  }
 0x3a3   : > { %5525 = vmatpush1.bf16.msra.mxu1 %v9134_v16  ;;  %5354 = vmatprep.subr.bf16.mxu0 %v9139_v47  ;;  %v9211_v16 = vld [vmem:[%s11961_s8 + $0x604] ss:$16 sps:$4 sm:$0xff]   ;;  %v9214_v47 = vld [vmem:[%s11961_s8 + $0x60c] ss:$16 sps:$4 sm:$0xff]  }
 0x3a4   : > { %5526 = vmatprep.subr.bf16.mxu1 %v9142_v48  ;;  %v9209_v48 = vld [vmem:[%s11961_s8 + $0x600] ss:$16 sps:$4 sm:$0xff]  }
 0x3a6   : > { %5355 = vmatpush1.bf16.msra.mxu0 %v9137_v11  ;;  %v9212_v11 = vld [vmem:[%s11961_s8 + $0x608] ss:$16 sps:$4 sm:$0xff]  }
 0x3a7   : > { %5527 = vmatpush1.bf16.msra.mxu1 %v9140_v49  ;;  %5356 = vmatprep.subr.bf16.mxu0 %v9145_v51  ;;  %v9217_v49 = vld [vmem:[%s11961_s8 + $0x624] ss:$16 sps:$4 sm:$0xff]   ;;  %v9220_v51 = vld [vmem:[%s11961_s8 + $0x62c] ss:$16 sps:$4 sm:$0xff]  }
 0x3a8   : > { %5528 = vmatprep.subr.bf16.mxu1 %v9148_v52  ;;  %v9215_v52 = vld [vmem:[%s11961_s8 + $0x620] ss:$16 sps:$4 sm:$0xff]  }
 0x3aa   : > { %5357 = vmatpush1.bf16.msra.mxu0 %v9143_v53  ;;  %v9218_v53 = vld [vmem:[%s11961_s8 + $0x628] ss:$16 sps:$4 sm:$0xff]  }
 0x3ab   : > { %5529 = vmatpush1.bf16.msra.mxu1 %v9146_v41  ;;  %5358 = vmatprep.subr.bf16.mxu0 %v9151_v21  ;;  %v9223_v41 = vld [vmem:[%s11961_s8 + $0x644] ss:$16 sps:$4 sm:$0xff]   ;;  %v9221_v21 = vld [vmem:[%s11961_s8 + $0x640] ss:$16 sps:$4 sm:$0xff]  }
 0x3ac   : > { %5530 = vmatprep.subr.bf16.mxu1 %v9154_v54  ;;  %v9224_v54 = vld [vmem:[%s11961_s8 + $0x648] ss:$16 sps:$4 sm:$0xff]  }
 0x3ae   : > { %5359 = vmatpush1.bf16.msra.mxu0 %v9149_v55  ;;  %v9229_v55 = vld [vmem:[%s11961_s8 + $0x664] ss:$16 sps:$4 sm:$0xff]  }
 0x3af   : > { %5531 = vmatpush1.bf16.msra.mxu1 %v9152_v57  ;;  %5360 = vmatprep.subr.bf16.mxu0 %v9157_v42  ;;  %v9232_v57 = vld [vmem:[%s11961_s8 + $0x66c] ss:$16 sps:$4 sm:$0xff]   ;;  %v9227_v42 = vld [vmem:[%s11961_s8 + $0x660] ss:$16 sps:$4 sm:$0xff]  }
 0x3b0   : > { %5532 = vmatprep.subr.bf16.mxu1 %v9160_v58  ;;  %v9230_v58 = vld [vmem:[%s11961_s8 + $0x668] ss:$16 sps:$4 sm:$0xff]  }
 0x3b2   : > { %5361 = vmatpush1.bf16.msra.mxu0 %v9155_v59  ;;  %v9235_v59 = vld [vmem:[%s11960_s7 + $0x4] ss:$16 sps:$4 sm:$0xff]  }
 0x3b3   : > { %5533 = vmatpush1.bf16.msra.mxu1 %v9158_v44  ;;  %5362 = vmatprep.subr.bf16.mxu0 %v9163_v60  ;;  %v9238_v44 = vld [vmem:[%s11960_s7 + $0xc] ss:$16 sps:$4 sm:$0xff]   ;;  %v9233_v60 = vld [vmem:[%s11960_s7] ss:$16 sps:$4 sm:$0xff]  }
 0x3b4   : > { %5534 = vmatprep.subr.bf16.mxu1 %v9166_v62  ;;  %v9236_v62 = vld [vmem:[%s11960_s7 + $0x8] ss:$16 sps:$4 sm:$0xff]  }
 0x3b6   : > { %5363 = vmatpush1.bf16.msra.mxu0 %v9161_v1  ;;  %v9241_v1 = vld [vmem:[%s11960_s7 + $0x24] ss:$16 sps:$4 sm:$0xff]  }
 0x3b7   : > { %5535 = vmatpush1.bf16.msra.mxu1 %v9164_v2  ;;  %5364 = vmatprep.subr.bf16.mxu0 %v9169_v8  ;;  %v9244_v2 = vld [vmem:[%s11960_s7 + $0x2c] ss:$16 sps:$4 sm:$0xff]   ;;  %v9239_v8 = vld [vmem:[%s11960_s7 + $0x20] ss:$16 sps:$4 sm:$0xff]  }
 0x3b8   : > { %5536 = vmatprep.subr.bf16.mxu1 %v9172_v10  ;;  %v9242_v10 = vld [vmem:[%s11960_s7 + $0x28] ss:$16 sps:$4 sm:$0xff]  }
 0x3ba   : > { %5365 = vmatpush1.bf16.msra.mxu0 %v9167_v6  ;;  %v9247_v6 = vld [vmem:[%s11960_s7 + $0x44] ss:$16 sps:$4 sm:$0xff]  }
 0x3bb   : > { %5537 = vmatpush1.bf16.msra.mxu1 %v9170_v23  ;;  %5366 = vmatprep.subr.bf16.mxu0 %v9175_v12  ;;  %v9245_v23 = vld [vmem:[%s11960_s7 + $0x40] ss:$16 sps:$4 sm:$0xff]   ;;  %v9248_v12 = vld [vmem:[%s11960_s7 + $0x48] ss:$16 sps:$4 sm:$0xff]  }
 0x3bc   : > { %5538 = vmatprep.subr.bf16.mxu1 %v9178_v17  ;;  %v9256_v17 = vld [vmem:[%s11960_s7 + $0x6c] ss:$16 sps:$4 sm:$0xff]  }
 0x3be   : > { %5367 = vmatpush1.bf16.msra.mxu0 %v9173_v18  ;;  %v9251_v18 = vld [vmem:[%s11960_s7 + $0x60] ss:$16 sps:$4 sm:$0xff]  }
 0x3bf   : > { %5539 = vmatpush1.bf16.msra.mxu1 %v9176_v22  ;;  %5368 = vmatprep.subr.bf16.mxu0 %v9181_v27  ;;  %v9254_v22 = vld [vmem:[%s11960_s7 + $0x68] ss:$16 sps:$4 sm:$0xff]   ;;  %v9259_v27 = vld [vmem:[%s11960_s7 + $0x84] ss:$16 sps:$4 sm:$0xff]  }
 0x3c0   : > { %5540 = vmatprep.subr.bf16.mxu1 %v9184_v28  ;;  %v9262_v28 = vld [vmem:[%s11960_s7 + $0x8c] ss:$16 sps:$4 sm:$0xff]  }
 0x3c2   : > { %5369 = vmatpush1.bf16.msra.mxu0 %v9179_v29  ;;  %v9257_v29 = vld [vmem:[%s11960_s7 + $0x80] ss:$16 sps:$4 sm:$0xff]  }
 0x3c3   : > { %5541 = vmatpush1.bf16.msra.mxu1 %v9182_v3  ;;  %5370 = vmatprep.subr.bf16.mxu0 %v9187_v30  ;;  %v9260_v3 = vld [vmem:[%s11960_s7 + $0x88] ss:$16 sps:$4 sm:$0xff]   ;;  %v9265_v30 = vld [vmem:[%s11960_s7 + $0xa4] ss:$16 sps:$4 sm:$0xff]  }
 0x3c4   : > { %5542 = vmatprep.subr.bf16.mxu1 %v9190_v31  ;;  %v9268_v31 = vld [vmem:[%s11960_s7 + $0xac] ss:$16 sps:$4 sm:$0xff]  }
 0x3c6   : > { %5371 = vmatpush1.bf16.msra.mxu0 %v9185_v33  ;;  %v9263_v33 = vld [vmem:[%s11960_s7 + $0xa0] ss:$16 sps:$4 sm:$0xff]  }
 0x3c7   : > { %5543 = vmatpush1.bf16.msra.mxu1 %v9188_v24  ;;  %5372 = vmatprep.subr.bf16.mxu0 %v9193_v34  ;;  %v9266_v24 = vld [vmem:[%s11960_s7 + $0xa8] ss:$16 sps:$4 sm:$0xff]   ;;  %v9271_v34 = vld [vmem:[%s11960_s7 + $0xc4] ss:$16 sps:$4 sm:$0xff]  }
 0x3c8   : > { %5544 = vmatprep.subr.bf16.mxu1 %v9196_v25  ;;  %v9274_v25 = vld [vmem:[%s11960_s7 + $0xcc] ss:$16 sps:$4 sm:$0xff]  }
 0x3ca   : > { %5373 = vmatpush1.bf16.msra.mxu0 %v9191_v26  ;;  %v9269_v26 = vld [vmem:[%s11960_s7 + $0xc0] ss:$16 sps:$4 sm:$0xff]  }
 0x3cb   : > { %5545 = vmatpush1.bf16.msra.mxu1 %v9194_v35  ;;  %5374 = vmatprep.subr.bf16.mxu0 %v9199_v36  ;;  %v9272_v35 = vld [vmem:[%s11960_s7 + $0xc8] ss:$16 sps:$4 sm:$0xff]   ;;  %v9277_v36 = vld [vmem:[%s11960_s7 + $0xe4] ss:$16 sps:$4 sm:$0xff]  }
 0x3cc   : > { %5546 = vmatprep.subr.bf16.mxu1 %v9202_v39  ;;  %v9280_v39 = vld [vmem:[%s11960_s7 + $0xec] ss:$16 sps:$4 sm:$0xff]  }
 0x3ce   : > { %5375 = vmatpush1.bf16.msra.mxu0 %v9197_v38  ;;  %v9275_v38 = vld [vmem:[%s11960_s7 + $0xe0] ss:$16 sps:$4 sm:$0xff]  }
 0x3cf   : > { %5547 = vmatpush1.bf16.msra.mxu1 %v9200_v32  ;;  %5376 = vmatprep.subr.bf16.mxu0 %v9205_v4  ;;  %v9278_v32 = vld [vmem:[%s11960_s7 + $0xe8] ss:$16 sps:$4 sm:$0xff]   ;;  %v9283_v4 = vld [vmem:[%s11960_s7 + $0x104] ss:$16 sps:$4 sm:$0xff]  }
 0x3d0   : > { %5548 = vmatprep.subr.bf16.mxu1 %v9208_v37  ;;  %v9286_v37 = vld [vmem:[%s11960_s7 + $0x10c] ss:$16 sps:$4 sm:$0xff]  }
 0x3d2   : > { %5377 = vmatpush1.bf16.msra.mxu0 %v9203_v40  ;;  %v9281_v40 = vld [vmem:[%s11960_s7 + $0x100] ss:$16 sps:$4 sm:$0xff]  }
 0x3d3   : > { %5549 = vmatpush1.bf16.msra.mxu1 %v9206_v46  ;;  %5389 = vmatprep.subr.bf16.mxu0 %v9211_v16  ;;  %v9284_v46 = vld [vmem:[%s11960_s7 + $0x108] ss:$16 sps:$4 sm:$0xff]   ;;  %v9289_v16 = vld [vmem:[%s11960_s7 + $0x124] ss:$16 sps:$4 sm:$0xff]  }
 0x3d4   : > { %5561 = vmatprep.subr.bf16.mxu1 %v9214_v47  ;;  %v9292_v47 = vld [vmem:[%s11960_s7 + $0x12c] ss:$16 sps:$4 sm:$0xff]  }
 0x3d5   : > { %5379 = vmatmul.mubr.bf16.vlgmr.msra.gmra.mrb[24].mxu0 %v10630_v56 }
 0x3d6   : > { %5551 = vmatmul.mubr.bf16.vlgmr.msra.gmra.mrb[44].mxu1 %v10630_v56  ;;  %5390 = vmatpush1.bf16.msra.mxu0 %v9209_v48  ;;  %v9226_v56 = vld [vmem:[%s11961_s8 + $0x64c] ss:$16 sps:$4 sm:$0xff]   ;;  %v9287_v48 = vld [vmem:[%s11960_s7 + $0x120] ss:$16 sps:$4 sm:$0xff]  }
 0x3d7   : > { %5562 = vmatpush1.bf16.msra.mxu1 %v9212_v11  ;;  %5391 = vmatprep.subr.bf16.mxu0 %v9217_v49  ;;  %v9290_v11 = vld [vmem:[%s11960_s7 + $0x128] ss:$16 sps:$4 sm:$0xff]   ;;  %v9295_v49 = vld [vmem:[%s11960_s7 + $0x144] ss:$16 sps:$4 sm:$0xff]  }
 0x3d8   : > { %5563 = vmatprep.subr.bf16.mxu1 %v9220_v51  ;;  %5421 = vmatprep.mubr.bf16.mxu0 %v9609_v15  ;;  %v9298_v51 = vld [vmem:[%s11960_s7 + $0x14c] ss:$16 sps:$4 sm:$0xff]  }
 0x3d9   : > { %5593 = vmatprep.mubr.bf16.mxu1 %v9609_v15 }
 0x3da   : > { %5392 = vmatpush1.bf16.msra.mxu0 %v9215_v52  ;;  %v9293_v52 = vld [vmem:[%s11960_s7 + $0x140] ss:$16 sps:$4 sm:$0xff]  }
 0x3db   : > { %5564 = vmatpush1.bf16.msra.mxu1 %v9218_v53  ;;  %5393 = vmatprep.subr.bf16.mxu0 %v9223_v41  ;;  %v9296_v53 = vld [vmem:[%s11960_s7 + $0x148] ss:$16 sps:$4 sm:$0xff]   ;;  %v9301_v41 = vld [vmem:[%s11960_s7 + $0x164] ss:$16 sps:$4 sm:$0xff]  }
 0x3dc   : > { %5565 = vmatprep.subr.bf16.mxu1 %v9226_v56  ;;  %v9304_v56 = vld [vmem:[%s11960_s7 + $0x16c] ss:$16 sps:$4 sm:$0xff]  }
 0x3de   : > { %5394 = vmatpush1.bf16.msra.mxu0 %v9221_v21  ;;  %v9299_v21 = vld [vmem:[%s11960_s7 + $0x160] ss:$16 sps:$4 sm:$0xff]  }
 0x3df   : > { %5566 = vmatpush1.bf16.msra.mxu1 %v9224_v54  ;;  %5395 = vmatprep.subr.bf16.mxu0 %v9229_v55  ;;  %v9302_v54 = vld [vmem:[%s11960_s7 + $0x168] ss:$16 sps:$4 sm:$0xff]   ;;  %v9307_v55 = vld [vmem:[%s11960_s7 + $0x184] ss:$16 sps:$4 sm:$0xff]  }
 0x3e0   : > { %5567 = vmatprep.subr.bf16.mxu1 %v9232_v57  ;;  %v9310_v57 = vld [vmem:[%s11960_s7 + $0x18c] ss:$16 sps:$4 sm:$0xff]  }
 0x3e2   : > { %5396 = vmatpush1.bf16.msra.mxu0 %v9227_v42  ;;  %v9305_v42 = vld [vmem:[%s11960_s7 + $0x180] ss:$16 sps:$4 sm:$0xff]  }
 0x3e3   : > { %5568 = vmatpush1.bf16.msra.mxu1 %v9230_v58  ;;  %6647 = vmatprep.subr.bf16.mxu0 %v9235_v59  ;;  %v9308_v58 = vld [vmem:[%s11960_s7 + $0x188] ss:$16 sps:$4 sm:$0xff]   ;;  %v9313_v59 = vld [vmem:[%s11960_s7 + $0x1a4] ss:$16 sps:$4 sm:$0xff]  }
 0x3e4   : > { %6819 = vmatprep.subr.bf16.mxu1 %v9238_v44  ;;  %v9316_v44 = vld [vmem:[%s11960_s7 + $0x1ac] ss:$16 sps:$4 sm:$0xff]  }
 0x3e5   : > { %7863 = vmatmul.mubr.msk.bf16.vlgmr.msra.gmra.mrb[24].mxu0 %vm5256_vm7, %v10645_v7 }
 0x3e6   : > { %7864 = vmatmul.mubr.msk.bf16.vlgmr.msra.gmra.mrb[44].mxu1 %vm5256_vm7, %v10645_v7  ;;  %6648 = vmatpush1.bf16.msra.mxu0 %v9233_v60  ;;  %v9250_v7 = vld [vmem:[%s11960_s7 + $0x4c] ss:$16 sps:$4 sm:$0xff]   ;;  %v9311_v60 = vld [vmem:[%s11960_s7 + $0x1a0] ss:$16 sps:$4 sm:$0xff]  }
 0x3e7   : > { %6679 = vmatprep.mubr.bf16.mxu0 %v10599_v43  ;;  %6820 = vmatpush1.bf16.msra.mxu1 %v9236_v62  ;;  %v9314_v62 = vld [vmem:[%s11960_s7 + $0x1a8] ss:$16 sps:$4 sm:$0xff]  }
 0x3e8   : > { %6851 = vmatprep.mubr.bf16.mxu1 %v10599_v43  ;;  %6649 = vmatprep.subr.bf16.mxu0 %v9241_v1  ;;  %v9253_v43 = vld [vmem:[%s11960_s7 + $0x64] ss:$16 sps:$4 sm:$0xff]  }
 0x3e9   : > { %6821 = vmatprep.subr.bf16.mxu1 %v9244_v2  ;;  %v9319_v1 = vld [vmem:[%s11960_s7 + $0x1c4] ss:$16 sps:$4 sm:$0xff]   ;;  %v9322_v2 = vld [vmem:[%s11960_s7 + $0x1cc] ss:$16 sps:$4 sm:$0xff]  }
 0x3ea   : > { %6650 = vmatpush1.bf16.msra.mxu0 %v9239_v8  ;;  %v9317_v8 = vld [vmem:[%s11960_s7 + $0x1c0] ss:$16 sps:$4 sm:$0xff]  }
 0x3eb   : > { %6822 = vmatpush1.bf16.msra.mxu1 %v9242_v10  ;;  %6651 = vmatprep.subr.bf16.mxu0 %v9247_v6  ;;  %v9320_v10 = vld [vmem:[%s11960_s7 + $0x1c8] ss:$16 sps:$4 sm:$0xff]   ;;  %v9325_v6 = vld [vmem:[%s11960_s7 + $0x1e4] ss:$16 sps:$4 sm:$0xff]  }
 0x3ec   : > { %6823 = vmatprep.subr.bf16.mxu1 %v9250_v7  ;;  %v9328_v7 = vld [vmem:[%s11960_s7 + $0x1ec] ss:$16 sps:$4 sm:$0xff]  }
 0x3ee   : > { %6652 = vmatpush1.bf16.msra.mxu0 %v9245_v23  ;;  %v9323_v23 = vld [vmem:[%s11960_s7 + $0x1e0] ss:$16 sps:$4 sm:$0xff]  }
 0x3ef   : > { %6824 = vmatpush1.bf16.msra.mxu1 %v9248_v12  ;;  %6653 = vmatprep.subr.bf16.mxu0 %v9253_v43  ;;  %v9326_v12 = vld [vmem:[%s11960_s7 + $0x1e8] ss:$16 sps:$4 sm:$0xff]   ;;  %v9331_v43 = vld [vmem:[%s11960_s7 + $0x204] ss:$16 sps:$4 sm:$0xff]  }
 0x3f0   : > { %6825 = vmatprep.subr.bf16.mxu1 %v9256_v17  ;;  %v9334_v17 = vld [vmem:[%s11960_s7 + $0x20c] ss:$16 sps:$4 sm:$0xff]  }
 0x3f2   : > { %6654 = vmatpush1.bf16.msra.mxu0 %v9251_v18  ;;  %v9329_v18 = vld [vmem:[%s11960_s7 + $0x200] ss:$16 sps:$4 sm:$0xff]  }
 0x3f3   : > { %6826 = vmatpush1.bf16.msra.mxu1 %v9254_v22  ;;  %6655 = vmatprep.subr.bf16.mxu0 %v9259_v27  ;;  %v9332_v22 = vld [vmem:[%s11960_s7 + $0x208] ss:$16 sps:$4 sm:$0xff]   ;;  %v9337_v27 = vld [vmem:[%s11960_s7 + $0x224] ss:$16 sps:$4 sm:$0xff]  }
 0x3f4   : > { %6827 = vmatprep.subr.bf16.mxu1 %v9262_v28  ;;  %v9340_v28 = vld [vmem:[%s11960_s7 + $0x22c] ss:$16 sps:$4 sm:$0xff]  }
 0x3f6   : > { %6656 = vmatpush1.bf16.msra.mxu0 %v9257_v29  ;;  %v9335_v29 = vld [vmem:[%s11960_s7 + $0x220] ss:$16 sps:$4 sm:$0xff]  }
 0x3f7   : > { %6828 = vmatpush1.bf16.msra.mxu1 %v9260_v3  ;;  %6657 = vmatprep.subr.bf16.mxu0 %v9265_v30  ;;  %v9338_v3 = vld [vmem:[%s11960_s7 + $0x228] ss:$16 sps:$4 sm:$0xff]   ;;  %v9343_v30 = vld [vmem:[%s11960_s7 + $0x244] ss:$16 sps:$4 sm:$0xff]  }
 0x3f8   : > { %6829 = vmatprep.subr.bf16.mxu1 %v9268_v31  ;;  %v9341_v31 = vld [vmem:[%s11960_s7 + $0x240] ss:$16 sps:$4 sm:$0xff]  }
 0x3fa   : > { %6658 = vmatpush1.bf16.msra.mxu0 %v9263_v33  ;;  %v9344_v33 = vld [vmem:[%s11960_s7 + $0x248] ss:$16 sps:$4 sm:$0xff]  }
 0x3fb   : > { %6830 = vmatpush1.bf16.msra.mxu1 %v9266_v24  ;;  %6659 = vmatprep.subr.bf16.mxu0 %v9271_v34  ;;  %v9352_v24 = vld [vmem:[%s11960_s7 + $0x26c] ss:$16 sps:$4 sm:$0xff]   ;;  %v9347_v34 = vld [vmem:[%s11960_s7 + $0x260] ss:$16 sps:$4 sm:$0xff]  }
 0x3fc   : > { %6831 = vmatprep.subr.bf16.mxu1 %v9274_v25  ;;  %v9350_v25 = vld [vmem:[%s11960_s7 + $0x268] ss:$16 sps:$4 sm:$0xff]  }
 0x3fe   : > { %6660 = vmatpush1.bf16.msra.mxu0 %v9269_v26  ;;  %v9355_v26 = vld [vmem:[%s11960_s7 + $0x284] ss:$16 sps:$4 sm:$0xff]  }
 0x3ff   : > { %6832 = vmatpush1.bf16.msra.mxu1 %v9272_v35  ;;  %6661 = vmatprep.subr.bf16.mxu0 %v9277_v36  ;;  %v9358_v35 = vld [vmem:[%s11960_s7 + $0x28c] ss:$16 sps:$4 sm:$0xff]   ;;  %v9353_v36 = vld [vmem:[%s11960_s7 + $0x280] ss:$16 sps:$4 sm:$0xff]  }
 0x400   : > { %6833 = vmatprep.subr.bf16.mxu1 %v9280_v39  ;;  %v9356_v39 = vld [vmem:[%s11960_s7 + $0x288] ss:$16 sps:$4 sm:$0xff]  }
 0x402   : > { %6662 = vmatpush1.bf16.msra.mxu0 %v9275_v38  ;;  %v9361_v38 = vld [vmem:[%s11960_s7 + $0x2a4] ss:$16 sps:$4 sm:$0xff]  }
 0x403   : > { %6834 = vmatpush1.bf16.msra.mxu1 %v9278_v32  ;;  %6663 = vmatprep.subr.bf16.mxu0 %v9283_v4  ;;  %v9364_v32 = vld [vmem:[%s11960_s7 + $0x2ac] ss:$16 sps:$4 sm:$0xff]   ;;  %v9359_v4 = vld [vmem:[%s11960_s7 + $0x2a0] ss:$16 sps:$4 sm:$0xff]  }
 0x404   : > { %6835 = vmatprep.subr.bf16.mxu1 %v9286_v37  ;;  %v9362_v37 = vld [vmem:[%s11960_s7 + $0x2a8] ss:$16 sps:$4 sm:$0xff]  }
 0x406   : > { %6664 = vmatpush1.bf16.msra.mxu0 %v9281_v40  ;;  %v9367_v40 = vld [vmem:[%s11960_s7 + $0x2c4] ss:$16 sps:$4 sm:$0xff]  }
 0x407   : > { %6836 = vmatpush1.bf16.msra.mxu1 %v9284_v46  ;;  %6665 = vmatprep.subr.bf16.mxu0 %v9289_v16  ;;  %v9370_v46 = vld [vmem:[%s11960_s7 + $0x2cc] ss:$16 sps:$4 sm:$0xff]   ;;  %v9365_v16 = vld [vmem:[%s11960_s7 + $0x2c0] ss:$16 sps:$4 sm:$0xff]  }
 0x408   : > { %6837 = vmatprep.subr.bf16.mxu1 %v9292_v47  ;;  %v9368_v47 = vld [vmem:[%s11960_s7 + $0x2c8] ss:$16 sps:$4 sm:$0xff]  }
 0x40a   : > { %6666 = vmatpush1.bf16.msra.mxu0 %v9287_v48  ;;  %v9373_v48 = vld [vmem:[%s11960_s7 + $0x2e4] ss:$16 sps:$4 sm:$0xff]  }
 0x40b   : > { %6838 = vmatpush1.bf16.msra.mxu1 %v9290_v11  ;;  %6667 = vmatprep.subr.bf16.mxu0 %v9295_v49  ;;  %v9376_v11 = vld [vmem:[%s11960_s7 + $0x2ec] ss:$16 sps:$4 sm:$0xff]   ;;  %v9371_v49 = vld [vmem:[%s11960_s7 + $0x2e0] ss:$16 sps:$4 sm:$0xff]  }
 0x40c   : > { %6839 = vmatprep.subr.bf16.mxu1 %v9298_v51  ;;  %v9374_v51 = vld [vmem:[%s11960_s7 + $0x2e8] ss:$16 sps:$4 sm:$0xff]  }
 0x40e   : > { %6668 = vmatpush1.bf16.msra.mxu0 %v9293_v52  ;;  %v9379_v52 = vld [vmem:[%s11960_s7 + $0x304] ss:$16 sps:$4 sm:$0xff]  }
 0x40f   : > { %6840 = vmatpush1.bf16.msra.mxu1 %v9296_v53  ;;  %6669 = vmatprep.subr.bf16.mxu0 %v9301_v41  ;;  %v9382_v53 = vld [vmem:[%s11960_s7 + $0x30c] ss:$16 sps:$4 sm:$0xff]   ;;  %v9377_v41 = vld [vmem:[%s11960_s7 + $0x300] ss:$16 sps:$4 sm:$0xff]  }
 0x410   : > { %6841 = vmatprep.subr.bf16.mxu1 %v9304_v56  ;;  %v9380_v56 = vld [vmem:[%s11960_s7 + $0x308] ss:$16 sps:$4 sm:$0xff]  }
 0x412   : > { %6670 = vmatpush1.bf16.msra.mxu0 %v9299_v21  ;;  %v9385_v21 = vld [vmem:[%s11960_s7 + $0x324] ss:$16 sps:$4 sm:$0xff]  }
 0x413   : > { %6842 = vmatpush1.bf16.msra.mxu1 %v9302_v54  ;;  %6671 = vmatprep.subr.bf16.mxu0 %v9307_v55  ;;  %v9388_v54 = vld [vmem:[%s11960_s7 + $0x32c] ss:$16 sps:$4 sm:$0xff]   ;;  %v9383_v55 = vld [vmem:[%s11960_s7 + $0x320] ss:$16 sps:$4 sm:$0xff]  }
 0x414   : > { %6843 = vmatprep.subr.bf16.mxu1 %v9310_v57  ;;  %v9386_v57 = vld [vmem:[%s11960_s7 + $0x328] ss:$16 sps:$4 sm:$0xff]  }
 0x416   : > { %6672 = vmatpush1.bf16.msra.mxu0 %v9305_v42  ;;  %v9391_v42 = vld [vmem:[%s11960_s7 + $0x344] ss:$16 sps:$4 sm:$0xff]  }
 0x417   : > { %6844 = vmatpush1.bf16.msra.mxu1 %v9308_v58  ;;  %6673 = vmatprep.subr.bf16.mxu0 %v9313_v59  ;;  %v9394_v58 = vld [vmem:[%s11960_s7 + $0x34c] ss:$16 sps:$4 sm:$0xff]   ;;  %v9389_v59 = vld [vmem:[%s11960_s7 + $0x340] ss:$16 sps:$4 sm:$0xff]  }
 0x418   : > { %6845 = vmatprep.subr.bf16.mxu1 %v9316_v44  ;;  %v9392_v44 = vld [vmem:[%s11960_s7 + $0x348] ss:$16 sps:$4 sm:$0xff]  }
 0x41a   : > { %6674 = vmatpush1.bf16.msra.mxu0 %v9311_v60  ;;  %v9397_v60 = vld [vmem:[%s11960_s7 + $0x364] ss:$16 sps:$4 sm:$0xff]  }
 0x41b   : > { %6846 = vmatpush1.bf16.msra.mxu1 %v9314_v62  ;;  %6675 = vmatprep.subr.bf16.mxu0 %v9319_v1  ;;  %v9400_v62 = vld [vmem:[%s11960_s7 + $0x36c] ss:$16 sps:$4 sm:$0xff]   ;;  %v9395_v1 = vld [vmem:[%s11960_s7 + $0x360] ss:$16 sps:$4 sm:$0xff]  }
 0x41c   : > { %6847 = vmatprep.subr.bf16.mxu1 %v9322_v2  ;;  %v9398_v2 = vld [vmem:[%s11960_s7 + $0x368] ss:$16 sps:$4 sm:$0xff]  }
 0x41e   : > { %6676 = vmatpush1.bf16.msra.mxu0 %v9317_v8  ;;  %v9403_v8 = vld [vmem:[%s11960_s7 + $0x384] ss:$16 sps:$4 sm:$0xff]  }
 0x41f   : > { %6848 = vmatpush1.bf16.msra.mxu1 %v9320_v10  ;;  %6677 = vmatprep.subr.bf16.mxu0 %v9325_v6  ;;  %v9406_v10 = vld [vmem:[%s11960_s7 + $0x38c] ss:$16 sps:$4 sm:$0xff]   ;;  %v9401_v6 = vld [vmem:[%s11960_s7 + $0x380] ss:$16 sps:$4 sm:$0xff]  }
 0x420   : > { %6849 = vmatprep.subr.bf16.mxu1 %v9328_v7  ;;  %v9404_v7 = vld [vmem:[%s11960_s7 + $0x388] ss:$16 sps:$4 sm:$0xff]  }
 0x422   : > { %6678 = vmatpush1.bf16.msra.mxu0 %v9323_v23  ;;  %v9409_v23 = vld [vmem:[%s11960_s7 + $0x3a4] ss:$16 sps:$4 sm:$0xff]  }
 0x423   : > { %6850 = vmatpush1.bf16.msra.mxu1 %v9326_v12  ;;  %6690 = vmatprep.subr.bf16.mxu0 %v9331_v43  ;;  %v9412_v12 = vld [vmem:[%s11960_s7 + $0x3ac] ss:$16 sps:$4 sm:$0xff]   ;;  %v9407_v43 = vld [vmem:[%s11960_s7 + $0x3a0] ss:$16 sps:$4 sm:$0xff]  }
 0x424   : > { %6862 = vmatprep.subr.bf16.mxu1 %v9334_v17  ;;  %v9410_v17 = vld [vmem:[%s11960_s7 + $0x3a8] ss:$16 sps:$4 sm:$0xff]  }
 0x425   : > { %6680 = vmatmul.mubr.bf16.vlgmr.msra.gmra.mrb[24].mxu0 %v10584_v63 }
 0x426   : > { %6852 = vmatmul.mubr.bf16.vlgmr.msra.gmra.mrb[44].mxu1 %v10584_v63  ;;  %6691 = vmatpush1.bf16.msra.mxu0 %v9329_v18  ;;  %v9346_v63 = vld [vmem:[%s11960_s7 + $0x24c] ss:$16 sps:$4 sm:$0xff]   ;;  %v9415_v18 = vld [vmem:[%s11960_s7 + $0x3c4] ss:$16 sps:$4 sm:$0xff]  }
 0x427   : > { %6722 = vmatprep.mubr.bf16.mxu0 %v10601_v45  ;;  %6863 = vmatpush1.bf16.msra.mxu1 %v9332_v22  ;;  %v9418_v22 = vld [vmem:[%s11960_s7 + $0x3cc] ss:$16 sps:$4 sm:$0xff]  }
 0x428   : > { %6894 = vmatprep.mubr.bf16.mxu1 %v10601_v45  ;;  %6692 = vmatprep.subr.bf16.mxu0 %v9337_v27  ;;  %v9349_v45 = vld [vmem:[%s11960_s7 + $0x264] ss:$16 sps:$4 sm:$0xff]   ;;  %v9413_v27 = vld [vmem:[%s11960_s7 + $0x3c0] ss:$16 sps:$4 sm:$0xff]  }
 0x429   : > { %6864 = vmatprep.subr.bf16.mxu1 %v9340_v28  ;;  %v9416_v28 = vld [vmem:[%s11960_s7 + $0x3c8] ss:$16 sps:$4 sm:$0xff]  }
 0x42a   : > { %6693 = vmatpush1.bf16.msra.mxu0 %v9335_v29  ;;  %v9421_v29 = vld [vmem:[%s11960_s7 + $0x3e4] ss:$16 sps:$4 sm:$0xff]  }
 0x42b   : > { %6865 = vmatpush1.bf16.msra.mxu1 %v9338_v3  ;;  %6694 = vmatprep.subr.bf16.mxu0 %v9343_v30  ;;  %v9424_v3 = vld [vmem:[%s11960_s7 + $0x3ec] ss:$16 sps:$4 sm:$0xff]   ;;  %v9419_v30 = vld [vmem:[%s11960_s7 + $0x3e0] ss:$16 sps:$4 sm:$0xff]  }
 0x42c   : > { %6866 = vmatprep.subr.bf16.mxu1 %v9346_v63  ;;  %v9422_v63 = vld [vmem:[%s11960_s7 + $0x3e8] ss:$16 sps:$4 sm:$0xff]  }
 0x42e   : > { %6695 = vmatpush1.bf16.msra.mxu0 %v9341_v31  ;;  %v9427_v31 = vld [vmem:[%s11960_s7 + $0x404] ss:$16 sps:$4 sm:$0xff]  }
 0x42f   : > { %6867 = vmatpush1.bf16.msra.mxu1 %v9344_v33  ;;  %6696 = vmatprep.subr.bf16.mxu0 %v9349_v45  ;;  %v9430_v33 = vld [vmem:[%s11960_s7 + $0x40c] ss:$16 sps:$4 sm:$0xff]   ;;  %v9425_v45 = vld [vmem:[%s11960_s7 + $0x400] ss:$16 sps:$4 sm:$0xff]  }
 0x430   : > { %6868 = vmatprep.subr.bf16.mxu1 %v9352_v24  ;;  %v9428_v24 = vld [vmem:[%s11960_s7 + $0x408] ss:$16 sps:$4 sm:$0xff]  }
 0x432   : > { %6697 = vmatpush1.bf16.msra.mxu0 %v9347_v34  ;;  %v9433_v34 = vld [vmem:[%s11960_s7 + $0x424] ss:$16 sps:$4 sm:$0xff]  }
 0x433   : > { %6869 = vmatpush1.bf16.msra.mxu1 %v9350_v25  ;;  %6698 = vmatprep.subr.bf16.mxu0 %v9355_v26  ;;  %v9436_v25 = vld [vmem:[%s11960_s7 + $0x42c] ss:$16 sps:$4 sm:$0xff]   ;;  %v9431_v26 = vld [vmem:[%s11960_s7 + $0x420] ss:$16 sps:$4 sm:$0xff]  }
 0x434   : > { %6870 = vmatprep.subr.bf16.mxu1 %v9358_v35  ;;  %v9434_v35 = vld [vmem:[%s11960_s7 + $0x428] ss:$16 sps:$4 sm:$0xff]  }
 0x436   : > { %6699 = vmatpush1.bf16.msra.mxu0 %v9353_v36  ;;  %v9439_v36 = vld [vmem:[%s11960_s7 + $0x444] ss:$16 sps:$4 sm:$0xff]  }
 0x437   : > { %6871 = vmatpush1.bf16.msra.mxu1 %v9356_v39  ;;  %6700 = vmatprep.subr.bf16.mxu0 %v9361_v38  ;;  %v9437_v39 = vld [vmem:[%s11960_s7 + $0x440] ss:$16 sps:$4 sm:$0xff]   ;;  %v9440_v38 = vld [vmem:[%s11960_s7 + $0x448] ss:$16 sps:$4 sm:$0xff]  }
 0x438   : > { %6872 = vmatprep.subr.bf16.mxu1 %v9364_v32  ;;  %v9448_v32 = vld [vmem:[%s11960_s7 + $0x46c] ss:$16 sps:$4 sm:$0xff]  }
 0x43a   : > { %6701 = vmatpush1.bf16.msra.mxu0 %v9359_v4  ;;  %v9443_v4 = vld [vmem:[%s11960_s7 + $0x460] ss:$16 sps:$4 sm:$0xff]  }
 0x43b   : > { %6873 = vmatpush1.bf16.msra.mxu1 %v9362_v37  ;;  %6702 = vmatprep.subr.bf16.mxu0 %v9367_v40  ;;  %v9446_v37 = vld [vmem:[%s11960_s7 + $0x468] ss:$16 sps:$4 sm:$0xff]   ;;  %v9451_v40 = vld [vmem:[%s11960_s7 + $0x484] ss:$16 sps:$4 sm:$0xff]  }
 0x43c   : > { %6874 = vmatprep.subr.bf16.mxu1 %v9370_v46  ;;  %v9454_v46 = vld [vmem:[%s11960_s7 + $0x48c] ss:$16 sps:$4 sm:$0xff]  }
 0x43e   : > { %6703 = vmatpush1.bf16.msra.mxu0 %v9365_v16  ;;  %v9449_v16 = vld [vmem:[%s11960_s7 + $0x480] ss:$16 sps:$4 sm:$0xff]  }
 0x43f   : > { %6875 = vmatpush1.bf16.msra.mxu1 %v9368_v47  ;;  %6704 = vmatprep.subr.bf16.mxu0 %v9373_v48  ;;  %v9452_v47 = vld [vmem:[%s11960_s7 + $0x488] ss:$16 sps:$4 sm:$0xff]   ;;  %v9457_v48 = vld [vmem:[%s11960_s7 + $0x4a4] ss:$16 sps:$4 sm:$0xff]  }
 0x440   : > { %6876 = vmatprep.subr.bf16.mxu1 %v9376_v11  ;;  %v9460_v11 = vld [vmem:[%s11960_s7 + $0x4ac] ss:$16 sps:$4 sm:$0xff]  }
 0x442   : > { %6705 = vmatpush1.bf16.msra.mxu0 %v9371_v49  ;;  %v9455_v49 = vld [vmem:[%s11960_s7 + $0x4a0] ss:$16 sps:$4 sm:$0xff]  }
 0x443   : > { %6877 = vmatpush1.bf16.msra.mxu1 %v9374_v51  ;;  %6706 = vmatprep.subr.bf16.mxu0 %v9379_v52  ;;  %v9458_v51 = vld [vmem:[%s11960_s7 + $0x4a8] ss:$16 sps:$4 sm:$0xff]   ;;  %v9463_v52 = vld [vmem:[%s11960_s7 + $0x4c4] ss:$16 sps:$4 sm:$0xff]  }
 0x444   : > { %6878 = vmatprep.subr.bf16.mxu1 %v9382_v53  ;;  %v9466_v53 = vld [vmem:[%s11960_s7 + $0x4cc] ss:$16 sps:$4 sm:$0xff]  }
 0x446   : > { %6707 = vmatpush1.bf16.msra.mxu0 %v9377_v41  ;;  %v9461_v41 = vld [vmem:[%s11960_s7 + $0x4c0] ss:$16 sps:$4 sm:$0xff]  }
 0x447   : > { %6879 = vmatpush1.bf16.msra.mxu1 %v9380_v56  ;;  %6708 = vmatprep.subr.bf16.mxu0 %v9385_v21  ;;  %v9464_v56 = vld [vmem:[%s11960_s7 + $0x4c8] ss:$16 sps:$4 sm:$0xff]   ;;  %v9469_v21 = vld [vmem:[%s11960_s7 + $0x4e4] ss:$16 sps:$4 sm:$0xff]  }
 0x448   : > { %6880 = vmatprep.subr.bf16.mxu1 %v9388_v54  ;;  %v9472_v54 = vld [vmem:[%s11960_s7 + $0x4ec] ss:$16 sps:$4 sm:$0xff]  }
 0x44a   : > { %6709 = vmatpush1.bf16.msra.mxu0 %v9383_v55  ;;  %v9467_v55 = vld [vmem:[%s11960_s7 + $0x4e0] ss:$16 sps:$4 sm:$0xff]  }
 0x44b   : > { %6881 = vmatpush1.bf16.msra.mxu1 %v9386_v57  ;;  %6710 = vmatprep.subr.bf16.mxu0 %v9391_v42  ;;  %v9470_v57 = vld [vmem:[%s11960_s7 + $0x4e8] ss:$16 sps:$4 sm:$0xff]   ;;  %v9475_v42 = vld [vmem:[%s11960_s7 + $0x504] ss:$16 sps:$4 sm:$0xff]  }
 0x44c   : > { %6882 = vmatprep.subr.bf16.mxu1 %v9394_v58  ;;  %v9478_v58 = vld [vmem:[%s11960_s7 + $0x50c] ss:$16 sps:$4 sm:$0xff]  }
 0x44e   : > { %6711 = vmatpush1.bf16.msra.mxu0 %v9389_v59  ;;  %v9473_v59 = vld [vmem:[%s11960_s7 + $0x500] ss:$16 sps:$4 sm:$0xff]  }
 0x44f   : > { %6883 = vmatpush1.bf16.msra.mxu1 %v9392_v44  ;;  %6712 = vmatprep.subr.bf16.mxu0 %v9397_v60  ;;  %v9476_v44 = vld [vmem:[%s11960_s7 + $0x508] ss:$16 sps:$4 sm:$0xff]   ;;  %v9481_v60 = vld [vmem:[%s11960_s7 + $0x524] ss:$16 sps:$4 sm:$0xff]  }
 0x450   : > { %6884 = vmatprep.subr.bf16.mxu1 %v9400_v62  ;;  %v9484_v62 = vld [vmem:[%s11960_s7 + $0x52c] ss:$16 sps:$4 sm:$0xff]  }
 0x452   : > { %6713 = vmatpush1.bf16.msra.mxu0 %v9395_v1  ;;  %v9479_v1 = vld [vmem:[%s11960_s7 + $0x520] ss:$16 sps:$4 sm:$0xff]  }
 0x453   : > { %6885 = vmatpush1.bf16.msra.mxu1 %v9398_v2  ;;  %6714 = vmatprep.subr.bf16.mxu0 %v9403_v8  ;;  %v9482_v2 = vld [vmem:[%s11960_s7 + $0x528] ss:$16 sps:$4 sm:$0xff]   ;;  %v9487_v8 = vld [vmem:[%s11960_s7 + $0x544] ss:$16 sps:$4 sm:$0xff]  }
 0x454   : > { %6886 = vmatprep.subr.bf16.mxu1 %v9406_v10  ;;  %v9490_v10 = vld [vmem:[%s11960_s7 + $0x54c] ss:$16 sps:$4 sm:$0xff]  }
 0x456   : > { %6715 = vmatpush1.bf16.msra.mxu0 %v9401_v6  ;;  %v9485_v6 = vld [vmem:[%s11960_s7 + $0x540] ss:$16 sps:$4 sm:$0xff]  }
 0x457   : > { %6887 = vmatpush1.bf16.msra.mxu1 %v9404_v7  ;;  %6716 = vmatprep.subr.bf16.mxu0 %v9409_v23  ;;  %v9488_v7 = vld [vmem:[%s11960_s7 + $0x548] ss:$16 sps:$4 sm:$0xff]   ;;  %v9493_v23 = vld [vmem:[%s11960_s7 + $0x564] ss:$16 sps:$4 sm:$0xff]  }
 0x458   : > { %6888 = vmatprep.subr.bf16.mxu1 %v9412_v12  ;;  %v9496_v12 = vld [vmem:[%s11960_s7 + $0x56c] ss:$16 sps:$4 sm:$0xff]  }
 0x45a   : > { %6717 = vmatpush1.bf16.msra.mxu0 %v9407_v43  ;;  %v9491_v43 = vld [vmem:[%s11960_s7 + $0x560] ss:$16 sps:$4 sm:$0xff]  }
 0x45b   : > { %6889 = vmatpush1.bf16.msra.mxu1 %v9410_v17  ;;  %6718 = vmatprep.subr.bf16.mxu0 %v9415_v18  ;;  %v9494_v17 = vld [vmem:[%s11960_s7 + $0x568] ss:$16 sps:$4 sm:$0xff]   ;;  %v9499_v18 = vld [vmem:[%s11960_s7 + $0x584] ss:$16 sps:$4 sm:$0xff]  }
 0x45c   : > { %6890 = vmatprep.subr.bf16.mxu1 %v9418_v22  ;;  %v9502_v22 = vld [vmem:[%s11960_s7 + $0x58c] ss:$16 sps:$4 sm:$0xff]  }
 0x45e   : > { %6719 = vmatpush1.bf16.msra.mxu0 %v9413_v27  ;;  %v9497_v27 = vld [vmem:[%s11960_s7 + $0x580] ss:$16 sps:$4 sm:$0xff]  }
 0x45f   : > { %6891 = vmatpush1.bf16.msra.mxu1 %v9416_v28  ;;  %6720 = vmatprep.subr.bf16.mxu0 %v9421_v29  ;;  %v9500_v28 = vld [vmem:[%s11960_s7 + $0x588] ss:$16 sps:$4 sm:$0xff]   ;;  %v9505_v29 = vld [vmem:[%s11960_s7 + $0x5a4] ss:$16 sps:$4 sm:$0xff]  }
 0x460   : > { %6892 = vmatprep.subr.bf16.mxu1 %v9424_v3  ;;  %v9508_v3 = vld [vmem:[%s11960_s7 + $0x5ac] ss:$16 sps:$4 sm:$0xff]  }
 0x462   : > { %6721 = vmatpush1.bf16.msra.mxu0 %v9419_v30  ;;  %v9503_v30 = vld [vmem:[%s11960_s7 + $0x5a0] ss:$16 sps:$4 sm:$0xff]  }
 0x463   : > { %6893 = vmatpush1.bf16.msra.mxu1 %v9422_v63  ;;  %6733 = vmatprep.subr.bf16.mxu0 %v9427_v31  ;;  %v9506_v63 = vld [vmem:[%s11960_s7 + $0x5a8] ss:$16 sps:$4 sm:$0xff]   ;;  %v9511_v31 = vld [vmem:[%s11960_s7 + $0x5c4] ss:$16 sps:$4 sm:$0xff]  }
 0x464   : > { %6905 = vmatprep.subr.bf16.mxu1 %v9430_v33  ;;  %v9514_v33 = vld [vmem:[%s11960_s7 + $0x5cc] ss:$16 sps:$4 sm:$0xff]  }
 0x465   : > { %6723 = vmatmul.mubr.bf16.vlgmr.msra.gmra.mrb[24].mxu0 %v10586_v0 }
 0x466   : > { %6895 = vmatmul.mubr.bf16.vlgmr.msra.gmra.mrb[44].mxu1 %v10586_v0  ;;  %6734 = vmatpush1.bf16.msra.mxu0 %v9425_v45  ;;  %v9442_v0 = vld [vmem:[%s11960_s7 + $0x44c] ss:$16 sps:$4 sm:$0xff]   ;;  %v9509_v45 = vld [vmem:[%s11960_s7 + $0x5c0] ss:$16 sps:$4 sm:$0xff]  }
 0x467   : > { %6765 = vmatprep.mubr.bf16.mxu0 %v10643_v5  ;;  %6906 = vmatpush1.bf16.msra.mxu1 %v9428_v24  ;;  %v9512_v24 = vld [vmem:[%s11960_s7 + $0x5c8] ss:$16 sps:$4 sm:$0xff]  }
 0x468   : > { %6937 = vmatprep.mubr.bf16.mxu1 %v10643_v5  ;;  %6735 = vmatprep.subr.bf16.mxu0 %v9433_v34  ;;  %v9445_v5 = vld [vmem:[%s11960_s7 + $0x464] ss:$16 sps:$4 sm:$0xff]  }
 0x469   : > { %6907 = vmatprep.subr.bf16.mxu1 %v9436_v25  ;;  %v9517_v34 = vld [vmem:[%s11960_s7 + $0x5e4] ss:$16 sps:$4 sm:$0xff]   ;;  %v9520_v25 = vld [vmem:[%s11960_s7 + $0x5ec] ss:$16 sps:$4 sm:$0xff]  }
 0x46a   : > { %6736 = vmatpush1.bf16.msra.mxu0 %v9431_v26  ;;  %v9515_v26 = vld [vmem:[%s11960_s7 + $0x5e0] ss:$16 sps:$4 sm:$0xff]  }
 0x46b   : > { %6908 = vmatpush1.bf16.msra.mxu1 %v9434_v35  ;;  %6737 = vmatprep.subr.bf16.mxu0 %v9439_v36  ;;  %v9518_v35 = vld [vmem:[%s11960_s7 + $0x5e8] ss:$16 sps:$4 sm:$0xff]   ;;  %v9523_v36 = vld [vmem:[%s11960_s7 + $0x604] ss:$16 sps:$4 sm:$0xff]  }
 0x46c   : > { %6909 = vmatprep.subr.bf16.mxu1 %v9442_v0  ;;  %v9526_v0 = vld [vmem:[%s11960_s7 + $0x60c] ss:$16 sps:$4 sm:$0xff]  }
 0x46e   : > { %6738 = vmatpush1.bf16.msra.mxu0 %v9437_v39  ;;  %v9521_v39 = vld [vmem:[%s11960_s7 + $0x600] ss:$16 sps:$4 sm:$0xff]  }
 0x46f   : > { %6910 = vmatpush1.bf16.msra.mxu1 %v9440_v38  ;;  %6739 = vmatprep.subr.bf16.mxu0 %v9445_v5  ;;  %v9524_v38 = vld [vmem:[%s11960_s7 + $0x608] ss:$16 sps:$4 sm:$0xff]   ;;  %v9529_v5 = vld [vmem:[%s11960_s7 + $0x624] ss:$16 sps:$4 sm:$0xff]  }
 0x470   : > { %6911 = vmatprep.subr.bf16.mxu1 %v9448_v32  ;;  %v9532_v32 = vld [vmem:[%s11960_s7 + $0x62c] ss:$16 sps:$4 sm:$0xff]  }
 0x472   : > { %6740 = vmatpush1.bf16.msra.mxu0 %v9443_v4  ;;  %v9527_v4 = vld [vmem:[%s11960_s7 + $0x620] ss:$16 sps:$4 sm:$0xff]  }
 0x473   : > { %6912 = vmatpush1.bf16.msra.mxu1 %v9446_v37  ;;  %6741 = vmatprep.subr.bf16.mxu0 %v9451_v40  ;;  %v9530_v37 = vld [vmem:[%s11960_s7 + $0x628] ss:$16 sps:$4 sm:$0xff]   ;;  %v9535_v40 = vld [vmem:[%s11960_s7 + $0x644] ss:$16 sps:$4 sm:$0xff]  }
 0x474   : > { %6913 = vmatprep.subr.bf16.mxu1 %v9454_v46  ;;  %v9533_v46 = vld [vmem:[%s11960_s7 + $0x640] ss:$16 sps:$4 sm:$0xff]  }
 0x476   : > { %6742 = vmatpush1.bf16.msra.mxu0 %v9449_v16  ;;  %v9536_v16 = vld [vmem:[%s11960_s7 + $0x648] ss:$16 sps:$4 sm:$0xff]  }
 0x477   : > { %6914 = vmatpush1.bf16.msra.mxu1 %v9452_v47  ;;  %6743 = vmatprep.subr.bf16.mxu0 %v9457_v48  ;;  %v9541_v47 = vld [vmem:[%s11960_s7 + $0x664] ss:$16 sps:$4 sm:$0xff]  }
 0x478   : > { %6915 = vmatprep.subr.bf16.mxu1 %v9460_v11  ;;  %v7061_v48 = vld [vmem:[%s11963_s10 + $0x80] sm:$0xff]  ;;  %v7062_v11 = vld [vmem:[%s11963_s10 + $0x88] sm:$0xff] }
 0x47a   : > { %6744 = vmatpush1.bf16.msra.mxu0 %v9455_v49  ;;  %v9539_v49 = vld [vmem:[%s11960_s7 + $0x660] ss:$16 sps:$4 sm:$0xff]  }
 0x47b   : > { %6916 = vmatpush1.bf16.msra.mxu1 %v9458_v51  ;;  %6745 = vmatprep.subr.bf16.mxu0 %v9463_v52  ;;  %v9542_v51 = vld [vmem:[%s11960_s7 + $0x668] ss:$16 sps:$4 sm:$0xff]   ;;  %v7077_v52 = vld [vmem:[%s11963_s10 + $0x100] sm:$0xff] }
 0x47c   : > { %6917 = vmatprep.subr.bf16.mxu1 %v9466_v53  ;;  %v8578_v53 = vpack.c.bf16 %v7062_v11, %v7061_v48  ;;  %v7091_v11 = vld [vmem:[%s11963_s10 + $0x170] sm:$0xff] }
 0x47e   : > { %6746 = vmatpush1.bf16.msra.mxu0 %v9461_v41  ;;  %v7045_v41 = vld [vmem:[%s11963_s10] sm:$0xff] }
 0x47f   : > { %6918 = vmatpush1.bf16.msra.mxu1 %v9464_v56  ;;  %6747 = vmatprep.subr.bf16.mxu0 %v9469_v21  ;;  %v7046_v56 = vld [vmem:[%s11963_s10 + $0x8] sm:$0xff] }
 0x480   : > { %6919 = vmatprep.subr.bf16.mxu1 %v9472_v54  ;;  %v7078_v21 = vld [vmem:[%s11963_s10 + $0x108] sm:$0xff]  ;;  %v7063_v54 = vld [vmem:[%s11963_s10 + $0x90] sm:$0xff] }
 0x482   : > { %6748 = vmatpush1.bf16.msra.mxu0 %v9467_v55  ;;  %v7064_v55 = vld [vmem:[%s11963_s10 + $0x98] sm:$0xff] }
 0x483   : > { %6920 = vmatpush1.bf16.msra.mxu1 %v9470_v57  ;;  %6749 = vmatprep.subr.bf16.mxu0 %v9475_v42  ;;  %v8580_v57 = vpack.c.bf16 %v7046_v56, %v7045_v41  ;;  %v8611_v42 = vpack.c.bf16 %v7078_v21, %v7077_v52  ;;  %v7073_v52 = vld [vmem:[%s11963_s10 + $0xe0] sm:$0xff]  ;;  %v7058_v21 = vld [vmem:[%s11963_s10 + $0x68] sm:$0xff] }
 0x484   : > { %6921 = vmatprep.subr.bf16.mxu1 %v9478_v58  ;;  %v7079_v58 = vld [vmem:[%s11963_s10 + $0x110] sm:$0xff]  ;;  %v7057_v56 = vld [vmem:[%s11963_s10 + $0x60] sm:$0xff] }
 0x486   : > { %6750 = vmatpush1.bf16.msra.mxu0 %v9473_v59  ;;  %v8582_v59 = vpack.c.bf16 %v7064_v55, %v7063_v54  ;;  %v7093_v54 = vld [vmem:[%s11963_s10 + $0x180] sm:$0xff]  ;;  %v8604_v55 = vpack.c.bf16 %v7058_v21, %v7057_v56 }
 0x487   : > { %6922 = vmatpush1.bf16.msra.mxu1 %v9476_v44  ;;  %6751 = vmatprep.subr.bf16.mxu0 %v9481_v60  ;;  %v7047_v44 = vld [vmem:[%s11963_s10 + $0x10] sm:$0xff]  ;;  %v7048_v60 = vld [vmem:[%s11963_s10 + $0x18] sm:$0xff] }
 0x488   : > { %6923 = vmatprep.subr.bf16.mxu1 %v9484_v62  ;;  %v9612_v62 = vmov 0.0|0.0  }
 0x48a   : > { %6752 = vmatpush1.bf16.msra.mxu0 %v9479_v1  ;;  %v7080_v1 = vld [vmem:[%s11963_s10 + $0x118] sm:$0xff] }
 0x48b   : > { %6924 = vmatpush1.bf16.msra.mxu1 %v9482_v2  ;;  %6753 = vmatprep.subr.bf16.mxu0 %v9487_v8  ;;  %v7065_v2 = vld [vmem:[%s11963_s10 + $0xa0] sm:$0xff]  ;;  %v7066_v8 = vld [vmem:[%s11963_s10 + $0xa8] sm:$0xff] }
 0x48c   : > { %6925 = vmatprep.subr.bf16.mxu1 %v9490_v10  ;;  %v8584_v10 = vpack.c.bf16 %v7048_v60, %v7047_v44  ;;  %v7059_v44 = vld [vmem:[%s11963_s10 + $0x70] sm:$0xff] }
 0x48e   : > { %6754 = vmatpush1.bf16.msra.mxu0 %v9485_v6  ;;  %v8614_v6 = vpack.c.bf16 %v7080_v1, %v7079_v58  ;;  %v7075_v58 = vld [vmem:[%s11963_s10 + $0xf0] sm:$0xff]  ;;  %v7060_v1 = vld [vmem:[%s11963_s10 + $0x78] sm:$0xff] }
 0x48f   : > { %6926 = vmatpush1.bf16.msra.mxu1 %v9488_v7  ;;  %6755 = vmatprep.subr.bf16.mxu0 %v9493_v23  ;;  %v7081_v7 = vld [vmem:[%s11963_s10 + $0x120] sm:$0xff]  ;;  %v8586_v23 = vpack.c.bf16 %v7066_v8, %v7065_v2  ;;  %v7095_v2 = vld [vmem:[%s11963_s10 + $0x190] sm:$0xff]  ;;  %v7096_v8 = vld [vmem:[%s11963_s10 + $0x198] sm:$0xff] }
 0x490   : > { %6927 = vmatprep.subr.bf16.mxu1 %v9496_v12  ;;  %v7049_v12 = vld [vmem:[%s11963_s10 + $0x20] sm:$0xff] }
 0x492   : > { %6756 = vmatpush1.bf16.msra.mxu0 %v9491_v43  ;;  %v7050_v43 = vld [vmem:[%s11963_s10 + $0x28] sm:$0xff] }
 0x493   : > { %6928 = vmatpush1.bf16.msra.mxu1 %v9494_v17  ;;  %6757 = vmatprep.subr.bf16.mxu0 %v9499_v18  ;;  %v7067_v17 = vld [vmem:[%s11963_s10 + $0xb0] sm:$0xff]  ;;  %v7068_v18 = vld [vmem:[%s11963_s10 + $0xb8] sm:$0xff] }
 0x494   : > { %6929 = vmatprep.subr.bf16.mxu1 %v9502_v22  ;;  %v8588_v22 = vpack.c.bf16 %v7050_v43, %v7049_v12 }
 0x496   : > { %6758 = vmatpush1.bf16.msra.mxu0 %v9497_v27 }
 0x497   : > { %6930 = vmatpush1.bf16.msra.mxu1 %v9500_v28  ;;  %6759 = vmatprep.subr.bf16.mxu0 %v9505_v29  ;;  %v7083_v28 = vld [vmem:[%s11963_s10 + $0x130] sm:$0xff]  ;;  %v8590_v29 = vpack.c.bf16 %v7068_v18, %v7067_v17 }
 0x498   : > { %6931 = vmatprep.subr.bf16.mxu1 %v9508_v3  ;;  %v7051_v3 = vld [vmem:[%s11963_s10 + $0x30] sm:$0xff] }
 0x49a   : > { %6760 = vmatpush1.bf16.msra.mxu0 %v9503_v30  ;;  %v7052_v30 = vld [vmem:[%s11963_s10 + $0x38] sm:$0xff] }
 0x49b   : > { %6932 = vmatpush1.bf16.msra.mxu1 %v9506_v63  ;;  %6761 = vmatprep.subr.bf16.mxu0 %v9511_v31  ;;  %v7084_v63 = vld [vmem:[%s11963_s10 + $0x138] sm:$0xff]  ;;  %v7069_v31 = vld [vmem:[%s11963_s10 + $0xc0] sm:$0xff] }
 0x49c   : > { %6933 = vmatprep.subr.bf16.mxu1 %v9514_v33  ;;  %v7070_v33 = vld [vmem:[%s11963_s10 + $0xc8] sm:$0xff] }
 0x49e   : > { %6762 = vmatpush1.bf16.msra.mxu0 %v9509_v45  ;;  %v8592_v45 = vpack.c.bf16 %v7052_v30, %v7051_v3 }
 0x49f   : > { %6934 = vmatpush1.bf16.msra.mxu1 %v9512_v24  ;;  %6763 = vmatprep.subr.bf16.mxu0 %v9517_v34  ;;  %v8620_v24 = vpack.c.bf16 %v7084_v63, %v7083_v28  ;;  %v7085_v34 = vld [vmem:[%s11963_s10 + $0x140] sm:$0xff] }
 0x4a0   : > { %6935 = vmatprep.subr.bf16.mxu1 %v9520_v25  ;;  %v8594_v25 = vpack.c.bf16 %v7070_v33, %v7069_v31 }
 0x4a2   : > { %6764 = vmatpush1.bf16.msra.mxu0 %v9515_v26  ;;  %v7053_v26 = vld [vmem:[%s11963_s10 + $0x40] sm:$0xff] }
 0x4a3   : > { %6936 = vmatpush1.bf16.msra.mxu1 %v9518_v35  ;;  %6776 = vmatprep.subr.bf16.mxu0 %v9523_v36  ;;  %v7054_v35 = vld [vmem:[%s11963_s10 + $0x48] sm:$0xff] }
 0x4a4   : > { %6948 = vmatprep.subr.bf16.mxu1 %v9526_v0  ;;  %v7086_v36 = vld [vmem:[%s11963_s10 + $0x148] sm:$0xff]  ;;  %v7071_v0 = vld [vmem:[%s11963_s10 + $0xd0] sm:$0xff] }
 0x4a5   : > { %6766 = vmatmul.mubr.bf16.vlgmr.msra.gmra.mrb[24].mxu0 %v10607_v50 }
 0x4a6   : > { %6938 = vmatmul.mubr.bf16.vlgmr.msra.gmra.mrb[44].mxu1 %v10607_v50  ;;  %6777 = vmatpush1.bf16.msra.mxu0 %v9521_v39  ;;  %v9538_v50 = vld [vmem:[%s11960_s7 + $0x64c] ss:$16 sps:$4 sm:$0xff]  }
 0x4a7   : > { %6949 = vmatpush1.bf16.msra.mxu1 %v9524_v38  ;;  %6778 = vmatprep.subr.bf16.mxu0 %v9529_v5  ;;  %v7072_v39 = vld [vmem:[%s11963_s10 + $0xd8] sm:$0xff]  ;;  %v8596_v38 = vpack.c.bf16 %v7054_v35, %v7053_v26  ;;  %v8623_v5 = vpack.c.bf16 %v7086_v36, %v7085_v34 }
 0x4a8   : > { %6950 = vmatprep.subr.bf16.mxu1 %v9532_v32  ;;  %6808 = vmatprep.mubr.bf16.mxu0 %v9609_v15  ;;  %v8598_v32 = vpack.c.bf16 %v7072_v39, %v7071_v0 }
 0x4a9   : > { %6980 = vmatprep.mubr.bf16.mxu1 %v9609_v15  ;;  %v9544_v15 = vld [vmem:[%s11960_s7 + $0x66c] ss:$16 sps:$4 sm:$0xff]  }
 0x4aa   : > { %6779 = vmatpush1.bf16.msra.mxu0 %v9527_v4  ;;  %v7055_v4 = vld [vmem:[%s11963_s10 + $0x50] sm:$0xff] }
 0x4ab   : > { %6951 = vmatpush1.bf16.msra.mxu1 %v9530_v37  ;;  %6780 = vmatprep.subr.bf16.mxu0 %v9535_v40  ;;  %v7056_v37 = vld [vmem:[%s11963_s10 + $0x58] sm:$0xff]  ;;  %v7087_v40 = vld [vmem:[%s11963_s10 + $0x150] sm:$0xff] }
 0x4ac   : > { %6952 = vmatprep.subr.bf16.mxu1 %v9538_v50  ;;  %v7088_v50 = vld [vmem:[%s11963_s10 + $0x158] sm:$0xff] }
 0x4ae   : > { %6781 = vmatpush1.bf16.msra.mxu0 %v9533_v46  ;;  %v8600_v46 = vpack.c.bf16 %v7056_v37, %v7055_v4 }
 0x4af   : > { %6953 = vmatpush1.bf16.msra.mxu1 %v9536_v16  ;;  %6782 = vmatprep.subr.bf16.mxu0 %v9541_v47  ;;  %v8626_v16 = vpack.c.bf16 %v7088_v50, %v7087_v40  ;;  %v7089_v47 = vld [vmem:[%s11963_s10 + $0x160] sm:$0xff] }
 0x4b0   : > { %6954 = vmatprep.subr.bf16.mxu1 %v9544_v15  ;;  %v7090_v15 = vld [vmem:[%s11963_s10 + $0x168] sm:$0xff] }
 0x4b1   : > { %v8629_v48 = vpack.c.bf16 %v7090_v15, %v7089_v47 }
 0x4b2   : > { %6783 = vmatpush1.bf16.msra.mxu0 %v9539_v49  ;;  %v7092_v49 = vld [vmem:[%s11963_s10 + $0x178] sm:$0xff] }
 0x4b3   : > { %6955 = vmatpush1.bf16.msra.mxu1 %v9542_v51  ;;  %8579 = vmatprep.subr.bf16.mxu0 %v8578_v53  ;;  %v8632_v51 = vpack.c.bf16 %v7092_v49, %v7091_v11  ;;  %v7074_v53 = vld [vmem:[%s11963_s10 + $0xe8] sm:$0xff] }
 0x4b4   : > { %8610 = vmatprep.subr.bf16.mxu1 %v9612_v62  ;;  %v8602_v41 = vpack.c.bf16 %v7074_v53, %v7073_v52 }
 0x4b5   : > { %8073 = vmatmul.mubr.msk.bf16.vlgmr.msra.gmra.mrb[24].mxu0 %vm5256_vm7, %v10613_v61 }
 0x4b6   : > { %8074 = vmatmul.mubr.msk.bf16.vlgmr.msra.gmra.mrb[44].mxu1 %vm5256_vm7, %v10613_v61  ;;  %8581 = vmatpush3.bf16.msra.mxu0 %v8580_v57  ;;  %v7082_v61 = vld [vmem:[%s11963_s10 + $0x128] sm:$0xff] }
 0x4b7   : > { %8612 = vmatpush1.bf16.msra.mxu1 %v8611_v42  ;;  %8583 = vmatprep.subr.bf16.mxu0 %v8582_v59  ;;  %v8617_v27 = vpack.c.bf16 %v7082_v61, %v7081_v7  ;;  %v7094_v57 = vld [vmem:[%s11963_s10 + $0x188] sm:$0xff]  ;;  %v7076_v59 = vld [vmem:[%s11963_s10 + $0xf8] sm:$0xff]  ;;  %v6991_v7 = vld [vmem:[%s11962_s9] sm:$0xf] }
 0x4b8   : > { %8613 = vmatprep.subr.bf16.mxu1 %v9612_v62  ;;  %v8635_v42 = vpack.c.bf16 %v7094_v57, %v7093_v54  ;;  %v8606_v60 = vpack.c.bf16 %v7076_v59, %v7075_v58  ;;  %v7004_v12 = vrot.slane %v6991_v7, %v3649_v14  ;;  %v7000_v43 = vrot.slane %v6991_v7, %v3645_v19 }
 0x4ba   : > { %8585 = vmatpush3.bf16.msra.mxu0 %v8584_v10  ;;  %v8608_v10 = vpack.c.bf16 %v7060_v1, %v7059_v44 }
 0x4bb   : > { %8615 = vmatpush1.bf16.msra.mxu1 %v8614_v6  ;;  %8587 = vmatprep.subr.bf16.mxu0 %v8586_v23  ;;  %v8638_v6 = vpack.c.bf16 %v7096_v8, %v7095_v2  ;;  %v6996_v23 = vrot.slane %v6991_v7, %v3641_v13 }
 0x4bc   : > { %8616 = vmatprep.subr.bf16.mxu1 %v9612_v62 }
 0x4be   : > { %8589 = vmatpush3.bf16.msra.mxu0 %v8588_v22 }
 0x4bf   : > { %8618 = vmatpush1.bf16.msra.mxu1 %v8617_v27  ;;  %8591 = vmatprep.subr.bf16.mxu0 %v8590_v29 }
 0x4c0   : > { %8619 = vmatprep.subr.bf16.mxu1 %v9612_v62 }
 0x4c2   : > { %8593 = vmatpush3.bf16.msra.mxu0 %v8592_v45 }
 0x4c3   : > { %8621 = vmatpush1.bf16.msra.mxu1 %v8620_v24  ;;  %8595 = vmatprep.subr.bf16.mxu0 %v8594_v25 }
 0x4c4   : > { %8622 = vmatprep.subr.bf16.mxu1 %v9612_v62 }
 0x4c6   : > { %8597 = vmatpush3.bf16.msra.mxu0 %v8596_v38 }
 0x4c7   : > { %8624 = vmatpush1.bf16.msra.mxu1 %v8623_v5  ;;  %8599 = vmatprep.subr.bf16.mxu0 %v8598_v32 }
 0x4c8   : > { %8625 = vmatprep.subr.bf16.mxu1 %v9612_v62 }
 0x4ca   : > { %8601 = vmatpush3.bf16.msra.mxu0 %v8600_v46  ;;  %v9613_v46 = vmov 1966171168  }
 0x4cb   : > { %8627 = vmatpush1.bf16.msra.mxu1 %v8626_v16  ;;  %8603 = vmatprep.subr.bf16.mxu0 %v8602_v41  ;;  %v7257_v16 = vunpack.c.l.s4 %v9613_v46 }
 0x4cc   : > { %8628 = vmatprep.subr.bf16.mxu1 %v9612_v62 }
 0x4cd   : > { %v7258_v47 = vunpack.c.0.s8 %v7257_v16 }
 0x4ce   : > { %8605 = vmatpush3.bf16.msra.mxu0 %v8604_v55 }
 0x4cf   : > { %8630 = vmatpush1.bf16.msra.mxu1 %v8629_v48  ;;  %8607 = vmatprep.subr.bf16.mxu0 %v8606_v60  ;;  %v7261_v52 = vsub.s32 %v7258_v47, %v10536_v9 }
 0x4d0   : > { %8631 = vmatprep.subr.bf16.mxu1 %v9612_v62 }
 0x4d2   : > { %8609 = vmatpush3.bf16.msra.mxu0 %v8608_v10 }
 0x4d3   : > { %8633 = vmatpush1.bf16.msra.mxu1 %v8632_v51 }
 0x4d4   : > { %8634 = vmatprep.subr.bf16.mxu1 %v9612_v62 }
 0x4d7   : > { %8636 = vmatpush1.bf16.msra.mxu1 %v8635_v42 }
 0x4d8   : > { %8637 = vmatprep.subr.bf16.mxu1 %v9612_v62  ;;  %v7008_v62 = vrot.slane %v6991_v7, %v3653_v20 }
 0x4db   : > { %8639 = vmatpush1.bf16.msra.mxu1 %v8638_v6 }
 0x588   : > { %v6810_v61 = vpop.f32.mrb[24].mxu0 }
 0x589   : > { %v7013_v17 = vadd.f32 %v6996_v23, %v6810_v61  ;;  %v6982_v18 = vpop.f32.mrb[44].mxu1  ;;  %v6812_v22 = vpop.f32.mrb[25].mxu0 }
 0x58a   : > { %v7015_v27 = vadd.f32 %v7004_v12, %v6982_v18  ;;  %v7014_v28 = vadd.f32 %v7000_v43, %v6812_v22  ;;  %v6984_v29 = vpop.f32.mrb[45].mxu1  ;;  %v6814_v3 = vpop.f32.mrb[26].mxu0 }
 0x58b   : > { %v7029_v30 = vmul.f32 0.01, %v7013_v17  ;;  %v7016_v63 = vadd.f32 %v7008_v62, %v6984_v29  ;;  %v7017_v13 = vadd.f32 %v6996_v23, %v6814_v3  ;;  %v6986_v31 = vpop.f32.mrb[46].mxu1  ;;  %v6816_v33 = vpop.f32.mrb[27].mxu0  ;;  %vm7021_vm8 = vcmp.gt.f32.partialorder %v7013_v17, 0.0 }
 0x58c   : > { %v7031_v14 = vmul.f32 0.01, %v7015_v27  ;;  %v7030_v45 = vmul.f32 0.01, %v7014_v28  ;;  %v7019_v19 = vadd.f32 %v7004_v12, %v6986_v31  ;;  %v6988_v24 = vpop.f32.mrb[47].mxu1  ;;  %vm7023_vm9 = vcmp.gt.f32.partialorder %v7015_v27, 0.0 }
 0x58d   : > { %vm7024_vm10 = vcmp.gt.f32.partialorder %v7016_v63, 0.0  ;;  %v7032_v20 = vmul.f32 0.01, %v7016_v63  ;;  %v7018_v34 = vadd.f32 %v7000_v43, %v6816_v33  ;;  %v7033_v25 = vmul.f32 0.01, %v7017_v13 }
 0x58e   : > { %v7035_v26 = vmul.f32 0.01, %v7019_v19  ;;  %v7020_v35 = vadd.f32 %v7008_v62, %v6988_v24  ;;  %vm7022_vm11 = vcmp.gt.f32.partialorder %v7014_v28, 0.0  ;;  %v7037_v38 = vsel %vm7021_vm8, %v7013_v17, %v7029_v30  ;;  %v7253_v62 = vld [vmem:[%s11964_s11] sm:$0x1] }
 0x58f   : > { %v7034_v36 = vmul.f32 0.01, %v7018_v34  ;;  %v7038_v0 = vsel %vm7022_vm11, %v7014_v28, %v7030_v45  ;;  %v7040_v39 = vsel %vm7024_vm10, %v7016_v63, %v7032_v20  ;;  %v7039_v32 = vsel %vm7023_vm9, %v7015_v27, %v7031_v14 }
 0x590   : > { %vm7028_vm12 = vcmp.gt.f32.partialorder %v7020_v35, 0.0  ;;  %v7036_v5 = vmul.f32 0.01, %v7020_v35  ;;  %7167 = vmatprep.mubr.f32.mxu0 %v7038_v0  ;;  %8075 = vmatprep.mubr.msk.f32.mxu1 %vm765_vm1, %v7040_v39  ;;  %vm7026_vm13 = vcmp.gt.f32.partialorder %v7018_v34, 0.0  ;;  %vm7025_vm14 = vcmp.gt.f32.partialorder %v7017_v13, 0.0 }
 0x591   : > { %7168 = vmatmul.mubr.f32.vlgmr.msra.gmra.mrb[28].mxu0 %v7037_v38  ;;  %7243 = vmatmul.mubr.f32.vlgmr.msra.gmra.mrb[48].mxu1 %v7039_v32  ;;  %v7042_v4 = vsel %vm7026_vm13, %v7018_v34, %v7034_v36  ;;  %vm7027_vm15 = vcmp.gt.f32.partialorder %v7019_v19, 0.0  ;;  %v7041_v40 = vsel %vm7025_vm14, %v7017_v13, %v7033_v25 }
 0x592   : > { %7172 = vmatprep.mubr.f32.mxu0 %v7042_v4  ;;  %v7044_v37 = vsel %vm7028_vm12, %v7020_v35, %v7036_v5  ;;  %v7043_v50 = vsel %vm7027_vm15, %v7019_v19, %v7035_v26 }
 0x593   : > { %8076 = vmatprep.mubr.msk.f32.mxu1 %vm765_vm1, %v7044_v37  ;;  %vm7352_vm1 = vcmask 24576  }
 0x595   : > { %7173 = vmatmul.mubr.f32.gmra.mrb[30].mxu0 %v7041_v40  ;;  %7248 = vmatmul.mubr.f32.gmra.mrb[50].mxu1 %v7043_v50 }
 0x664   : > { %v8228_v15 = vpop.f32.mrb[28].mxu0  ;;  %v7244_v48 = vpop.f32.mrb[48].mxu1 }
 0x665   : > { %v8229_v11 = vpop.f32.mrb[29].mxu0  ;;  %v7246_v49 = vpop.f32.mrb[49].mxu1 }
 0x666   : > { %v8230_v51 = vadd.f32 %v8229_v11, %v8228_v15 }
 0x668   : > { %v7245_v53 = vadd.f32 %v8230_v51, %v7244_v48  ;;  %v8231_v41 = vpop.f32.mrb[30].mxu0  ;;  %v7249_v56 = vpop.f32.mrb[50].mxu1 }
 0x669   : > { %v8232_v21 = vpop.f32.mrb[31].mxu0  ;;  %v7251_v54 = vpop.f32.mrb[51].mxu1 }
 0x66a   : > { %v7292_v55 = vcombine.high %v7245_v53, %v7245_v53  ;;  %v8233_v57 = vadd.f32 %v8232_v21, %v8231_v41  ;;  %v7262_v42 = vrot.slane %v7245_v53, %v7261_v52  ;;  %v7254_v17 = vadd.f32 %v7253_v62, %v7245_v53 }
 0x66c   : > { %v7250_v58 = vadd.f32 %v8233_v57, %v7249_v56  ;;  %v7263_v59 = vcombine.high %v7262_v42, %v7262_v42  ;;  %v7270_v60 = vrot.slane %v7262_v42, %v7261_v52  ;;  %v7299_v1 = vrot.slane %v7292_v55, %v7261_v52 }
 0x66e   : > { %v7277_v44 = vrot.slane %v7263_v59, %v7261_v52  ;;  %v7282_v8 = vcombine.high %v7270_v60, %v7270_v60  ;;  %v7311_v9 = vcombine.high %v7299_v1, %v7299_v1  ;;  %v7306_v10 = vrot.slane %v7299_v1, %v7261_v52 }
 0x66f   : > { %v7340_v7 = vrot.slane %v7250_v58, %v7261_v52 }
 0x670   : > { %7278 = vrot.lane.b32.xlu0 %v7277_v44, %s9614_s20  ;;  %v7287_v2 = vcombine.high %v7277_v44, %v7277_v44  ;;  %v7318_v6 = vrot.slane %v7311_v9, %v7261_v52  ;;  %v7323_v23 = vcombine.high %v7306_v10, %v7306_v10  ;;  %s8077_s20 = sshll.u32 %s9709_s25, 4  ;;  %s9622_s25 = smov [#allocation2]  }
 0x671   : > { %v7347_v43 = vrot.slane %v7340_v7, %v7261_v52  ;;  %s9549_s19 = sshll.u32 %s9622_s25, 4  ;;  %s9550_s19 = int_to_ptr.vmem [resolvable:$false] %s9549_s19 }
 0x672   : > { %7288 = vrot.lane.b32.xlu1 %v7287_v2, %s9615_s26  ;;  %v7328_v12 = vcombine.high %v7318_v6, %v7318_v6  ;;  %s420_s26 = scalar_lea.vmem [#allocation2], %s419_s30  ;;  %s9551_s23 = scalar_lea.vmem %s9550_s19, 32 }
 0x674   : > { %7283 = vrot.lane.b32.xlu0 %v7282_v8, %s9616_s28  ;;  %s7367_s28 = sshll.u32 %s420_s26, 4  ;;  %s11913_s28 = int_to_ptr.vmem [resolvable:$true] %s7367_s28 }
 0x675   : > { %p9552_p0 = scmp.lt.s32.totalorder %s11913_s28, %s9550_s19 }
 0x676   : > { %7307 = vrot.lane.b32.xlu1 %v7306_v10, %s9617_s29 }
 0x678   : > { %7319 = vrot.lane.b32.xlu0 %v7318_v6, %s9618_s15 }
 0x67a   : > { %7324 = vrot.lane.b32.xlu1 %v7323_v23, %s9619_s16  ;;  %s11911_s16 = scalar_lea.hbm %s11965_s12, %s8077_s20 }
 0x67c   : > { %7329 = vrot.lane.b32.xlu0 %v7328_v12, %s9620_s17  ;;  %s7355_s17 = scalar_lea.sflag [#allocation3], %s419_s30 }
 0x67e   : > { %7348 = vrot.lane.b32.xlu1 %v7347_v43, %s9621_s18  ;;  %s9545_s18 = scalar_lea.vmem %s11913_s28, 16 }
 0x67f   : > { %p9546_p11 = scmp.ne.s32.totalorder %s11913_s28, %s9545_s18  ;;  %p9553_p1 = scmp.lt.s32.totalorder %s9551_s23, %s9545_s18 }
 0x681   : > { %p9547_p12 = pnand %p9546_p11, %p9726_p5  ;;  %p9554_p2 = por %p9553_p1, %p9552_p0 }
 0x683   : > { %p9548_p13 = pneg %p9547_p12 }
 0x685   : > { %p9555_p3 = pnand %p9554_p2, %p9548_p13 }
 0x6e2   : > { %v7279_v61 = vpop.permute.xlu0 %7278 }
 0x6e3   : > { %v7281_v22 = vadd.f32 %v7279_v61, %v7254_v17 }
 0x6e4   : > { %v7289_v18 = vpop.permute.xlu1 %7288 }
 0x6e6   : > { %v7284_v27 = vpop.permute.xlu0 %7283 }
 0x6e7   : > { %v7286_v28 = vadd.f32 %v7284_v27, %v7281_v22 }
 0x6e8   : > { %v7308_v29 = vpop.permute.xlu1 %7307 }
 0x6e9   : > { %v7291_v3 = vadd.f32 %v7289_v18, %v7286_v28 }
 0x6ea   : > { %v7320_v30 = vpop.permute.xlu0 %7319 }
 0x6eb   : > { %v7310_v63 = vadd.f32 %v7308_v29, %v7291_v3 }
 0x6ec   : > { %v7325_v13 = vpop.permute.xlu1 %7324 }
 0x6ed   : > { %v7322_v31 = vadd.f32 %v7320_v30, %v7310_v63 }
 0x6ee   : > { %v7330_v14 = vpop.permute.xlu0 %7329 }
 0x6ef   : > { %v7327_v33 = vadd.f32 %v7325_v13, %v7322_v31 }
 0x6f0   : > { %v7349_v19 = vpop.permute.xlu1 %7348 }
 0x6f1   : > { %v7332_v45 = vadd.f32 %v7330_v14, %v7327_v33 }
 0x6f3   : > { %v7351_v24 = vadd.f32 %v7349_v19, %v7332_v45 }
 0x6f5   : > { %7353 = vst.msk [vmem:[%s420_s26] sm:$0x1] %vm7352_vm1, %v7351_v24 }
 0x6f6   : > { %9558 = shalt.err (!%p9555_p3)
}
 0x6f7   : > { %s9559_s30 = scalar_lea.hbm %s11911_s16, 16  ;;  %s9563_s29 = scalar_lea.hbm %s11965_s12, 32 }
 0x6f8   : > { %p9560_p4 = scmp.ne.s32.totalorder %s11911_s16, %s9559_s30  ;;  %p9564_p9 = scmp.lt.u32.totalorder %s11911_s16, %s11965_s12 }
 0x6f9   : > { %p9565_p10 = scmp.lt.u32.totalorder %s9563_s29, %s9559_s30  ;;  %p9567_p12 = scmp.lt.u32.totalorder %s9559_s30, %s11911_s16 }
 0x6fa   : > { %p9561_p7 = pnand %p9560_p4, %p9726_p5 }
 0x6fb   : > { %p9566_p11 = por %p9565_p10, %p9564_p9 }
 0x6fc   : > { %p9562_p8 = pneg %p9561_p7 }
 0x6fd   : > { %p9568_p13 = por %p9567_p12, %p9566_p11 }
 0x6ff   : > { %p9569_p0 = pnand %p9568_p13, %p9562_p8 }
 0x701   : > { %9572 = shalt.err (!%p9569_p0)
}
 0x702   : > { %8789 = dma.vmem_to_hbm [thread:$0]  (%p9726_p5), %s11913_s28, 16, %s11911_s16, %s7355_s17  }
 0x703 PF: > { %p8795_p1 = scmp.ge.s32.totalorder %s9607_s24, 2  ;;  %s7379_s18 = sand.u32 1, %s9595_s21  }
 0x704   : > { %s7380_s19 = scalar_lea.sflag [#allocation3], %s7379_s18 }
 0x705   : > { %p8792_p2 = pnand %p8795_p1, %p9730_p6 }
 0x707   : > { %9590 = dma.done.wait (!%p8792_p2), %s7380_s19, 16  }
 0x708   : > { %9592 = vsyncadd (!%p8792_p2), %s7380_s19, 4294967280  ;;  %s11971_s23 = sld [smem:[#allocation5_spill]]  ;;  %s11972_s30 = sld [smem:[#allocation6_spill]] }
 0x709   : > { %p22_p3 = scmp.ge.s32.totalorder %s9713_s27, 4   ;;  %s11973_s21 = smov %s9599_s22 }
 0x70a   : > { %s11976_s24 = smov %s9713_s27 }
 0x70b   :  { %24 = sbr.rel (!%p22_p3) target bundleno = 3 (0x3), region = 115 }
 0x70e   : > { %s11974_s22 = smov %s11971_s23  ;;  %s11975_s23 = smov %s11972_s30 }
 0x712   :  { %7384 = vsyncpa [#allocation3], 1 }
 0x713   :  { %7386 = vsyncpa [#allocation3 + $0x1], 1 }

</bundles_post_ra>
